<compile_context>
chip_gen: v5e
topology: v5e:2x2
jax: 0.10.0
libtpu: 0.0.40
codegen_flags: <defaults>
</compile_context>

<pallas_src>
import functools

import numpy as np
import jax
import jax.numpy as jnp
from jax import lax
from jax.experimental import pallas as pl
from jax.experimental.pallas import tpu as pltpu


# ----------------------------------------------------------------------------
# exact GELU (erf via XLA's f32 rational polynomial, Estrin + EUP reciprocal)
# ----------------------------------------------------------------------------
_ERF_ALPHA = (-2.72614225801306e-10, 2.77068142495902e-08, -2.10102402082508e-06,
              -5.69250639462346e-05, -7.34990630326855e-04, -2.95459980854025e-03,
              -1.60960333262415e-02)
_ERF_BETA = (-1.45660718464996e-05, -2.13374055278905e-04, -1.68282697438203e-03,
             -7.37332916720468e-03, -1.42647390514189e-02)


def _erf(x):
    x = jnp.clip(x, -4.0, 4.0)
    y = x * x
    y2 = y * y
    y4 = y2 * y2
    a0, a1, a2, a3, a4, a5, a6 = _ERF_ALPHA
    p = (a6 + a5 * y) + y2 * (a4 + a3 * y) + y4 * (a2 + a1 * y + a0 * y2)
    b0, b1, b2, b3, b4 = _ERF_BETA
    q = (b4 + b3 * y) + y2 * (b2 + b1 * y) + b0 * y4
    return jnp.clip((p * x) * pl.reciprocal(q, approx=True), -1.0, 1.0)


def _gelu(x):
    # exact GELU: 0.5 * x * (1 + erf(x / sqrt(2)))
    return 0.5 * x * (1.0 + _erf(x * 0.7071067811865475))


def _layer_norm(t, axis, gamma, beta):
    mu = jnp.mean(t, axis=axis, keepdims=True)
    var = jnp.mean((t - mu) ** 2, axis=axis, keepdims=True)
    return (t - mu) * lax.rsqrt(var + 1e-5) * gamma + beta


def _pairwise_sum(xs):
    xs = list(xs)
    while len(xs) > 1:
        nxt = [xs[i] + xs[i + 1] for i in range(0, len(xs) - 1, 2)]
        if len(xs) % 2:
            nxt.append(xs[-1])
        xs = nxt
    return xs[0]


# ----------------------------------------------------------------------------
# Fused forward kernel (whole network in one pallas_call)
# ----------------------------------------------------------------------------
def _fused_kernel(meta, x_ref, wslab_ref, pslab_ref, o_ref):
    f32, bf16 = jnp.float32, jnp.bfloat16

    def wget(m):                       # bf16 matmul-weight slab
        off, r, c = m
        return wslab_ref[off:off + r, 0:c]

    def pget(m):                       # f32 bias / norm-param slab
        off, r, c = m
        return pslab_ref[off:off + r, 0:c]

    Bc, S, F = x_ref.shape
    x = x_ref[...].astype(f32)                                    # (Bc, S, F)

    # ---- BiN, computed in (B, S, F) layout; y1/y2 folded into params ----
    mb = meta["bin"]
    mu_t = jnp.mean(x, axis=1, keepdims=True)
    std_t = jnp.sqrt(jnp.sum((x - mu_t) ** 2, axis=1, keepdims=True) / (S - 1))
    inv_t = jnp.where(std_t < 1e-4, 1.0, pl.reciprocal(std_t, approx=True))
    x2n = pget(mb["l2r"])[None] * ((x - mu_t) * inv_t) + pget(mb["B2r"])[None]
    mu_f = jnp.mean(x, axis=2, keepdims=True)
    std_f = jnp.sqrt(jnp.sum((x - mu_f) ** 2, axis=2, keepdims=True) / (F - 1))
    # TODO(synk): std_f is unguarded, matching the reference BiN behaviour.
    x1n = (pget(mb["l1c"])[None] * ((x - mu_f) * pl.reciprocal(std_f, approx=True))
           + pget(mb["B1c"])[None])
    a = (x1n + x2n).reshape(Bc * S, F)                            # (B*S, F)

    # ---- first Linear + GELU (batch folded into the matmul M dim) ----
    a = _gelu(jnp.dot(a.astype(bf16), wget(meta["first"]["w"]),
                      preferred_element_type=f32) + pget(meta["first"]["b"]))

    a3 = None
    num_blocks = len(meta["blocks"])
    for bi, blk in enumerate(meta["blocks"]):
        # -- hidden-dim MLP block: fc -> GELU -> fc2 -> (+res) -> LN -> GELU --
        h = blk["hid"]
        t = _gelu(jnp.dot(a.astype(bf16), wget(h["w1"]),
                          preferred_element_type=f32) + pget(h["b1"]))
        t = jnp.dot(t.astype(bf16), wget(h["w2"]),
                    preferred_element_type=f32) + pget(h["b2"])
        if h["w2"][2] == h["w1"][1]:                  # Dout == Din -> residual
            t = t + a
        a = _gelu(_layer_norm(t, -1, pget(h["g"]), pget(h["bt"])))

        # -- seq-dim MLP block: pre-transposed weights, batched 3-D einsums,
        #    hidden dim stays in lanes, LayerNorm reduces over the seq axis --
        s = blk["seq"]
        T, S_in = s["w1T"][1], s["w1T"][2]
        U = s["w2T"][1]
        Hc = a.shape[1]
        a3 = a.reshape(Bc, S_in, Hc)
        h2 = _gelu(jnp.einsum("bts,bsh->bth",
                              jnp.broadcast_to(wget(s["w1T"]), (Bc, T, S_in)),
                              a3.astype(bf16),
                              preferred_element_type=f32) + pget(s["b1c"])[None])
        t2 = jnp.einsum("but,bth->buh",
                        jnp.broadcast_to(wget(s["w2T"]), (Bc, U, T)),
                        h2.astype(bf16),
                        preferred_element_type=f32) + pget(s["b2c"])[None]
        if U == S_in:                                 # residual when seq kept
            t2 = t2 + a3
        a3 = _gelu(_layer_norm(t2, 1, pget(s["gc"])[None], pget(s["bc"])[None]))
        if bi + 1 < num_blocks:
            a = a3.reshape(Bc * U, Hc)                # back to (B*S, H)

    # ---- final head: flatten expressed as sum over seq-rows of batched dots,
    #      then the remaining Linear(+GELU) chain; ONE full-block store ----
    _, head_parts, head_b, head_g = meta["final"][0]
    s4 = a3.shape[1]
    terms = [jnp.dot(a3[:, si, :].astype(bf16), wget(head_parts[si]),
                     preferred_element_type=f32) for si in range(s4)]
    out = pget(head_b) + _pairwise_sum(terms)
    if head_g:
        out = _gelu(out)
    for _, wm, bm, gg in meta["final"][1:]:
        out = jnp.dot(out.astype(bf16), wget(wm),
                      preferred_element_type=f32) + pget(bm)
        if gg:
            out = _gelu(out)
    o_ref[...] = out.astype(o_ref.dtype)


# ----------------------------------------------------------------------------
# Parameter packing: everything into two (8,128)-tile-aligned slabs
# ----------------------------------------------------------------------------
def _round_up(v, m):
    return ((v + m - 1) // m) * m


class _Packer:
    """Packs many small 2-D arrays into one (rows, width) slab."""

    def __init__(self, row_align):
        self._align = row_align
        self._items = []
        self._rows = 0
        self._width = 1

    def add(self, arr):
        arr = np.asarray(arr, dtype=np.float32)
        if arr.ndim == 1:
            arr = arr.reshape(1, -1)
        off = self._rows
        self._items.append((off, arr))
        self._rows += _round_up(arr.shape[0], self._align)
        self._width = max(self._width, arr.shape[1])
        return (off, arr.shape[0], arr.shape[1])

    def build(self, dtype):
        width = _round_up(self._width, 128)
        rows = _round_up(max(self._rows, self._align), self._align)
        slab = np.zeros((rows, width), np.float32)
        for off, arr in self._items:
            slab[off:off + arr.shape[0], :arr.shape[1]] = arr
        return jnp.asarray(slab, dtype=dtype)


def _prepare_kernel_params(params):
    wp = _Packer(16)   # bf16 matmul weights (converted once, here)
    pp = _Packer(8)    # f32 biases / BiN / LayerNorm params

    bn = params["bin"]
    S = bn["l1"].shape[1]
    F = bn["l2"].shape[0]
    y1 = float(np.asarray(bn["y1"]).reshape(()))
    y2 = float(np.asarray(bn["y2"]).reshape(()))
    meta = {
        "bin": dict(
            l1c=pp.add(np.asarray(bn["l1"]).reshape(S, 1) * y1),
            B1c=pp.add(np.asarray(bn["B1"]).reshape(S, 1) * y1),
            l2r=pp.add(np.asarray(bn["l2"]).reshape(1, F) * y2),
            B2r=pp.add(np.asarray(bn["B2"]).reshape(1, F) * y2),
        ),
        "first": dict(w=wp.add(params["first"]["w"]),
                      b=pp.add(params["first"]["b"])),
        "blocks": [],
        "final": [],
    }
    for pf, ps in params["blocks"]:
        hid = dict(w1=wp.add(pf["w1"]), b1=pp.add(pf["b1"]),
                   w2=wp.add(pf["w2"]), b2=pp.add(pf["b2"]),
                   g=pp.add(pf["gamma"]), bt=pp.add(pf["beta"]))
        seq = dict(w1T=wp.add(np.asarray(ps["w1"]).T),
                   b1c=pp.add(np.asarray(ps["b1"]).reshape(-1, 1)),
                   w2T=wp.add(np.asarray(ps["w2"]).T),
                   b2c=pp.add(np.asarray(ps["b2"]).reshape(-1, 1)),
                   gc=pp.add(np.asarray(ps["gamma"]).reshape(-1, 1)),
                   bc=pp.add(np.asarray(ps["beta"]).reshape(-1, 1)))
        meta["blocks"].append(dict(hid=hid, seq=seq))

    # Split the head weight into per-seq-row (H4, D) chunks so the flatten of
    # the (B, S/4, H/4) activation becomes a tree-sum of batched dots.
    h4 = int(params["blocks"][-1][0]["w2"].shape[1])
    for li, (w, b, use_gelu) in enumerate(params["final"]):
        w = np.asarray(w, np.float32)
        if li == 0:
            s4 = w.shape[0] // h4
            parts = tuple(wp.add(w[si * h4:(si + 1) * h4, :]) for si in range(s4))
            meta["final"].append(("head", parts, pp.add(b), bool(use_gelu)))
        else:
            meta["final"].append(("dense", wp.add(w), pp.add(b), bool(use_gelu)))

    return wp.build(jnp.bfloat16), pp.build(jnp.float32), meta


# ----------------------------------------------------------------------------
# Wrapper: pallas_call plumbing
# ----------------------------------------------------------------------------
def mlplob_forward(x, params):
    # x: (B, seq_size, num_features)
    B, S, F = x.shape
    out_dim = int(params["final"][-1][0].shape[1])
    wslab, pslab, meta = _prepare_kernel_params(params)

    # Batch-chunk grid: feeds v7x's second TensorCore for larger batches; a
    # single fused step is best for tiny batches (and on v5e/v6e, 1 TC).
    grid_b = 2 if (B >= 16 and B % 16 == 0) else 1
    bc = B // grid_b

    # Explicit VMEM budget + fit check (everything stays resident).
    vmem_limit = 32 * 1024 * 1024
    hidden = int(params["first"]["w"].shape[1])
    est = (2 * (wslab.size * 2 + pslab.size * 4)      # double-buffered slabs
           + 8 * bc * S * 4 * hidden * 4              # ~8 live f32 activations
           + 2 * x.nbytes)
    assert est < vmem_limit // 2, (
        f"MLPLOB fused kernel estimated VMEM {est} bytes exceeds budget; "
        "fall back to a per-block grid / manual weight streaming.")

    kern = functools.partial(_fused_kernel, meta)
    return pl.pallas_call(
        kern,
        out_shape=jax.ShapeDtypeStruct((B, out_dim), x.dtype),
        grid=(grid_b,),
        in_specs=[
            pl.BlockSpec((bc, S, F), lambda i: (i, 0, 0)),
            pl.BlockSpec(wslab.shape, lambda i: (0, 0)),
            pl.BlockSpec(pslab.shape, lambda i: (0, 0)),
        ],
        out_specs=pl.BlockSpec((bc, out_dim), lambda i: (i, 0)),
        compiler_params=pltpu.CompilerParams(
            dimension_semantics=("parallel",),
            vmem_limit_bytes=vmem_limit,
        ),
    )(x, wslab, pslab)


# ----------------------------------------------------------------------------
# Deterministic parameter initialization (shapes mirror the PyTorch __init__)
# ----------------------------------------------------------------------------
def init_params(key, hidden_dim, num_layers, seq_size, num_features, output_dim):
    keys = list(jax.random.split(key, 256))
    idx = [0]

    def nk():
        k = keys[idx[0]]
        idx[0] += 1
        return k

    def linear_params(din, dout):
        bound = 1.0 / float(np.sqrt(din))
        w = jax.random.uniform(nk(), (din, dout), jnp.float32, -bound, bound)
        b = jax.random.uniform(nk(), (1, dout), jnp.float32, -bound, bound)
        return w, b

    def mlp_params(start, hidden, final):
        w1, b1 = linear_params(start, hidden)
        w2, b2 = linear_params(hidden, final)
        return dict(w1=w1, b1=b1, w2=w2, b2=b2,
                    gamma=jnp.ones((1, final), jnp.float32),
                    beta=jnp.zeros((1, final), jnp.float32))

    # BiN parameters (l1,B1 over time; l2,B2 over features; scalar mix weights)
    t1, d1 = seq_size, num_features
    l1 = jax.random.normal(nk(), (1, t1), jnp.float32) * float(np.sqrt(2.0 / (t1 + 1)))
    l2 = jax.random.normal(nk(), (d1, 1), jnp.float32) * float(np.sqrt(2.0 / (d1 + 1)))
    bin_p = dict(l1=l1, B1=jnp.zeros((1, t1), jnp.float32),
                 l2=l2, B2=jnp.zeros((d1, 1), jnp.float32),
                 y1=jnp.full((1, 1), 0.5, jnp.float32),
                 y2=jnp.full((1, 1), 0.5, jnp.float32))

    fw, fb = linear_params(num_features, hidden_dim)

    blocks = []
    for i in range(num_layers):
        if i != num_layers - 1:
            pf = mlp_params(hidden_dim, hidden_dim * 4, hidden_dim)
            ps = mlp_params(seq_size, seq_size * 4, seq_size)
        else:
            pf = mlp_params(hidden_dim, hidden_dim * 2, hidden_dim // 4)
            ps = mlp_params(seq_size, seq_size * 2, seq_size // 4)
        blocks.append((pf, ps))

    finals = []
    total = hidden_dim // 4 * (seq_size // 4)
    while total > 128:
        w, b = linear_params(total, total // 4)
        finals.append((w, b, True))
        total //= 4
    w, b = linear_params(total, output_dim)
    finals.append((w, b, False))

    return dict(bin=bin_p, first=dict(w=fw, b=fb), blocks=blocks, final=finals)


# ----------------------------------------------------------------------------
# Pure-JAX reference (numerical sanity check)
# ----------------------------------------------------------------------------
def _ref_gelu(x):
    return 0.5 * x * (1.0 + jax.scipy.special.erf(x / np.sqrt(2.0)))


def _ref_bin(x, p):
    F, T = x.shape[1], x.shape[2]
    mu_t = jnp.mean(x, axis=2, keepdims=True)
    std_t = jnp.sqrt(jnp.sum((x - mu_t) ** 2, axis=2, keepdims=True) / (T - 1))
    std_t = jnp.where(std_t < 1e-4, 1.0, std_t)
    x2n = p["l2"][None] * ((x - mu_t) / std_t) + p["B2"][None]
    mu_f = jnp.mean(x, axis=1, keepdims=True)
    std_f = jnp.sqrt(jnp.sum((x - mu_f) ** 2, axis=1, keepdims=True) / (F - 1))
    x1n = p["l1"][None] * ((x - mu_f) / std_f) + p["B1"][None]
    return p["y1"][None] * x1n + p["y2"][None] * x2n


def _ref_mlp_block(x, p):
    t = _ref_gelu(jnp.dot(x, p["w1"]) + p["b1"])
    t = jnp.dot(t, p["w2"]) + p["b2"]
    if t.shape[-1] == x.shape[-1]:
        t = t + x
    mu = jnp.mean(t, axis=-1, keepdims=True)
    var = jnp.mean((t - mu) ** 2, axis=-1, keepdims=True)
    y = (t - mu) / jnp.sqrt(var + 1e-5) * p["gamma"] + p["beta"]
    return _ref_gelu(y)


def _ref_forward(x, params):
    xt = jnp.transpose(x, (0, 2, 1))
    xt = _ref_bin(xt, params["bin"])
    x = jnp.transpose(xt, (0, 2, 1))
    x = _ref_gelu(jnp.dot(x, params["first"]["w"]) + params["first"]["b"])
    for pf, ps in params["blocks"]:
        x = _ref_mlp_block(x, pf)
        x = jnp.transpose(x, (0, 2, 1))
        x = _ref_mlp_block(x, ps)
        x = jnp.transpose(x, (0, 2, 1))
    out = x.reshape(x.shape[0], -1)
    for w, b, use_gelu in params["final"]:
        out = jnp.dot(out, w) + b
        if use_gelu:
            out = _ref_gelu(out)
    return out


# ----------------------------------------------------------------------------
if __name__ == "__main__":
    batch = 2
    hidden_dim = 32
    num_layers = 2
    seq_size = 8
    num_features = 16
    output_dim = 3

    key = jax.random.PRNGKey(0)
    kx, kp = jax.random.split(key)
    x = jax.random.normal(kx, (batch, seq_size, num_features), jnp.float32)
    params = init_params(kp, hidden_dim, num_layers, seq_size, num_features,
                         output_dim)

    out = mlplob_forward(x, params)
    out = jax.block_until_ready(out)
    assert out.shape == (batch, output_dim)

    ref = _ref_forward(x, params)
    np.testing.assert_allclose(np.asarray(out), np.asarray(ref),
                               rtol=2e-2, atol=2e-2)

    print("KERNEL_OK")
</pallas_src>

<mosaic_0001>
module attributes {stable_mosaic.version = 11 : i64} {
  func.func @_fused_kernel(%arg0: i32, %arg1: memref<2x8x16xf32, #tpu.memory_space<vmem>>, %arg2: memref<384x128xbf16, #tpu.memory_space<vmem>>, %arg3: memref<208x128xf32, #tpu.memory_space<vmem>>, %arg4: memref<2x3xf32, #tpu.memory_space<vmem>>) attributes {dimension_semantics = [#tpu.dimension_semantics<parallel>], iteration_bounds = array<i64: 1>, scalar_prefetch = 0 : i64, scratch_operands = 0 : i64, tpu.core_type = #tpu.core_type<tc>, window_params = [{transform_indices = @transform_0, window_bounds = array<i64: 2, 8, 16>}, {pipeline_mode = #tpu.pipeline_mode<synchronous>, transform_indices = @transform_1, window_bounds = array<i64: 384, 128>}, {pipeline_mode = #tpu.pipeline_mode<synchronous>, transform_indices = @transform_2, window_bounds = array<i64: 208, 128>}, {transform_indices = @transform_3, window_bounds = array<i64: 2, 3>}]} {
    %c0 = arith.constant 0 : index
    %c0_0 = arith.constant 0 : index
    %c0_1 = arith.constant 0 : index
    %0 = vector.load %arg1[%c0, %c0_0, %c0_1] : memref<2x8x16xf32, #tpu.memory_space<vmem>>, vector<2x8x16xf32>
    %cst = arith.constant dense<0.000000e+00> : vector<2x16xf32>
    %1 = vector.multi_reduction <add>, %0, %cst [1] : vector<2x8x16xf32> to vector<2x16xf32>
    %2 = vector.shape_cast %1 : vector<2x16xf32> to vector<2x1x16xf32>
    %cst_2 = arith.constant 8.000000e+00 : f32
    %3 = vector.broadcast %cst_2 : f32 to vector<2x1x16xf32>
    %4 = arith.divf %2, %3 : vector<2x1x16xf32>
    %5 = vector.broadcast %4 : vector<2x1x16xf32> to vector<2x8x16xf32>
    %6 = arith.subf %0, %5 : vector<2x8x16xf32>
    %7 = arith.mulf %6, %6 : vector<2x8x16xf32>
    %cst_3 = arith.constant dense<0.000000e+00> : vector<2x16xf32>
    %8 = vector.multi_reduction <add>, %7, %cst_3 [1] : vector<2x8x16xf32> to vector<2x16xf32>
    %9 = vector.shape_cast %8 : vector<2x16xf32> to vector<2x1x16xf32>
    %cst_4 = arith.constant 7.000000e+00 : f32
    %10 = vector.broadcast %cst_4 : f32 to vector<2x1x16xf32>
    %11 = arith.divf %9, %10 : vector<2x1x16xf32>
    %12 = math.sqrt %11 : vector<2x1x16xf32>
    %cst_5 = arith.constant 9.99999974E-5 : f32
    %13 = vector.broadcast %cst_5 : f32 to vector<2x1x16xf32>
    %14 = arith.cmpf olt, %12, %13 : vector<2x1x16xf32>
    %15 = tpu.reciprocal %12 {approx = true} : vector<2x1x16xf32> -> vector<2x1x16xf32>
    %cst_6 = arith.constant 1.000000e+00 : f32
    %16 = vector.broadcast %cst_6 : f32 to vector<2x1x16xf32>
    %17 = arith.select %14, %16, %15 : vector<2x1x16xi1>, vector<2x1x16xf32>
    %c16 = arith.constant 16 : index
    %c0_7 = arith.constant 0 : index
    %18 = vector.load %arg3[%c16, %c0_7] : memref<208x128xf32, #tpu.memory_space<vmem>>, vector<1x16xf32>
    %19 = vector.shape_cast %18 : vector<1x16xf32> to vector<1x1x16xf32>
    %20 = vector.broadcast %4 : vector<2x1x16xf32> to vector<2x8x16xf32>
    %21 = arith.subf %0, %20 : vector<2x8x16xf32>
    %22 = vector.broadcast %17 : vector<2x1x16xf32> to vector<2x8x16xf32>
    %23 = arith.mulf %21, %22 : vector<2x8x16xf32>
    %24 = vector.broadcast %19 : vector<1x1x16xf32> to vector<2x8x16xf32>
    %25 = arith.mulf %24, %23 : vector<2x8x16xf32>
    %c24 = arith.constant 24 : index
    %c0_8 = arith.constant 0 : index
    %26 = vector.load %arg3[%c24, %c0_8] : memref<208x128xf32, #tpu.memory_space<vmem>>, vector<1x16xf32>
    %27 = vector.shape_cast %26 : vector<1x16xf32> to vector<1x1x16xf32>
    %28 = vector.broadcast %27 : vector<1x1x16xf32> to vector<2x8x16xf32>
    %29 = arith.addf %25, %28 : vector<2x8x16xf32>
    %cst_9 = arith.constant dense<0.000000e+00> : vector<2x8xf32>
    %30 = vector.multi_reduction <add>, %0, %cst_9 [2] : vector<2x8x16xf32> to vector<2x8xf32>
    %31 = vector.shape_cast %30 : vector<2x8xf32> to vector<2x8x1xf32>
    %cst_10 = arith.constant 1.600000e+01 : f32
    %32 = vector.broadcast %cst_10 : f32 to vector<2x8x1xf32>
    %33 = arith.divf %31, %32 : vector<2x8x1xf32>
    %34 = vector.broadcast %33 : vector<2x8x1xf32> to vector<2x8x16xf32>
    %35 = arith.subf %0, %34 : vector<2x8x16xf32>
    %36 = arith.mulf %35, %35 : vector<2x8x16xf32>
    %cst_11 = arith.constant dense<0.000000e+00> : vector<2x8xf32>
    %37 = vector.multi_reduction <add>, %36, %cst_11 [2] : vector<2x8x16xf32> to vector<2x8xf32>
    %38 = vector.shape_cast %37 : vector<2x8xf32> to vector<2x8x1xf32>
    %cst_12 = arith.constant 1.500000e+01 : f32
    %39 = vector.broadcast %cst_12 : f32 to vector<2x8x1xf32>
    %40 = arith.divf %38, %39 : vector<2x8x1xf32>
    %41 = math.sqrt %40 : vector<2x8x1xf32>
    %c0_13 = arith.constant 0 : index
    %c0_14 = arith.constant 0 : index
    %42 = vector.load %arg3[%c0_13, %c0_14] : memref<208x128xf32, #tpu.memory_space<vmem>>, vector<8x1xf32>
    %43 = vector.shape_cast %42 : vector<8x1xf32> to vector<1x8x1xf32>
    %44 = vector.broadcast %33 : vector<2x8x1xf32> to vector<2x8x16xf32>
    %45 = arith.subf %0, %44 : vector<2x8x16xf32>
    %46 = tpu.reciprocal %41 {approx = true} : vector<2x8x1xf32> -> vector<2x8x1xf32>
    %47 = vector.broadcast %46 : vector<2x8x1xf32> to vector<2x8x16xf32>
    %48 = arith.mulf %45, %47 : vector<2x8x16xf32>
    %49 = vector.broadcast %43 : vector<1x8x1xf32> to vector<2x8x16xf32>
    %50 = arith.mulf %49, %48 : vector<2x8x16xf32>
    %c8 = arith.constant 8 : index
    %c0_15 = arith.constant 0 : index
    %51 = vector.load %arg3[%c8, %c0_15] : memref<208x128xf32, #tpu.memory_space<vmem>>, vector<8x1xf32>
    %52 = vector.shape_cast %51 : vector<8x1xf32> to vector<1x8x1xf32>
    %53 = vector.broadcast %52 : vector<1x8x1xf32> to vector<2x8x16xf32>
    %54 = arith.addf %50, %53 : vector<2x8x16xf32>
    %55 = arith.addf %54, %29 : vector<2x8x16xf32>
    %56 = vector.shape_cast %55 : vector<2x8x16xf32> to vector<16x16xf32>
    %57 = arith.truncf %56 : vector<16x16xf32> to vector<16x16xbf16>
    %c0_16 = arith.constant 0 : index
    %c0_17 = arith.constant 0 : index
    %58 = vector.load %arg2[%c0_16, %c0_17] : memref<384x128xbf16, #tpu.memory_space<vmem>>, vector<16x32xbf16>
    %cst_18 = arith.constant dense<0.000000e+00> : vector<16x32xf32>
    %59 = tpu.matmul %57, %58, %cst_18 {dimension_numbers = #tpu.dot_dimension_numbers<[1], [0], [0], [1], [0, 0, 1, 1], [], []>} : vector<16x16xbf16>, vector<16x32xbf16>, vector<16x32xf32> -> vector<16x32xf32>
    %c32 = arith.constant 32 : index
    %c0_19 = arith.constant 0 : index
    %60 = vector.load %arg3[%c32, %c0_19] : memref<208x128xf32, #tpu.memory_space<vmem>>, vector<1x32xf32>
    %61 = vector.broadcast %60 : vector<1x32xf32> to vector<16x32xf32>
    %62 = arith.addf %59, %61 : vector<16x32xf32>
    %cst_20 = arith.constant 5.000000e-01 : f32
    %63 = vector.broadcast %cst_20 : f32 to vector<16x32xf32>
    %64 = arith.mulf %63, %62 : vector<16x32xf32>
    %cst_21 = arith.constant 0.707106769 : f32
    %65 = vector.broadcast %cst_21 : f32 to vector<16x32xf32>
    %66 = arith.mulf %62, %65 : vector<16x32xf32>
    %cst_22 = arith.constant -4.000000e+00 : f32
    %cst_23 = arith.constant 4.000000e+00 : f32
    %67 = vector.broadcast %cst_22 : f32 to vector<16x32xf32>
    %68 = arith.maximumf %67, %66 : vector<16x32xf32>
    %69 = vector.broadcast %cst_23 : f32 to vector<16x32xf32>
    %70 = arith.minimumf %69, %68 : vector<16x32xf32>
    %71 = arith.mulf %70, %70 : vector<16x32xf32>
    %72 = arith.mulf %71, %71 : vector<16x32xf32>
    %73 = arith.mulf %72, %72 : vector<16x32xf32>
    %cst_24 = arith.constant -2.954600e-03 : f32
    %74 = vector.broadcast %cst_24 : f32 to vector<16x32xf32>
    %75 = arith.mulf %74, %71 : vector<16x32xf32>
    %cst_25 = arith.constant -0.0160960332 : f32
    %76 = vector.broadcast %cst_25 : f32 to vector<16x32xf32>
    %77 = arith.addf %76, %75 : vector<16x32xf32>
    %cst_26 = arith.constant -5.69250624E-5 : f32
    %78 = vector.broadcast %cst_26 : f32 to vector<16x32xf32>
    %79 = arith.mulf %78, %71 : vector<16x32xf32>
    %cst_27 = arith.constant -7.34990637E-4 : f32
    %80 = vector.broadcast %cst_27 : f32 to vector<16x32xf32>
    %81 = arith.addf %80, %79 : vector<16x32xf32>
    %82 = arith.mulf %72, %81 : vector<16x32xf32>
    %83 = arith.addf %77, %82 : vector<16x32xf32>
    %cst_28 = arith.constant 2.77068146E-8 : f32
    %84 = vector.broadcast %cst_28 : f32 to vector<16x32xf32>
    %85 = arith.mulf %84, %71 : vector<16x32xf32>
    %cst_29 = arith.constant -2.10102394E-6 : f32
    %86 = vector.broadcast %cst_29 : f32 to vector<16x32xf32>
    %87 = arith.addf %86, %85 : vector<16x32xf32>
    %cst_30 = arith.constant -2.72614237E-10 : f32
    %88 = vector.broadcast %cst_30 : f32 to vector<16x32xf32>
    %89 = arith.mulf %88, %72 : vector<16x32xf32>
    %90 = arith.addf %87, %89 : vector<16x32xf32>
    %91 = arith.mulf %73, %90 : vector<16x32xf32>
    %92 = arith.addf %83, %91 : vector<16x32xf32>
    %cst_31 = arith.constant -0.00737332925 : f32
    %93 = vector.broadcast %cst_31 : f32 to vector<16x32xf32>
    %94 = arith.mulf %93, %71 : vector<16x32xf32>
    %cst_32 = arith.constant -0.0142647391 : f32
    %95 = vector.broadcast %cst_32 : f32 to vector<16x32xf32>
    %96 = arith.addf %95, %94 : vector<16x32xf32>
    %cst_33 = arith.constant -2.13374049E-4 : f32
    %97 = vector.broadcast %cst_33 : f32 to vector<16x32xf32>
    %98 = arith.mulf %97, %71 : vector<16x32xf32>
    %cst_34 = arith.constant -0.00168282702 : f32
    %99 = vector.broadcast %cst_34 : f32 to vector<16x32xf32>
    %100 = arith.addf %99, %98 : vector<16x32xf32>
    %101 = arith.mulf %72, %100 : vector<16x32xf32>
    %102 = arith.addf %96, %101 : vector<16x32xf32>
    %cst_35 = arith.constant -1.45660715E-5 : f32
    %103 = vector.broadcast %cst_35 : f32 to vector<16x32xf32>
    %104 = arith.mulf %103, %73 : vector<16x32xf32>
    %105 = arith.addf %102, %104 : vector<16x32xf32>
    %106 = arith.mulf %92, %70 : vector<16x32xf32>
    %107 = tpu.reciprocal %105 {approx = true} : vector<16x32xf32> -> vector<16x32xf32>
    %108 = arith.mulf %106, %107 : vector<16x32xf32>
    %cst_36 = arith.constant -1.000000e+00 : f32
    %cst_37 = arith.constant 1.000000e+00 : f32
    %109 = vector.broadcast %cst_36 : f32 to vector<16x32xf32>
    %110 = arith.maximumf %109, %108 : vector<16x32xf32>
    %111 = vector.broadcast %cst_37 : f32 to vector<16x32xf32>
    %112 = arith.minimumf %111, %110 : vector<16x32xf32>
    %cst_38 = arith.constant 1.000000e+00 : f32
    %113 = vector.broadcast %cst_38 : f32 to vector<16x32xf32>
    %114 = arith.addf %113, %112 : vector<16x32xf32>
    %115 = arith.mulf %64, %114 : vector<16x32xf32>
    %116 = arith.truncf %115 : vector<16x32xf32> to vector<16x32xbf16>
    %c16_39 = arith.constant 16 : index
    %c0_40 = arith.constant 0 : index
    %117 = vector.load %arg2[%c16_39, %c0_40] : memref<384x128xbf16, #tpu.memory_space<vmem>>, vector<32x128xbf16>
    %cst_41 = arith.constant dense<0.000000e+00> : vector<16x128xf32>
    %118 = tpu.matmul %116, %117, %cst_41 {dimension_numbers = #tpu.dot_dimension_numbers<[1], [0], [0], [1], [0, 0, 1, 1], [], []>} : vector<16x32xbf16>, vector<32x128xbf16>, vector<16x128xf32> -> vector<16x128xf32>
    %c40 = arith.constant 40 : index
    %c0_42 = arith.constant 0 : index
    %119 = vector.load %arg3[%c40, %c0_42] : memref<208x128xf32, #tpu.memory_space<vmem>>, vector<1x128xf32>
    %120 = vector.broadcast %119 : vector<1x128xf32> to vector<16x128xf32>
    %121 = arith.addf %118, %120 : vector<16x128xf32>
    %cst_43 = arith.constant 5.000000e-01 : f32
    %122 = vector.broadcast %cst_43 : f32 to vector<16x128xf32>
    %123 = arith.mulf %122, %121 : vector<16x128xf32>
    %cst_44 = arith.constant 0.707106769 : f32
    %124 = vector.broadcast %cst_44 : f32 to vector<16x128xf32>
    %125 = arith.mulf %121, %124 : vector<16x128xf32>
    %cst_45 = arith.constant -4.000000e+00 : f32
    %cst_46 = arith.constant 4.000000e+00 : f32
    %126 = vector.broadcast %cst_45 : f32 to vector<16x128xf32>
    %127 = arith.maximumf %126, %125 : vector<16x128xf32>
    %128 = vector.broadcast %cst_46 : f32 to vector<16x128xf32>
    %129 = arith.minimumf %128, %127 : vector<16x128xf32>
    %130 = arith.mulf %129, %129 : vector<16x128xf32>
    %131 = arith.mulf %130, %130 : vector<16x128xf32>
    %132 = arith.mulf %131, %131 : vector<16x128xf32>
    %cst_47 = arith.constant -2.954600e-03 : f32
    %133 = vector.broadcast %cst_47 : f32 to vector<16x128xf32>
    %134 = arith.mulf %133, %130 : vector<16x128xf32>
    %cst_48 = arith.constant -0.0160960332 : f32
    %135 = vector.broadcast %cst_48 : f32 to vector<16x128xf32>
    %136 = arith.addf %135, %134 : vector<16x128xf32>
    %cst_49 = arith.constant -5.69250624E-5 : f32
    %137 = vector.broadcast %cst_49 : f32 to vector<16x128xf32>
    %138 = arith.mulf %137, %130 : vector<16x128xf32>
    %cst_50 = arith.constant -7.34990637E-4 : f32
    %139 = vector.broadcast %cst_50 : f32 to vector<16x128xf32>
    %140 = arith.addf %139, %138 : vector<16x128xf32>
    %141 = arith.mulf %131, %140 : vector<16x128xf32>
    %142 = arith.addf %136, %141 : vector<16x128xf32>
    %cst_51 = arith.constant 2.77068146E-8 : f32
    %143 = vector.broadcast %cst_51 : f32 to vector<16x128xf32>
    %144 = arith.mulf %143, %130 : vector<16x128xf32>
    %cst_52 = arith.constant -2.10102394E-6 : f32
    %145 = vector.broadcast %cst_52 : f32 to vector<16x128xf32>
    %146 = arith.addf %145, %144 : vector<16x128xf32>
    %cst_53 = arith.constant -2.72614237E-10 : f32
    %147 = vector.broadcast %cst_53 : f32 to vector<16x128xf32>
    %148 = arith.mulf %147, %131 : vector<16x128xf32>
    %149 = arith.addf %146, %148 : vector<16x128xf32>
    %150 = arith.mulf %132, %149 : vector<16x128xf32>
    %151 = arith.addf %142, %150 : vector<16x128xf32>
    %cst_54 = arith.constant -0.00737332925 : f32
    %152 = vector.broadcast %cst_54 : f32 to vector<16x128xf32>
    %153 = arith.mulf %152, %130 : vector<16x128xf32>
    %cst_55 = arith.constant -0.0142647391 : f32
    %154 = vector.broadcast %cst_55 : f32 to vector<16x128xf32>
    %155 = arith.addf %154, %153 : vector<16x128xf32>
    %cst_56 = arith.constant -2.13374049E-4 : f32
    %156 = vector.broadcast %cst_56 : f32 to vector<16x128xf32>
    %157 = arith.mulf %156, %130 : vector<16x128xf32>
    %cst_57 = arith.constant -0.00168282702 : f32
    %158 = vector.broadcast %cst_57 : f32 to vector<16x128xf32>
    %159 = arith.addf %158, %157 : vector<16x128xf32>
    %160 = arith.mulf %131, %159 : vector<16x128xf32>
    %161 = arith.addf %155, %160 : vector<16x128xf32>
    %cst_58 = arith.constant -1.45660715E-5 : f32
    %162 = vector.broadcast %cst_58 : f32 to vector<16x128xf32>
    %163 = arith.mulf %162, %132 : vector<16x128xf32>
    %164 = arith.addf %161, %163 : vector<16x128xf32>
    %165 = arith.mulf %151, %129 : vector<16x128xf32>
    %166 = tpu.reciprocal %164 {approx = true} : vector<16x128xf32> -> vector<16x128xf32>
    %167 = arith.mulf %165, %166 : vector<16x128xf32>
    %cst_59 = arith.constant -1.000000e+00 : f32
    %cst_60 = arith.constant 1.000000e+00 : f32
    %168 = vector.broadcast %cst_59 : f32 to vector<16x128xf32>
    %169 = arith.maximumf %168, %167 : vector<16x128xf32>
    %170 = vector.broadcast %cst_60 : f32 to vector<16x128xf32>
    %171 = arith.minimumf %170, %169 : vector<16x128xf32>
    %cst_61 = arith.constant 1.000000e+00 : f32
    %172 = vector.broadcast %cst_61 : f32 to vector<16x128xf32>
    %173 = arith.addf %172, %171 : vector<16x128xf32>
    %174 = arith.mulf %123, %173 : vector<16x128xf32>
    %175 = arith.truncf %174 : vector<16x128xf32> to vector<16x128xbf16>
    %c48 = arith.constant 48 : index
    %c0_62 = arith.constant 0 : index
    %176 = vector.load %arg2[%c48, %c0_62] : memref<384x128xbf16, #tpu.memory_space<vmem>>, vector<128x32xbf16>
    %cst_63 = arith.constant dense<0.000000e+00> : vector<16x32xf32>
    %177 = tpu.matmul %175, %176, %cst_63 {dimension_numbers = #tpu.dot_dimension_numbers<[1], [0], [0], [1], [0, 0, 1, 1], [], []>} : vector<16x128xbf16>, vector<128x32xbf16>, vector<16x32xf32> -> vector<16x32xf32>
    %c48_64 = arith.constant 48 : index
    %c0_65 = arith.constant 0 : index
    %178 = vector.load %arg3[%c48_64, %c0_65] : memref<208x128xf32, #tpu.memory_space<vmem>>, vector<1x32xf32>
    %179 = vector.broadcast %178 : vector<1x32xf32> to vector<16x32xf32>
    %180 = arith.addf %177, %179 : vector<16x32xf32>
    %181 = arith.addf %180, %115 : vector<16x32xf32>
    %c56 = arith.constant 56 : index
    %c0_66 = arith.constant 0 : index
    %182 = vector.load %arg3[%c56, %c0_66] : memref<208x128xf32, #tpu.memory_space<vmem>>, vector<1x32xf32>
    %c64 = arith.constant 64 : index
    %c0_67 = arith.constant 0 : index
    %183 = vector.load %arg3[%c64, %c0_67] : memref<208x128xf32, #tpu.memory_space<vmem>>, vector<1x32xf32>
    %cst_68 = arith.constant dense<0.000000e+00> : vector<16xf32>
    %184 = vector.multi_reduction <add>, %181, %cst_68 [1] : vector<16x32xf32> to vector<16xf32>
    %185 = vector.shape_cast %184 : vector<16xf32> to vector<16x1xf32>
    %cst_69 = arith.constant 3.200000e+01 : f32
    %186 = vector.broadcast %cst_69 : f32 to vector<16x1xf32>
    %187 = arith.divf %185, %186 : vector<16x1xf32>
    %188 = vector.broadcast %187 : vector<16x1xf32> to vector<16x32xf32>
    %189 = arith.subf %181, %188 : vector<16x32xf32>
    %190 = arith.mulf %189, %189 : vector<16x32xf32>
    %cst_70 = arith.constant dense<0.000000e+00> : vector<16xf32>
    %191 = vector.multi_reduction <add>, %190, %cst_70 [1] : vector<16x32xf32> to vector<16xf32>
    %192 = vector.shape_cast %191 : vector<16xf32> to vector<16x1xf32>
    %cst_71 = arith.constant 3.200000e+01 : f32
    %193 = vector.broadcast %cst_71 : f32 to vector<16x1xf32>
    %194 = arith.divf %192, %193 : vector<16x1xf32>
    %195 = vector.broadcast %187 : vector<16x1xf32> to vector<16x32xf32>
    %196 = arith.subf %181, %195 : vector<16x32xf32>
    %cst_72 = arith.constant 9.99999974E-6 : f32
    %197 = vector.broadcast %cst_72 : f32 to vector<16x1xf32>
    %198 = arith.addf %194, %197 : vector<16x1xf32>
    %199 = math.rsqrt %198 : vector<16x1xf32>
    %200 = vector.broadcast %199 : vector<16x1xf32> to vector<16x32xf32>
    %201 = arith.mulf %196, %200 : vector<16x32xf32>
    %202 = vector.broadcast %182 : vector<1x32xf32> to vector<16x32xf32>
    %203 = arith.mulf %201, %202 : vector<16x32xf32>
    %204 = vector.broadcast %183 : vector<1x32xf32> to vector<16x32xf32>
    %205 = arith.addf %203, %204 : vector<16x32xf32>
    %cst_73 = arith.constant 5.000000e-01 : f32
    %206 = vector.broadcast %cst_73 : f32 to vector<16x32xf32>
    %207 = arith.mulf %206, %205 : vector<16x32xf32>
    %cst_74 = arith.constant 0.707106769 : f32
    %208 = vector.broadcast %cst_74 : f32 to vector<16x32xf32>
    %209 = arith.mulf %205, %208 : vector<16x32xf32>
    %cst_75 = arith.constant -4.000000e+00 : f32
    %cst_76 = arith.constant 4.000000e+00 : f32
    %210 = vector.broadcast %cst_75 : f32 to vector<16x32xf32>
    %211 = arith.maximumf %210, %209 : vector<16x32xf32>
    %212 = vector.broadcast %cst_76 : f32 to vector<16x32xf32>
    %213 = arith.minimumf %212, %211 : vector<16x32xf32>
    %214 = arith.mulf %213, %213 : vector<16x32xf32>
    %215 = arith.mulf %214, %214 : vector<16x32xf32>
    %216 = arith.mulf %215, %215 : vector<16x32xf32>
    %cst_77 = arith.constant -2.954600e-03 : f32
    %217 = vector.broadcast %cst_77 : f32 to vector<16x32xf32>
    %218 = arith.mulf %217, %214 : vector<16x32xf32>
    %cst_78 = arith.constant -0.0160960332 : f32
    %219 = vector.broadcast %cst_78 : f32 to vector<16x32xf32>
    %220 = arith.addf %219, %218 : vector<16x32xf32>
    %cst_79 = arith.constant -5.69250624E-5 : f32
    %221 = vector.broadcast %cst_79 : f32 to vector<16x32xf32>
    %222 = arith.mulf %221, %214 : vector<16x32xf32>
    %cst_80 = arith.constant -7.34990637E-4 : f32
    %223 = vector.broadcast %cst_80 : f32 to vector<16x32xf32>
    %224 = arith.addf %223, %222 : vector<16x32xf32>
    %225 = arith.mulf %215, %224 : vector<16x32xf32>
    %226 = arith.addf %220, %225 : vector<16x32xf32>
    %cst_81 = arith.constant 2.77068146E-8 : f32
    %227 = vector.broadcast %cst_81 : f32 to vector<16x32xf32>
    %228 = arith.mulf %227, %214 : vector<16x32xf32>
    %cst_82 = arith.constant -2.10102394E-6 : f32
    %229 = vector.broadcast %cst_82 : f32 to vector<16x32xf32>
    %230 = arith.addf %229, %228 : vector<16x32xf32>
    %cst_83 = arith.constant -2.72614237E-10 : f32
    %231 = vector.broadcast %cst_83 : f32 to vector<16x32xf32>
    %232 = arith.mulf %231, %215 : vector<16x32xf32>
    %233 = arith.addf %230, %232 : vector<16x32xf32>
    %234 = arith.mulf %216, %233 : vector<16x32xf32>
    %235 = arith.addf %226, %234 : vector<16x32xf32>
    %cst_84 = arith.constant -0.00737332925 : f32
    %236 = vector.broadcast %cst_84 : f32 to vector<16x32xf32>
    %237 = arith.mulf %236, %214 : vector<16x32xf32>
    %cst_85 = arith.constant -0.0142647391 : f32
    %238 = vector.broadcast %cst_85 : f32 to vector<16x32xf32>
    %239 = arith.addf %238, %237 : vector<16x32xf32>
    %cst_86 = arith.constant -2.13374049E-4 : f32
    %240 = vector.broadcast %cst_86 : f32 to vector<16x32xf32>
    %241 = arith.mulf %240, %214 : vector<16x32xf32>
    %cst_87 = arith.constant -0.00168282702 : f32
    %242 = vector.broadcast %cst_87 : f32 to vector<16x32xf32>
    %243 = arith.addf %242, %241 : vector<16x32xf32>
    %244 = arith.mulf %215, %243 : vector<16x32xf32>
    %245 = arith.addf %239, %244 : vector<16x32xf32>
    %cst_88 = arith.constant -1.45660715E-5 : f32
    %246 = vector.broadcast %cst_88 : f32 to vector<16x32xf32>
    %247 = arith.mulf %246, %216 : vector<16x32xf32>
    %248 = arith.addf %245, %247 : vector<16x32xf32>
    %249 = arith.mulf %235, %213 : vector<16x32xf32>
    %250 = tpu.reciprocal %248 {approx = true} : vector<16x32xf32> -> vector<16x32xf32>
    %251 = arith.mulf %249, %250 : vector<16x32xf32>
    %cst_89 = arith.constant -1.000000e+00 : f32
    %cst_90 = arith.constant 1.000000e+00 : f32
    %252 = vector.broadcast %cst_89 : f32 to vector<16x32xf32>
    %253 = arith.maximumf %252, %251 : vector<16x32xf32>
    %254 = vector.broadcast %cst_90 : f32 to vector<16x32xf32>
    %255 = arith.minimumf %254, %253 : vector<16x32xf32>
    %cst_91 = arith.constant 1.000000e+00 : f32
    %256 = vector.broadcast %cst_91 : f32 to vector<16x32xf32>
    %257 = arith.addf %256, %255 : vector<16x32xf32>
    %258 = arith.mulf %207, %257 : vector<16x32xf32>
    %259 = vector.shape_cast %258 : vector<16x32xf32> to vector<2x8x32xf32>
    %c176 = arith.constant 176 : index
    %c0_92 = arith.constant 0 : index
    %260 = vector.load %arg2[%c176, %c0_92] : memref<384x128xbf16, #tpu.memory_space<vmem>>, vector<32x8xbf16>
    %261 = vector.shape_cast %260 : vector<32x8xbf16> to vector<1x32x8xbf16>
    %262 = vector.broadcast %261 : vector<1x32x8xbf16> to vector<2x32x8xbf16>
    %263 = arith.truncf %259 : vector<2x8x32xf32> to vector<2x8x32xbf16>
    "tpu.trace_start"() <{level = 10 : i32, message = "bts,bsh->bth"}> : () -> ()
    %cst_93 = arith.constant dense<0.000000e+00> : vector<2x32x32xf32>
    %264 = tpu.matmul %262, %263, %cst_93 {dimension_numbers = #tpu.dot_dimension_numbers<[2], [1], [1], [2], [0, 0, 0, 1, 1, 2], [0], [0]>} : vector<2x32x8xbf16>, vector<2x8x32xbf16>, vector<2x32x32xf32> -> vector<2x32x32xf32>
    "tpu.trace_stop"() : () -> ()
    %c72 = arith.constant 72 : index
    %c0_94 = arith.constant 0 : index
    %265 = vector.load %arg3[%c72, %c0_94] : memref<208x128xf32, #tpu.memory_space<vmem>>, vector<32x1xf32>
    %266 = vector.shape_cast %265 : vector<32x1xf32> to vector<1x32x1xf32>
    %267 = vector.broadcast %266 : vector<1x32x1xf32> to vector<2x32x32xf32>
    %268 = arith.addf %264, %267 : vector<2x32x32xf32>
    %cst_95 = arith.constant 5.000000e-01 : f32
    %269 = vector.broadcast %cst_95 : f32 to vector<2x32x32xf32>
    %270 = arith.mulf %269, %268 : vector<2x32x32xf32>
    %cst_96 = arith.constant 0.707106769 : f32
    %271 = vector.broadcast %cst_96 : f32 to vector<2x32x32xf32>
    %272 = arith.mulf %268, %271 : vector<2x32x32xf32>
    %cst_97 = arith.constant -4.000000e+00 : f32
    %cst_98 = arith.constant 4.000000e+00 : f32
    %273 = vector.broadcast %cst_97 : f32 to vector<2x32x32xf32>
    %274 = arith.maximumf %273, %272 : vector<2x32x32xf32>
    %275 = vector.broadcast %cst_98 : f32 to vector<2x32x32xf32>
    %276 = arith.minimumf %275, %274 : vector<2x32x32xf32>
    %277 = arith.mulf %276, %276 : vector<2x32x32xf32>
    %278 = arith.mulf %277, %277 : vector<2x32x32xf32>
    %279 = arith.mulf %278, %278 : vector<2x32x32xf32>
    %cst_99 = arith.constant -2.954600e-03 : f32
    %280 = vector.broadcast %cst_99 : f32 to vector<2x32x32xf32>
    %281 = arith.mulf %280, %277 : vector<2x32x32xf32>
    %cst_100 = arith.constant -0.0160960332 : f32
    %282 = vector.broadcast %cst_100 : f32 to vector<2x32x32xf32>
    %283 = arith.addf %282, %281 : vector<2x32x32xf32>
    %cst_101 = arith.constant -5.69250624E-5 : f32
    %284 = vector.broadcast %cst_101 : f32 to vector<2x32x32xf32>
    %285 = arith.mulf %284, %277 : vector<2x32x32xf32>
    %cst_102 = arith.constant -7.34990637E-4 : f32
    %286 = vector.broadcast %cst_102 : f32 to vector<2x32x32xf32>
    %287 = arith.addf %286, %285 : vector<2x32x32xf32>
    %288 = arith.mulf %278, %287 : vector<2x32x32xf32>
    %289 = arith.addf %283, %288 : vector<2x32x32xf32>
    %cst_103 = arith.constant 2.77068146E-8 : f32
    %290 = vector.broadcast %cst_103 : f32 to vector<2x32x32xf32>
    %291 = arith.mulf %290, %277 : vector<2x32x32xf32>
    %cst_104 = arith.constant -2.10102394E-6 : f32
    %292 = vector.broadcast %cst_104 : f32 to vector<2x32x32xf32>
    %293 = arith.addf %292, %291 : vector<2x32x32xf32>
    %cst_105 = arith.constant -2.72614237E-10 : f32
    %294 = vector.broadcast %cst_105 : f32 to vector<2x32x32xf32>
    %295 = arith.mulf %294, %278 : vector<2x32x32xf32>
    %296 = arith.addf %293, %295 : vector<2x32x32xf32>
    %297 = arith.mulf %279, %296 : vector<2x32x32xf32>
    %298 = arith.addf %289, %297 : vector<2x32x32xf32>
    %cst_106 = arith.constant -0.00737332925 : f32
    %299 = vector.broadcast %cst_106 : f32 to vector<2x32x32xf32>
    %300 = arith.mulf %299, %277 : vector<2x32x32xf32>
    %cst_107 = arith.constant -0.0142647391 : f32
    %301 = vector.broadcast %cst_107 : f32 to vector<2x32x32xf32>
    %302 = arith.addf %301, %300 : vector<2x32x32xf32>
    %cst_108 = arith.constant -2.13374049E-4 : f32
    %303 = vector.broadcast %cst_108 : f32 to vector<2x32x32xf32>
    %304 = arith.mulf %303, %277 : vector<2x32x32xf32>
    %cst_109 = arith.constant -0.00168282702 : f32
    %305 = vector.broadcast %cst_109 : f32 to vector<2x32x32xf32>
    %306 = arith.addf %305, %304 : vector<2x32x32xf32>
    %307 = arith.mulf %278, %306 : vector<2x32x32xf32>
    %308 = arith.addf %302, %307 : vector<2x32x32xf32>
    %cst_110 = arith.constant -1.45660715E-5 : f32
    %309 = vector.broadcast %cst_110 : f32 to vector<2x32x32xf32>
    %310 = arith.mulf %309, %279 : vector<2x32x32xf32>
    %311 = arith.addf %308, %310 : vector<2x32x32xf32>
    %312 = arith.mulf %298, %276 : vector<2x32x32xf32>
    %313 = tpu.reciprocal %311 {approx = true} : vector<2x32x32xf32> -> vector<2x32x32xf32>
    %314 = arith.mulf %312, %313 : vector<2x32x32xf32>
    %cst_111 = arith.constant -1.000000e+00 : f32
    %cst_112 = arith.constant 1.000000e+00 : f32
    %315 = vector.broadcast %cst_111 : f32 to vector<2x32x32xf32>
    %316 = arith.maximumf %315, %314 : vector<2x32x32xf32>
    %317 = vector.broadcast %cst_112 : f32 to vector<2x32x32xf32>
    %318 = arith.minimumf %317, %316 : vector<2x32x32xf32>
    %cst_113 = arith.constant 1.000000e+00 : f32
    %319 = vector.broadcast %cst_113 : f32 to vector<2x32x32xf32>
    %320 = arith.addf %319, %318 : vector<2x32x32xf32>
    %321 = arith.mulf %270, %320 : vector<2x32x32xf32>
    %c208 = arith.constant 208 : index
    %c0_114 = arith.constant 0 : index
    %322 = vector.load %arg2[%c208, %c0_114] : memref<384x128xbf16, #tpu.memory_space<vmem>>, vector<8x32xbf16>
    %323 = vector.shape_cast %322 : vector<8x32xbf16> to vector<1x8x32xbf16>
    %324 = vector.broadcast %323 : vector<1x8x32xbf16> to vector<2x8x32xbf16>
    %325 = arith.truncf %321 : vector<2x32x32xf32> to vector<2x32x32xbf16>
    "tpu.trace_start"() <{level = 10 : i32, message = "but,bth->buh"}> : () -> ()
    %cst_115 = arith.constant dense<0.000000e+00> : vector<2x8x32xf32>
    %326 = tpu.matmul %324, %325, %cst_115 {dimension_numbers = #tpu.dot_dimension_numbers<[2], [1], [1], [2], [0, 0, 0, 1, 1, 2], [0], [0]>} : vector<2x8x32xbf16>, vector<2x32x32xbf16>, vector<2x8x32xf32> -> vector<2x8x32xf32>
    "tpu.trace_stop"() : () -> ()
    %c104 = arith.constant 104 : index
    %c0_116 = arith.constant 0 : index
    %327 = vector.load %arg3[%c104, %c0_116] : memref<208x128xf32, #tpu.memory_space<vmem>>, vector<8x1xf32>
    %328 = vector.shape_cast %327 : vector<8x1xf32> to vector<1x8x1xf32>
    %329 = vector.broadcast %328 : vector<1x8x1xf32> to vector<2x8x32xf32>
    %330 = arith.addf %326, %329 : vector<2x8x32xf32>
    %331 = arith.addf %330, %259 : vector<2x8x32xf32>
    %c112 = arith.constant 112 : index
    %c0_117 = arith.constant 0 : index
    %332 = vector.load %arg3[%c112, %c0_117] : memref<208x128xf32, #tpu.memory_space<vmem>>, vector<8x1xf32>
    %333 = vector.shape_cast %332 : vector<8x1xf32> to vector<1x8x1xf32>
    %c120 = arith.constant 120 : index
    %c0_118 = arith.constant 0 : index
    %334 = vector.load %arg3[%c120, %c0_118] : memref<208x128xf32, #tpu.memory_space<vmem>>, vector<8x1xf32>
    %335 = vector.shape_cast %334 : vector<8x1xf32> to vector<1x8x1xf32>
    %cst_119 = arith.constant dense<0.000000e+00> : vector<2x32xf32>
    %336 = vector.multi_reduction <add>, %331, %cst_119 [1] : vector<2x8x32xf32> to vector<2x32xf32>
    %337 = vector.shape_cast %336 : vector<2x32xf32> to vector<2x1x32xf32>
    %cst_120 = arith.constant 8.000000e+00 : f32
    %338 = vector.broadcast %cst_120 : f32 to vector<2x1x32xf32>
    %339 = arith.divf %337, %338 : vector<2x1x32xf32>
    %340 = vector.broadcast %339 : vector<2x1x32xf32> to vector<2x8x32xf32>
    %341 = arith.subf %331, %340 : vector<2x8x32xf32>
    %342 = arith.mulf %341, %341 : vector<2x8x32xf32>
    %cst_121 = arith.constant dense<0.000000e+00> : vector<2x32xf32>
    %343 = vector.multi_reduction <add>, %342, %cst_121 [1] : vector<2x8x32xf32> to vector<2x32xf32>
    %344 = vector.shape_cast %343 : vector<2x32xf32> to vector<2x1x32xf32>
    %cst_122 = arith.constant 8.000000e+00 : f32
    %345 = vector.broadcast %cst_122 : f32 to vector<2x1x32xf32>
    %346 = arith.divf %344, %345 : vector<2x1x32xf32>
    %347 = vector.broadcast %339 : vector<2x1x32xf32> to vector<2x8x32xf32>
    %348 = arith.subf %331, %347 : vector<2x8x32xf32>
    %cst_123 = arith.constant 9.99999974E-6 : f32
    %349 = vector.broadcast %cst_123 : f32 to vector<2x1x32xf32>
    %350 = arith.addf %346, %349 : vector<2x1x32xf32>
    %351 = math.rsqrt %350 : vector<2x1x32xf32>
    %352 = vector.broadcast %351 : vector<2x1x32xf32> to vector<2x8x32xf32>
    %353 = arith.mulf %348, %352 : vector<2x8x32xf32>
    %354 = vector.broadcast %333 : vector<1x8x1xf32> to vector<2x8x32xf32>
    %355 = arith.mulf %353, %354 : vector<2x8x32xf32>
    %356 = vector.broadcast %335 : vector<1x8x1xf32> to vector<2x8x32xf32>
    %357 = arith.addf %355, %356 : vector<2x8x32xf32>
    %cst_124 = arith.constant 5.000000e-01 : f32
    %358 = vector.broadcast %cst_124 : f32 to vector<2x8x32xf32>
    %359 = arith.mulf %358, %357 : vector<2x8x32xf32>
    %cst_125 = arith.constant 0.707106769 : f32
    %360 = vector.broadcast %cst_125 : f32 to vector<2x8x32xf32>
    %361 = arith.mulf %357, %360 : vector<2x8x32xf32>
    %cst_126 = arith.constant -4.000000e+00 : f32
    %cst_127 = arith.constant 4.000000e+00 : f32
    %362 = vector.broadcast %cst_126 : f32 to vector<2x8x32xf32>
    %363 = arith.maximumf %362, %361 : vector<2x8x32xf32>
    %364 = vector.broadcast %cst_127 : f32 to vector<2x8x32xf32>
    %365 = arith.minimumf %364, %363 : vector<2x8x32xf32>
    %366 = arith.mulf %365, %365 : vector<2x8x32xf32>
    %367 = arith.mulf %366, %366 : vector<2x8x32xf32>
    %368 = arith.mulf %367, %367 : vector<2x8x32xf32>
    %cst_128 = arith.constant -2.954600e-03 : f32
    %369 = vector.broadcast %cst_128 : f32 to vector<2x8x32xf32>
    %370 = arith.mulf %369, %366 : vector<2x8x32xf32>
    %cst_129 = arith.constant -0.0160960332 : f32
    %371 = vector.broadcast %cst_129 : f32 to vector<2x8x32xf32>
    %372 = arith.addf %371, %370 : vector<2x8x32xf32>
    %cst_130 = arith.constant -5.69250624E-5 : f32
    %373 = vector.broadcast %cst_130 : f32 to vector<2x8x32xf32>
    %374 = arith.mulf %373, %366 : vector<2x8x32xf32>
    %cst_131 = arith.constant -7.34990637E-4 : f32
    %375 = vector.broadcast %cst_131 : f32 to vector<2x8x32xf32>
    %376 = arith.addf %375, %374 : vector<2x8x32xf32>
    %377 = arith.mulf %367, %376 : vector<2x8x32xf32>
    %378 = arith.addf %372, %377 : vector<2x8x32xf32>
    %cst_132 = arith.constant 2.77068146E-8 : f32
    %379 = vector.broadcast %cst_132 : f32 to vector<2x8x32xf32>
    %380 = arith.mulf %379, %366 : vector<2x8x32xf32>
    %cst_133 = arith.constant -2.10102394E-6 : f32
    %381 = vector.broadcast %cst_133 : f32 to vector<2x8x32xf32>
    %382 = arith.addf %381, %380 : vector<2x8x32xf32>
    %cst_134 = arith.constant -2.72614237E-10 : f32
    %383 = vector.broadcast %cst_134 : f32 to vector<2x8x32xf32>
    %384 = arith.mulf %383, %367 : vector<2x8x32xf32>
    %385 = arith.addf %382, %384 : vector<2x8x32xf32>
    %386 = arith.mulf %368, %385 : vector<2x8x32xf32>
    %387 = arith.addf %378, %386 : vector<2x8x32xf32>
    %cst_135 = arith.constant -0.00737332925 : f32
    %388 = vector.broadcast %cst_135 : f32 to vector<2x8x32xf32>
    %389 = arith.mulf %388, %366 : vector<2x8x32xf32>
    %cst_136 = arith.constant -0.0142647391 : f32
    %390 = vector.broadcast %cst_136 : f32 to vector<2x8x32xf32>
    %391 = arith.addf %390, %389 : vector<2x8x32xf32>
    %cst_137 = arith.constant -2.13374049E-4 : f32
    %392 = vector.broadcast %cst_137 : f32 to vector<2x8x32xf32>
    %393 = arith.mulf %392, %366 : vector<2x8x32xf32>
    %cst_138 = arith.constant -0.00168282702 : f32
    %394 = vector.broadcast %cst_138 : f32 to vector<2x8x32xf32>
    %395 = arith.addf %394, %393 : vector<2x8x32xf32>
    %396 = arith.mulf %367, %395 : vector<2x8x32xf32>
    %397 = arith.addf %391, %396 : vector<2x8x32xf32>
    %cst_139 = arith.constant -1.45660715E-5 : f32
    %398 = vector.broadcast %cst_139 : f32 to vector<2x8x32xf32>
    %399 = arith.mulf %398, %368 : vector<2x8x32xf32>
    %400 = arith.addf %397, %399 : vector<2x8x32xf32>
    %401 = arith.mulf %387, %365 : vector<2x8x32xf32>
    %402 = tpu.reciprocal %400 {approx = true} : vector<2x8x32xf32> -> vector<2x8x32xf32>
    %403 = arith.mulf %401, %402 : vector<2x8x32xf32>
    %cst_140 = arith.constant -1.000000e+00 : f32
    %cst_141 = arith.constant 1.000000e+00 : f32
    %404 = vector.broadcast %cst_140 : f32 to vector<2x8x32xf32>
    %405 = arith.maximumf %404, %403 : vector<2x8x32xf32>
    %406 = vector.broadcast %cst_141 : f32 to vector<2x8x32xf32>
    %407 = arith.minimumf %406, %405 : vector<2x8x32xf32>
    %cst_142 = arith.constant 1.000000e+00 : f32
    %408 = vector.broadcast %cst_142 : f32 to vector<2x8x32xf32>
    %409 = arith.addf %408, %407 : vector<2x8x32xf32>
    %410 = arith.mulf %359, %409 : vector<2x8x32xf32>
    %411 = vector.shape_cast %410 : vector<2x8x32xf32> to vector<16x32xf32>
    %412 = arith.truncf %411 : vector<16x32xf32> to vector<16x32xbf16>
    %c224 = arith.constant 224 : index
    %c0_143 = arith.constant 0 : index
    %413 = vector.load %arg2[%c224, %c0_143] : memref<384x128xbf16, #tpu.memory_space<vmem>>, vector<32x64xbf16>
    %cst_144 = arith.constant dense<0.000000e+00> : vector<16x64xf32>
    %414 = tpu.matmul %412, %413, %cst_144 {dimension_numbers = #tpu.dot_dimension_numbers<[1], [0], [0], [1], [0, 0, 1, 1], [], []>} : vector<16x32xbf16>, vector<32x64xbf16>, vector<16x64xf32> -> vector<16x64xf32>
    %c128 = arith.constant 128 : index
    %c0_145 = arith.constant 0 : index
    %415 = vector.load %arg3[%c128, %c0_145] : memref<208x128xf32, #tpu.memory_space<vmem>>, vector<1x64xf32>
    %416 = vector.broadcast %415 : vector<1x64xf32> to vector<16x64xf32>
    %417 = arith.addf %414, %416 : vector<16x64xf32>
    %cst_146 = arith.constant 5.000000e-01 : f32
    %418 = vector.broadcast %cst_146 : f32 to vector<16x64xf32>
    %419 = arith.mulf %418, %417 : vector<16x64xf32>
    %cst_147 = arith.constant 0.707106769 : f32
    %420 = vector.broadcast %cst_147 : f32 to vector<16x64xf32>
    %421 = arith.mulf %417, %420 : vector<16x64xf32>
    %cst_148 = arith.constant -4.000000e+00 : f32
    %cst_149 = arith.constant 4.000000e+00 : f32
    %422 = vector.broadcast %cst_148 : f32 to vector<16x64xf32>
    %423 = arith.maximumf %422, %421 : vector<16x64xf32>
    %424 = vector.broadcast %cst_149 : f32 to vector<16x64xf32>
    %425 = arith.minimumf %424, %423 : vector<16x64xf32>
    %426 = arith.mulf %425, %425 : vector<16x64xf32>
    %427 = arith.mulf %426, %426 : vector<16x64xf32>
    %428 = arith.mulf %427, %427 : vector<16x64xf32>
    %cst_150 = arith.constant -2.954600e-03 : f32
    %429 = vector.broadcast %cst_150 : f32 to vector<16x64xf32>
    %430 = arith.mulf %429, %426 : vector<16x64xf32>
    %cst_151 = arith.constant -0.0160960332 : f32
    %431 = vector.broadcast %cst_151 : f32 to vector<16x64xf32>
    %432 = arith.addf %431, %430 : vector<16x64xf32>
    %cst_152 = arith.constant -5.69250624E-5 : f32
    %433 = vector.broadcast %cst_152 : f32 to vector<16x64xf32>
    %434 = arith.mulf %433, %426 : vector<16x64xf32>
    %cst_153 = arith.constant -7.34990637E-4 : f32
    %435 = vector.broadcast %cst_153 : f32 to vector<16x64xf32>
    %436 = arith.addf %435, %434 : vector<16x64xf32>
    %437 = arith.mulf %427, %436 : vector<16x64xf32>
    %438 = arith.addf %432, %437 : vector<16x64xf32>
    %cst_154 = arith.constant 2.77068146E-8 : f32
    %439 = vector.broadcast %cst_154 : f32 to vector<16x64xf32>
    %440 = arith.mulf %439, %426 : vector<16x64xf32>
    %cst_155 = arith.constant -2.10102394E-6 : f32
    %441 = vector.broadcast %cst_155 : f32 to vector<16x64xf32>
    %442 = arith.addf %441, %440 : vector<16x64xf32>
    %cst_156 = arith.constant -2.72614237E-10 : f32
    %443 = vector.broadcast %cst_156 : f32 to vector<16x64xf32>
    %444 = arith.mulf %443, %427 : vector<16x64xf32>
    %445 = arith.addf %442, %444 : vector<16x64xf32>
    %446 = arith.mulf %428, %445 : vector<16x64xf32>
    %447 = arith.addf %438, %446 : vector<16x64xf32>
    %cst_157 = arith.constant -0.00737332925 : f32
    %448 = vector.broadcast %cst_157 : f32 to vector<16x64xf32>
    %449 = arith.mulf %448, %426 : vector<16x64xf32>
    %cst_158 = arith.constant -0.0142647391 : f32
    %450 = vector.broadcast %cst_158 : f32 to vector<16x64xf32>
    %451 = arith.addf %450, %449 : vector<16x64xf32>
    %cst_159 = arith.constant -2.13374049E-4 : f32
    %452 = vector.broadcast %cst_159 : f32 to vector<16x64xf32>
    %453 = arith.mulf %452, %426 : vector<16x64xf32>
    %cst_160 = arith.constant -0.00168282702 : f32
    %454 = vector.broadcast %cst_160 : f32 to vector<16x64xf32>
    %455 = arith.addf %454, %453 : vector<16x64xf32>
    %456 = arith.mulf %427, %455 : vector<16x64xf32>
    %457 = arith.addf %451, %456 : vector<16x64xf32>
    %cst_161 = arith.constant -1.45660715E-5 : f32
    %458 = vector.broadcast %cst_161 : f32 to vector<16x64xf32>
    %459 = arith.mulf %458, %428 : vector<16x64xf32>
    %460 = arith.addf %457, %459 : vector<16x64xf32>
    %461 = arith.mulf %447, %425 : vector<16x64xf32>
    %462 = tpu.reciprocal %460 {approx = true} : vector<16x64xf32> -> vector<16x64xf32>
    %463 = arith.mulf %461, %462 : vector<16x64xf32>
    %cst_162 = arith.constant -1.000000e+00 : f32
    %cst_163 = arith.constant 1.000000e+00 : f32
    %464 = vector.broadcast %cst_162 : f32 to vector<16x64xf32>
    %465 = arith.maximumf %464, %463 : vector<16x64xf32>
    %466 = vector.broadcast %cst_163 : f32 to vector<16x64xf32>
    %467 = arith.minimumf %466, %465 : vector<16x64xf32>
    %cst_164 = arith.constant 1.000000e+00 : f32
    %468 = vector.broadcast %cst_164 : f32 to vector<16x64xf32>
    %469 = arith.addf %468, %467 : vector<16x64xf32>
    %470 = arith.mulf %419, %469 : vector<16x64xf32>
    %471 = arith.truncf %470 : vector<16x64xf32> to vector<16x64xbf16>
    %c256 = arith.constant 256 : index
    %c0_165 = arith.constant 0 : index
    %472 = vector.load %arg2[%c256, %c0_165] : memref<384x128xbf16, #tpu.memory_space<vmem>>, vector<64x8xbf16>
    %cst_166 = arith.constant dense<0.000000e+00> : vector<16x8xf32>
    %473 = tpu.matmul %471, %472, %cst_166 {dimension_numbers = #tpu.dot_dimension_numbers<[1], [0], [0], [1], [0, 0, 1, 1], [], []>} : vector<16x64xbf16>, vector<64x8xbf16>, vector<16x8xf32> -> vector<16x8xf32>
    %c136 = arith.constant 136 : index
    %c0_167 = arith.constant 0 : index
    %474 = vector.load %arg3[%c136, %c0_167] : memref<208x128xf32, #tpu.memory_space<vmem>>, vector<1x8xf32>
    %475 = vector.broadcast %474 : vector<1x8xf32> to vector<16x8xf32>
    %476 = arith.addf %473, %475 : vector<16x8xf32>
    %c144 = arith.constant 144 : index
    %c0_168 = arith.constant 0 : index
    %477 = vector.load %arg3[%c144, %c0_168] : memref<208x128xf32, #tpu.memory_space<vmem>>, vector<1x8xf32>
    %c152 = arith.constant 152 : index
    %c0_169 = arith.constant 0 : index
    %478 = vector.load %arg3[%c152, %c0_169] : memref<208x128xf32, #tpu.memory_space<vmem>>, vector<1x8xf32>
    %cst_170 = arith.constant dense<0.000000e+00> : vector<16xf32>
    %479 = vector.multi_reduction <add>, %476, %cst_170 [1] : vector<16x8xf32> to vector<16xf32>
    %480 = vector.shape_cast %479 : vector<16xf32> to vector<16x1xf32>
    %cst_171 = arith.constant 8.000000e+00 : f32
    %481 = vector.broadcast %cst_171 : f32 to vector<16x1xf32>
    %482 = arith.divf %480, %481 : vector<16x1xf32>
    %483 = vector.broadcast %482 : vector<16x1xf32> to vector<16x8xf32>
    %484 = arith.subf %476, %483 : vector<16x8xf32>
    %485 = arith.mulf %484, %484 : vector<16x8xf32>
    %cst_172 = arith.constant dense<0.000000e+00> : vector<16xf32>
    %486 = vector.multi_reduction <add>, %485, %cst_172 [1] : vector<16x8xf32> to vector<16xf32>
    %487 = vector.shape_cast %486 : vector<16xf32> to vector<16x1xf32>
    %cst_173 = arith.constant 8.000000e+00 : f32
    %488 = vector.broadcast %cst_173 : f32 to vector<16x1xf32>
    %489 = arith.divf %487, %488 : vector<16x1xf32>
    %490 = vector.broadcast %482 : vector<16x1xf32> to vector<16x8xf32>
    %491 = arith.subf %476, %490 : vector<16x8xf32>
    %cst_174 = arith.constant 9.99999974E-6 : f32
    %492 = vector.broadcast %cst_174 : f32 to vector<16x1xf32>
    %493 = arith.addf %489, %492 : vector<16x1xf32>
    %494 = math.rsqrt %493 : vector<16x1xf32>
    %495 = vector.broadcast %494 : vector<16x1xf32> to vector<16x8xf32>
    %496 = arith.mulf %491, %495 : vector<16x8xf32>
    %497 = vector.broadcast %477 : vector<1x8xf32> to vector<16x8xf32>
    %498 = arith.mulf %496, %497 : vector<16x8xf32>
    %499 = vector.broadcast %478 : vector<1x8xf32> to vector<16x8xf32>
    %500 = arith.addf %498, %499 : vector<16x8xf32>
    %cst_175 = arith.constant 5.000000e-01 : f32
    %501 = vector.broadcast %cst_175 : f32 to vector<16x8xf32>
    %502 = arith.mulf %501, %500 : vector<16x8xf32>
    %cst_176 = arith.constant 0.707106769 : f32
    %503 = vector.broadcast %cst_176 : f32 to vector<16x8xf32>
    %504 = arith.mulf %500, %503 : vector<16x8xf32>
    %cst_177 = arith.constant -4.000000e+00 : f32
    %cst_178 = arith.constant 4.000000e+00 : f32
    %505 = vector.broadcast %cst_177 : f32 to vector<16x8xf32>
    %506 = arith.maximumf %505, %504 : vector<16x8xf32>
    %507 = vector.broadcast %cst_178 : f32 to vector<16x8xf32>
    %508 = arith.minimumf %507, %506 : vector<16x8xf32>
    %509 = arith.mulf %508, %508 : vector<16x8xf32>
    %510 = arith.mulf %509, %509 : vector<16x8xf32>
    %511 = arith.mulf %510, %510 : vector<16x8xf32>
    %cst_179 = arith.constant -2.954600e-03 : f32
    %512 = vector.broadcast %cst_179 : f32 to vector<16x8xf32>
    %513 = arith.mulf %512, %509 : vector<16x8xf32>
    %cst_180 = arith.constant -0.0160960332 : f32
    %514 = vector.broadcast %cst_180 : f32 to vector<16x8xf32>
    %515 = arith.addf %514, %513 : vector<16x8xf32>
    %cst_181 = arith.constant -5.69250624E-5 : f32
    %516 = vector.broadcast %cst_181 : f32 to vector<16x8xf32>
    %517 = arith.mulf %516, %509 : vector<16x8xf32>
    %cst_182 = arith.constant -7.34990637E-4 : f32
    %518 = vector.broadcast %cst_182 : f32 to vector<16x8xf32>
    %519 = arith.addf %518, %517 : vector<16x8xf32>
    %520 = arith.mulf %510, %519 : vector<16x8xf32>
    %521 = arith.addf %515, %520 : vector<16x8xf32>
    %cst_183 = arith.constant 2.77068146E-8 : f32
    %522 = vector.broadcast %cst_183 : f32 to vector<16x8xf32>
    %523 = arith.mulf %522, %509 : vector<16x8xf32>
    %cst_184 = arith.constant -2.10102394E-6 : f32
    %524 = vector.broadcast %cst_184 : f32 to vector<16x8xf32>
    %525 = arith.addf %524, %523 : vector<16x8xf32>
    %cst_185 = arith.constant -2.72614237E-10 : f32
    %526 = vector.broadcast %cst_185 : f32 to vector<16x8xf32>
    %527 = arith.mulf %526, %510 : vector<16x8xf32>
    %528 = arith.addf %525, %527 : vector<16x8xf32>
    %529 = arith.mulf %511, %528 : vector<16x8xf32>
    %530 = arith.addf %521, %529 : vector<16x8xf32>
    %cst_186 = arith.constant -0.00737332925 : f32
    %531 = vector.broadcast %cst_186 : f32 to vector<16x8xf32>
    %532 = arith.mulf %531, %509 : vector<16x8xf32>
    %cst_187 = arith.constant -0.0142647391 : f32
    %533 = vector.broadcast %cst_187 : f32 to vector<16x8xf32>
    %534 = arith.addf %533, %532 : vector<16x8xf32>
    %cst_188 = arith.constant -2.13374049E-4 : f32
    %535 = vector.broadcast %cst_188 : f32 to vector<16x8xf32>
    %536 = arith.mulf %535, %509 : vector<16x8xf32>
    %cst_189 = arith.constant -0.00168282702 : f32
    %537 = vector.broadcast %cst_189 : f32 to vector<16x8xf32>
    %538 = arith.addf %537, %536 : vector<16x8xf32>
    %539 = arith.mulf %510, %538 : vector<16x8xf32>
    %540 = arith.addf %534, %539 : vector<16x8xf32>
    %cst_190 = arith.constant -1.45660715E-5 : f32
    %541 = vector.broadcast %cst_190 : f32 to vector<16x8xf32>
    %542 = arith.mulf %541, %511 : vector<16x8xf32>
    %543 = arith.addf %540, %542 : vector<16x8xf32>
    %544 = arith.mulf %530, %508 : vector<16x8xf32>
    %545 = tpu.reciprocal %543 {approx = true} : vector<16x8xf32> -> vector<16x8xf32>
    %546 = arith.mulf %544, %545 : vector<16x8xf32>
    %cst_191 = arith.constant -1.000000e+00 : f32
    %cst_192 = arith.constant 1.000000e+00 : f32
    %547 = vector.broadcast %cst_191 : f32 to vector<16x8xf32>
    %548 = arith.maximumf %547, %546 : vector<16x8xf32>
    %549 = vector.broadcast %cst_192 : f32 to vector<16x8xf32>
    %550 = arith.minimumf %549, %548 : vector<16x8xf32>
    %cst_193 = arith.constant 1.000000e+00 : f32
    %551 = vector.broadcast %cst_193 : f32 to vector<16x8xf32>
    %552 = arith.addf %551, %550 : vector<16x8xf32>
    %553 = arith.mulf %502, %552 : vector<16x8xf32>
    %554 = vector.shape_cast %553 : vector<16x8xf32> to vector<2x8x8xf32>
    %c320 = arith.constant 320 : index
    %c0_194 = arith.constant 0 : index
    %555 = vector.load %arg2[%c320, %c0_194] : memref<384x128xbf16, #tpu.memory_space<vmem>>, vector<16x8xbf16>
    %556 = vector.shape_cast %555 : vector<16x8xbf16> to vector<1x16x8xbf16>
    %557 = vector.broadcast %556 : vector<1x16x8xbf16> to vector<2x16x8xbf16>
    %558 = arith.truncf %554 : vector<2x8x8xf32> to vector<2x8x8xbf16>
    "tpu.trace_start"() <{level = 10 : i32, message = "bts,bsh->bth"}> : () -> ()
    %cst_195 = arith.constant dense<0.000000e+00> : vector<2x16x8xf32>
    %559 = tpu.matmul %557, %558, %cst_195 {dimension_numbers = #tpu.dot_dimension_numbers<[2], [1], [1], [2], [0, 0, 0, 1, 1, 2], [0], [0]>} : vector<2x16x8xbf16>, vector<2x8x8xbf16>, vector<2x16x8xf32> -> vector<2x16x8xf32>
    "tpu.trace_stop"() : () -> ()
    %c160 = arith.constant 160 : index
    %c0_196 = arith.constant 0 : index
    %560 = vector.load %arg3[%c160, %c0_196] : memref<208x128xf32, #tpu.memory_space<vmem>>, vector<16x1xf32>
    %561 = vector.shape_cast %560 : vector<16x1xf32> to vector<1x16x1xf32>
    %562 = vector.broadcast %561 : vector<1x16x1xf32> to vector<2x16x8xf32>
    %563 = arith.addf %559, %562 : vector<2x16x8xf32>
    %cst_197 = arith.constant 5.000000e-01 : f32
    %564 = vector.broadcast %cst_197 : f32 to vector<2x16x8xf32>
    %565 = arith.mulf %564, %563 : vector<2x16x8xf32>
    %cst_198 = arith.constant 0.707106769 : f32
    %566 = vector.broadcast %cst_198 : f32 to vector<2x16x8xf32>
    %567 = arith.mulf %563, %566 : vector<2x16x8xf32>
    %cst_199 = arith.constant -4.000000e+00 : f32
    %cst_200 = arith.constant 4.000000e+00 : f32
    %568 = vector.broadcast %cst_199 : f32 to vector<2x16x8xf32>
    %569 = arith.maximumf %568, %567 : vector<2x16x8xf32>
    %570 = vector.broadcast %cst_200 : f32 to vector<2x16x8xf32>
    %571 = arith.minimumf %570, %569 : vector<2x16x8xf32>
    %572 = arith.mulf %571, %571 : vector<2x16x8xf32>
    %573 = arith.mulf %572, %572 : vector<2x16x8xf32>
    %574 = arith.mulf %573, %573 : vector<2x16x8xf32>
    %cst_201 = arith.constant -2.954600e-03 : f32
    %575 = vector.broadcast %cst_201 : f32 to vector<2x16x8xf32>
    %576 = arith.mulf %575, %572 : vector<2x16x8xf32>
    %cst_202 = arith.constant -0.0160960332 : f32
    %577 = vector.broadcast %cst_202 : f32 to vector<2x16x8xf32>
    %578 = arith.addf %577, %576 : vector<2x16x8xf32>
    %cst_203 = arith.constant -5.69250624E-5 : f32
    %579 = vector.broadcast %cst_203 : f32 to vector<2x16x8xf32>
    %580 = arith.mulf %579, %572 : vector<2x16x8xf32>
    %cst_204 = arith.constant -7.34990637E-4 : f32
    %581 = vector.broadcast %cst_204 : f32 to vector<2x16x8xf32>
    %582 = arith.addf %581, %580 : vector<2x16x8xf32>
    %583 = arith.mulf %573, %582 : vector<2x16x8xf32>
    %584 = arith.addf %578, %583 : vector<2x16x8xf32>
    %cst_205 = arith.constant 2.77068146E-8 : f32
    %585 = vector.broadcast %cst_205 : f32 to vector<2x16x8xf32>
    %586 = arith.mulf %585, %572 : vector<2x16x8xf32>
    %cst_206 = arith.constant -2.10102394E-6 : f32
    %587 = vector.broadcast %cst_206 : f32 to vector<2x16x8xf32>
    %588 = arith.addf %587, %586 : vector<2x16x8xf32>
    %cst_207 = arith.constant -2.72614237E-10 : f32
    %589 = vector.broadcast %cst_207 : f32 to vector<2x16x8xf32>
    %590 = arith.mulf %589, %573 : vector<2x16x8xf32>
    %591 = arith.addf %588, %590 : vector<2x16x8xf32>
    %592 = arith.mulf %574, %591 : vector<2x16x8xf32>
    %593 = arith.addf %584, %592 : vector<2x16x8xf32>
    %cst_208 = arith.constant -0.00737332925 : f32
    %594 = vector.broadcast %cst_208 : f32 to vector<2x16x8xf32>
    %595 = arith.mulf %594, %572 : vector<2x16x8xf32>
    %cst_209 = arith.constant -0.0142647391 : f32
    %596 = vector.broadcast %cst_209 : f32 to vector<2x16x8xf32>
    %597 = arith.addf %596, %595 : vector<2x16x8xf32>
    %cst_210 = arith.constant -2.13374049E-4 : f32
    %598 = vector.broadcast %cst_210 : f32 to vector<2x16x8xf32>
    %599 = arith.mulf %598, %572 : vector<2x16x8xf32>
    %cst_211 = arith.constant -0.00168282702 : f32
    %600 = vector.broadcast %cst_211 : f32 to vector<2x16x8xf32>
    %601 = arith.addf %600, %599 : vector<2x16x8xf32>
    %602 = arith.mulf %573, %601 : vector<2x16x8xf32>
    %603 = arith.addf %597, %602 : vector<2x16x8xf32>
    %cst_212 = arith.constant -1.45660715E-5 : f32
    %604 = vector.broadcast %cst_212 : f32 to vector<2x16x8xf32>
    %605 = arith.mulf %604, %574 : vector<2x16x8xf32>
    %606 = arith.addf %603, %605 : vector<2x16x8xf32>
    %607 = arith.mulf %593, %571 : vector<2x16x8xf32>
    %608 = tpu.reciprocal %606 {approx = true} : vector<2x16x8xf32> -> vector<2x16x8xf32>
    %609 = arith.mulf %607, %608 : vector<2x16x8xf32>
    %cst_213 = arith.constant -1.000000e+00 : f32
    %cst_214 = arith.constant 1.000000e+00 : f32
    %610 = vector.broadcast %cst_213 : f32 to vector<2x16x8xf32>
    %611 = arith.maximumf %610, %609 : vector<2x16x8xf32>
    %612 = vector.broadcast %cst_214 : f32 to vector<2x16x8xf32>
    %613 = arith.minimumf %612, %611 : vector<2x16x8xf32>
    %cst_215 = arith.constant 1.000000e+00 : f32
    %614 = vector.broadcast %cst_215 : f32 to vector<2x16x8xf32>
    %615 = arith.addf %614, %613 : vector<2x16x8xf32>
    %616 = arith.mulf %565, %615 : vector<2x16x8xf32>
    %c336 = arith.constant 336 : index
    %c0_216 = arith.constant 0 : index
    %617 = vector.load %arg2[%c336, %c0_216] : memref<384x128xbf16, #tpu.memory_space<vmem>>, vector<2x16xbf16>
    %618 = vector.shape_cast %617 : vector<2x16xbf16> to vector<1x2x16xbf16>
    %619 = vector.broadcast %618 : vector<1x2x16xbf16> to vector<2x2x16xbf16>
    %620 = arith.truncf %616 : vector<2x16x8xf32> to vector<2x16x8xbf16>
    "tpu.trace_start"() <{level = 10 : i32, message = "but,bth->buh"}> : () -> ()
    %cst_217 = arith.constant dense<0.000000e+00> : vector<2x2x8xf32>
    %621 = tpu.matmul %619, %620, %cst_217 {dimension_numbers = #tpu.dot_dimension_numbers<[2], [1], [1], [2], [0, 0, 0, 1, 1, 2], [0], [0]>} : vector<2x2x16xbf16>, vector<2x16x8xbf16>, vector<2x2x8xf32> -> vector<2x2x8xf32>
    "tpu.trace_stop"() : () -> ()
    %c176_218 = arith.constant 176 : index
    %c0_219 = arith.constant 0 : index
    %622 = vector.load %arg3[%c176_218, %c0_219] : memref<208x128xf32, #tpu.memory_space<vmem>>, vector<2x1xf32>
    %623 = vector.shape_cast %622 : vector<2x1xf32> to vector<1x2x1xf32>
    %624 = vector.broadcast %623 : vector<1x2x1xf32> to vector<2x2x8xf32>
    %625 = arith.addf %621, %624 : vector<2x2x8xf32>
    %c184 = arith.constant 184 : index
    %c0_220 = arith.constant 0 : index
    %626 = vector.load %arg3[%c184, %c0_220] : memref<208x128xf32, #tpu.memory_space<vmem>>, vector<2x1xf32>
    %627 = vector.shape_cast %626 : vector<2x1xf32> to vector<1x2x1xf32>
    %c192 = arith.constant 192 : index
    %c0_221 = arith.constant 0 : index
    %628 = vector.load %arg3[%c192, %c0_221] : memref<208x128xf32, #tpu.memory_space<vmem>>, vector<2x1xf32>
    %629 = vector.shape_cast %628 : vector<2x1xf32> to vector<1x2x1xf32>
    %cst_222 = arith.constant dense<0.000000e+00> : vector<2x8xf32>
    %630 = vector.multi_reduction <add>, %625, %cst_222 [1] : vector<2x2x8xf32> to vector<2x8xf32>
    %631 = vector.shape_cast %630 : vector<2x8xf32> to vector<2x1x8xf32>
    %cst_223 = arith.constant 2.000000e+00 : f32
    %632 = vector.broadcast %cst_223 : f32 to vector<2x1x8xf32>
    %633 = arith.divf %631, %632 : vector<2x1x8xf32>
    %634 = vector.broadcast %633 : vector<2x1x8xf32> to vector<2x2x8xf32>
    %635 = arith.subf %625, %634 : vector<2x2x8xf32>
    %636 = arith.mulf %635, %635 : vector<2x2x8xf32>
    %cst_224 = arith.constant dense<0.000000e+00> : vector<2x8xf32>
    %637 = vector.multi_reduction <add>, %636, %cst_224 [1] : vector<2x2x8xf32> to vector<2x8xf32>
    %638 = vector.shape_cast %637 : vector<2x8xf32> to vector<2x1x8xf32>
    %cst_225 = arith.constant 2.000000e+00 : f32
    %639 = vector.broadcast %cst_225 : f32 to vector<2x1x8xf32>
    %640 = arith.divf %638, %639 : vector<2x1x8xf32>
    %641 = vector.broadcast %633 : vector<2x1x8xf32> to vector<2x2x8xf32>
    %642 = arith.subf %625, %641 : vector<2x2x8xf32>
    %cst_226 = arith.constant 9.99999974E-6 : f32
    %643 = vector.broadcast %cst_226 : f32 to vector<2x1x8xf32>
    %644 = arith.addf %640, %643 : vector<2x1x8xf32>
    %645 = math.rsqrt %644 : vector<2x1x8xf32>
    %646 = vector.broadcast %645 : vector<2x1x8xf32> to vector<2x2x8xf32>
    %647 = arith.mulf %642, %646 : vector<2x2x8xf32>
    %648 = vector.broadcast %627 : vector<1x2x1xf32> to vector<2x2x8xf32>
    %649 = arith.mulf %647, %648 : vector<2x2x8xf32>
    %650 = vector.broadcast %629 : vector<1x2x1xf32> to vector<2x2x8xf32>
    %651 = arith.addf %649, %650 : vector<2x2x8xf32>
    %cst_227 = arith.constant 5.000000e-01 : f32
    %652 = vector.broadcast %cst_227 : f32 to vector<2x2x8xf32>
    %653 = arith.mulf %652, %651 : vector<2x2x8xf32>
    %cst_228 = arith.constant 0.707106769 : f32
    %654 = vector.broadcast %cst_228 : f32 to vector<2x2x8xf32>
    %655 = arith.mulf %651, %654 : vector<2x2x8xf32>
    %cst_229 = arith.constant -4.000000e+00 : f32
    %cst_230 = arith.constant 4.000000e+00 : f32
    %656 = vector.broadcast %cst_229 : f32 to vector<2x2x8xf32>
    %657 = arith.maximumf %656, %655 : vector<2x2x8xf32>
    %658 = vector.broadcast %cst_230 : f32 to vector<2x2x8xf32>
    %659 = arith.minimumf %658, %657 : vector<2x2x8xf32>
    %660 = arith.mulf %659, %659 : vector<2x2x8xf32>
    %661 = arith.mulf %660, %660 : vector<2x2x8xf32>
    %662 = arith.mulf %661, %661 : vector<2x2x8xf32>
    %cst_231 = arith.constant -2.954600e-03 : f32
    %663 = vector.broadcast %cst_231 : f32 to vector<2x2x8xf32>
    %664 = arith.mulf %663, %660 : vector<2x2x8xf32>
    %cst_232 = arith.constant -0.0160960332 : f32
    %665 = vector.broadcast %cst_232 : f32 to vector<2x2x8xf32>
    %666 = arith.addf %665, %664 : vector<2x2x8xf32>
    %cst_233 = arith.constant -5.69250624E-5 : f32
    %667 = vector.broadcast %cst_233 : f32 to vector<2x2x8xf32>
    %668 = arith.mulf %667, %660 : vector<2x2x8xf32>
    %cst_234 = arith.constant -7.34990637E-4 : f32
    %669 = vector.broadcast %cst_234 : f32 to vector<2x2x8xf32>
    %670 = arith.addf %669, %668 : vector<2x2x8xf32>
    %671 = arith.mulf %661, %670 : vector<2x2x8xf32>
    %672 = arith.addf %666, %671 : vector<2x2x8xf32>
    %cst_235 = arith.constant 2.77068146E-8 : f32
    %673 = vector.broadcast %cst_235 : f32 to vector<2x2x8xf32>
    %674 = arith.mulf %673, %660 : vector<2x2x8xf32>
    %cst_236 = arith.constant -2.10102394E-6 : f32
    %675 = vector.broadcast %cst_236 : f32 to vector<2x2x8xf32>
    %676 = arith.addf %675, %674 : vector<2x2x8xf32>
    %cst_237 = arith.constant -2.72614237E-10 : f32
    %677 = vector.broadcast %cst_237 : f32 to vector<2x2x8xf32>
    %678 = arith.mulf %677, %661 : vector<2x2x8xf32>
    %679 = arith.addf %676, %678 : vector<2x2x8xf32>
    %680 = arith.mulf %662, %679 : vector<2x2x8xf32>
    %681 = arith.addf %672, %680 : vector<2x2x8xf32>
    %cst_238 = arith.constant -0.00737332925 : f32
    %682 = vector.broadcast %cst_238 : f32 to vector<2x2x8xf32>
    %683 = arith.mulf %682, %660 : vector<2x2x8xf32>
    %cst_239 = arith.constant -0.0142647391 : f32
    %684 = vector.broadcast %cst_239 : f32 to vector<2x2x8xf32>
    %685 = arith.addf %684, %683 : vector<2x2x8xf32>
    %cst_240 = arith.constant -2.13374049E-4 : f32
    %686 = vector.broadcast %cst_240 : f32 to vector<2x2x8xf32>
    %687 = arith.mulf %686, %660 : vector<2x2x8xf32>
    %cst_241 = arith.constant -0.00168282702 : f32
    %688 = vector.broadcast %cst_241 : f32 to vector<2x2x8xf32>
    %689 = arith.addf %688, %687 : vector<2x2x8xf32>
    %690 = arith.mulf %661, %689 : vector<2x2x8xf32>
    %691 = arith.addf %685, %690 : vector<2x2x8xf32>
    %cst_242 = arith.constant -1.45660715E-5 : f32
    %692 = vector.broadcast %cst_242 : f32 to vector<2x2x8xf32>
    %693 = arith.mulf %692, %662 : vector<2x2x8xf32>
    %694 = arith.addf %691, %693 : vector<2x2x8xf32>
    %695 = arith.mulf %681, %659 : vector<2x2x8xf32>
    %696 = tpu.reciprocal %694 {approx = true} : vector<2x2x8xf32> -> vector<2x2x8xf32>
    %697 = arith.mulf %695, %696 : vector<2x2x8xf32>
    %cst_243 = arith.constant -1.000000e+00 : f32
    %cst_244 = arith.constant 1.000000e+00 : f32
    %698 = vector.broadcast %cst_243 : f32 to vector<2x2x8xf32>
    %699 = arith.maximumf %698, %697 : vector<2x2x8xf32>
    %700 = vector.broadcast %cst_244 : f32 to vector<2x2x8xf32>
    %701 = arith.minimumf %700, %699 : vector<2x2x8xf32>
    %cst_245 = arith.constant 1.000000e+00 : f32
    %702 = vector.broadcast %cst_245 : f32 to vector<2x2x8xf32>
    %703 = arith.addf %702, %701 : vector<2x2x8xf32>
    %704 = arith.mulf %653, %703 : vector<2x2x8xf32>
    %705 = vector.extract_strided_slice %704 {offsets = [0, 0, 0], sizes = [2, 1, 8], strides = [1, 1, 1]} : vector<2x2x8xf32> to vector<2x1x8xf32>
    %706 = vector.shape_cast %705 : vector<2x1x8xf32> to vector<2x8xf32>
    %707 = arith.truncf %706 : vector<2x8xf32> to vector<2x8xbf16>
    %c352 = arith.constant 352 : index
    %c0_246 = arith.constant 0 : index
    %708 = vector.load %arg2[%c352, %c0_246] : memref<384x128xbf16, #tpu.memory_space<vmem>>, vector<8x3xbf16>
    %cst_247 = arith.constant dense<0.000000e+00> : vector<2x3xf32>
    %709 = tpu.matmul %707, %708, %cst_247 {dimension_numbers = #tpu.dot_dimension_numbers<[1], [0], [0], [1], [0, 0, 1, 1], [], []>} : vector<2x8xbf16>, vector<8x3xbf16>, vector<2x3xf32> -> vector<2x3xf32>
    %710 = vector.extract_strided_slice %704 {offsets = [0, 1, 0], sizes = [2, 1, 8], strides = [1, 1, 1]} : vector<2x2x8xf32> to vector<2x1x8xf32>
    %711 = vector.shape_cast %710 : vector<2x1x8xf32> to vector<2x8xf32>
    %712 = arith.truncf %711 : vector<2x8xf32> to vector<2x8xbf16>
    %c368 = arith.constant 368 : index
    %c0_248 = arith.constant 0 : index
    %713 = vector.load %arg2[%c368, %c0_248] : memref<384x128xbf16, #tpu.memory_space<vmem>>, vector<8x3xbf16>
    %cst_249 = arith.constant dense<0.000000e+00> : vector<2x3xf32>
    %714 = tpu.matmul %712, %713, %cst_249 {dimension_numbers = #tpu.dot_dimension_numbers<[1], [0], [0], [1], [0, 0, 1, 1], [], []>} : vector<2x8xbf16>, vector<8x3xbf16>, vector<2x3xf32> -> vector<2x3xf32>
    %c200 = arith.constant 200 : index
    %c0_250 = arith.constant 0 : index
    %715 = vector.load %arg3[%c200, %c0_250] : memref<208x128xf32, #tpu.memory_space<vmem>>, vector<1x3xf32>
    %716 = arith.addf %709, %714 : vector<2x3xf32>
    %717 = vector.broadcast %715 : vector<1x3xf32> to vector<2x3xf32>
    %718 = arith.addf %717, %716 : vector<2x3xf32>
    %c0_251 = arith.constant 0 : index
    %c0_252 = arith.constant 0 : index
    %719 = vector.load %arg4[%c0_251, %c0_252] : memref<2x3xf32, #tpu.memory_space<vmem>>, vector<2x3xf32>
    tpu.vector_store %arg4[%c0_251, %c0_252], %718 {strides = array<i32>} : memref<2x3xf32, #tpu.memory_space<vmem>>, vector<2x3xf32>,
    return
  }
  func.func @transform_0(%arg0: i32) -> (i32, i32, i32) {
    %c0_i32 = arith.constant 0 : i32
    %c0_i32_0 = arith.constant 0 : i32
    %c0_i32_1 = arith.constant 0 : i32
    return %arg0, %c0_i32, %c0_i32_0 : i32, i32, i32
  }
  func.func @transform_1(%arg0: i32) -> (i32, i32) {
    %c0_i32 = arith.constant 0 : i32
    %c0_i32_0 = arith.constant 0 : i32
    %c0_i32_1 = arith.constant 0 : i32
    return %c0_i32, %c0_i32_0 : i32, i32
  }
  func.func @transform_2(%arg0: i32) -> (i32, i32) {
    %c0_i32 = arith.constant 0 : i32
    %c0_i32_0 = arith.constant 0 : i32
    %c0_i32_1 = arith.constant 0 : i32
    return %c0_i32, %c0_i32_0 : i32, i32
  }
  func.func @transform_3(%arg0: i32) -> (i32, i32) {
    %c0_i32 = arith.constant 0 : i32
    %c0_i32_0 = arith.constant 0 : i32
    return %arg0, %c0_i32 : i32, i32
  }
}

</mosaic_0001>

<bundles_post_ra>
// kernel: tpu_custom_call.1
= control target key start
LH: loop header
LB: loop body
LE: loop exit
PB: predicated region body
PF: predicated region fallthrough
CT: control target
= control target key end

     0   :  { %8 = vsyncpa [#allocation3], 0  ;;  %s2660_s0 = inlined_call_operand.hbm [shape: f32[2,8,16], index: 0, kind: input, shape index: {}]   ;;  %s2661_s1 = inlined_call_operand.hbm [shape: bf16[384,128], index: 1, kind: input, shape index: {}]   ;;  %s2662_s2 = inlined_call_operand.hbm [shape: f32[208,128], index: 2, kind: input, shape index: {}]   ;;  %s2663_s3 = inlined_call_operand.hbm [shape: f32[2,3], index: 3, kind: output, shape index: {}]  }
   0x1   :  { %9 = vsyncpa [#allocation6], 0  ;;  %s28_s14 = sshll.u32 %s2661_s1, 4  ;;  %s29_s14 = int_to_ptr.hbm [resolvable:$true] %s28_s14 }
   0x2   :  { %10 = vsyncpa [#allocation4], 0  ;;  %s2370_s15 = smov [#allocation5]   ;;  %s15_s19 = sshll.u32 %s2660_s0, 4  ;;  %s16_s19 = int_to_ptr.hbm [resolvable:$true] %s15_s19 }
   0x3   :  { %s30_s16 = sshll.u32 %s2370_s15, 4  ;;  %s2371_s20 = smov 64   ;;  %s31_s16 = int_to_ptr.vmem [resolvable:$true] %s30_s16 }
   0x4   :  { %s2372_s21 = smov 4   ;;  %s2373_s22 = smov [#allocation2]  }
   0x5   :  { %36 = dma.hbm_to_vmem [thread:$0]  %s29_s14, 3072, %s31_s16, [#allocation6], %s2371_s20, %s2371_s20, %s2372_s21  }
   0x6   :  { %s17_s23 = sshll.u32 %s2373_s22, 4  ;;  %s2374_s24 = smov 128   ;;  %s18_s23 = int_to_ptr.vmem [resolvable:$true] %s17_s23 }
   0x7   :  { %s2375_s25 = smov 8   ;;  %s41_s27 = sshll.u32 %s2662_s2, 4  ;;  %s42_s27 = int_to_ptr.hbm [resolvable:$true] %s41_s27 }
   0x8   :  { %23 = dma.hbm_to_vmem [thread:$0]  %s16_s19, 256, %s18_s23, [#allocation3], %s2374_s24, %s2374_s24, %s2375_s25  }
   0x9   :  { %s2376_s28 = smov [#allocation7]  }
   0xa   :  { %s43_s29 = sshll.u32 %s2376_s28, 4  ;;  %s44_s29 = int_to_ptr.vmem [resolvable:$true] %s43_s29 }
   0xb   :  { %49 = dma.hbm_to_vmem [thread:$0]  %s42_s27, 3328, %s44_s29, [#allocation6], %s2374_s24, %s2374_s24, %s2375_s25  }
   0xc   :  { %2364 = dma.done.wait [#allocation3], 256  }
   0xd   :  { %2365 = vsyncadd [#allocation3], 4294967040 }
   0xe   :  { %2366 = dma.done.wait [#allocation6], 6400  }
   0xf   :  { %2367 = vsyncadd [#allocation6], 4294960896  ;;  %vm65_vm0 = vcmask 130048   ;;  %v63_v0 = vld [vmem:[#allocation2] sm:$0xff]  ;;  %v64_v2 = vld [vmem:[#allocation2 + $0x8] sm:$0xff]  ;;  %v2377_v4 = vmov 16.0  }
  0x10   :  { %v66_v1 = vsel %vm65_vm0, %v63_v0, 0.0  ;;  %v73_v3 = vsel %vm65_vm0, %v64_v2, 0.0  ;;  %2172 = vrcp.f32 %v2377_v4  ;;  %v212_v7 = vld [vmem:[#allocation7] sm:$0xff]  ;;  %v2378_v8 = vmov 0   ;;  %v224_v11 = vld [vmem:[#allocation7 + $0x8] sm:$0xff]  ;;  %s2384_s0 = smov [#allocation8]  }
  0x11   :  { %156 = vadd.xlane.f32.xlu0 %v66_v1  ;;  %2157 = vset.pattern.permute.xlu2 %v2378_v8  ;;  %v2379_v24 = vmov 8.0   ;;  %v67_v25 = vrot.slane %v66_v1, 4  ;;  %v74_v26 = vrot.slane %v73_v3, 4  ;;  %v2380_v49 = vmov 7.0   ;;  %s1961_s2 = sshll.u32 %s2384_s0, 4  ;;  %s1963_s5 = sshll.u32 %s2663_s3, 4  ;;  %s1962_s2 = int_to_ptr.vmem [resolvable:$true] %s1961_s2  ;;  %s1964_s5 = int_to_ptr.hbm [resolvable:$true] %s1963_s5 }
  0x12   :  { %2158 = vset.pattern.permute.xlu1 %v2378_v8  ;;  %219 = vperm.xlu2 %2157, %v212_v7   ;;  %2174 = vrcp.f32 %v2379_v24  ;;  %v2381_v4 = vmov 15.0   ;;  %vm349_vm15 = vcmask 261120  }
  0x13   :  { %2159 = vset.pattern.permute.xlu0 %v2378_v8  ;;  %v68_v28 = vadd.f32 %v67_v25, %v66_v1  ;;  %v75_v30 = vadd.f32 %v74_v26, %v73_v3  ;;  %2176 = vrcp.f32 %v2380_v49 }
  0x14   :  { %2178 = vrcp.f32 %v2381_v4 }
  0x15   :  { %v69_v31 = vrot.slane %v68_v28, 2  ;;  %v76_v33 = vrot.slane %v75_v30, 2 }
  0x16   :  { %v2173_v5 = vpop.eup %2172 }
  0x17   :  { %v161_v6 = vmul.f32 16.0, %v2173_v5  ;;  %vm165_vm1 = vweird.f32 %v2173_v5  ;;  %v70_v34 = vadd.f32 %v69_v31, %v68_v28  ;;  %v77_v36 = vadd.f32 %v76_v33, %v75_v30 }
  0x18   :  { %v2175_v27 = vpop.eup %2174 }
  0x19   :  { %158 = vadd.xlane.f32.xlu0 %v73_v3  ;;  %v162_v9 = vsub.f32 1.0, %v161_v6  ;;  %v81_v29 = vmul.f32 8.0, %v2175_v27  ;;  %v71_v37 = vrot.slane %v70_v34, 1  ;;  %v78_v39 = vrot.slane %v77_v36, 1  ;;  %v2177_v54 = vpop.eup %2176 }
  0x1a   :  { %227 = vperm.xlu2 %2157, %v224_v11   ;;  %vm85_vm2 = vweird.f32 %v2175_v27  ;;  %v108_v56 = vmul.f32 7.0, %v2177_v54  ;;  %vm112_vm3 = vweird.f32 %v2177_v54 }
  0x1b   :  { %v163_v10 = vmul.f32 %v2173_v5, %v162_v9  ;;  %v82_v32 = vsub.f32 1.0, %v81_v29  ;;  %v72_v40 = vadd.f32 %v71_v37, %v70_v34  ;;  %v79_v42 = vadd.f32 %v78_v39, %v77_v36  ;;  %v2179_v9 = vpop.eup %2178 }
  0x1c   :  { %v109_v59 = vsub.f32 1.0, %v108_v56  ;;  %vm184_vm4 = vweird.f32 %v2179_v9 }
  0x1d   :  { %v164_v12 = vadd.f32 %v2173_v5, %v163_v10  ;;  %v83_v35 = vmul.f32 %v2175_v27, %v82_v32  ;;  %v180_v10 = vmul.f32 15.0, %v2179_v9 }
  0x1e   :  { %v110_v62 = vmul.f32 %v2177_v54, %v109_v59 }
  0x1f   :  { %v166_v13 = vsel %vm165_vm1, %v2173_v5, %v164_v12  ;;  %v84_v38 = vadd.f32 %v2175_v27, %v83_v35  ;;  %v181_v11 = vsub.f32 1.0, %v180_v10  ;;  %v2160_v10 = vld [vmem:[#allocation7 + $0x10] ss:$0 sm:$0xff] }
  0x20   :  { %v111_v1 = vadd.f32 %v2177_v54, %v110_v62 }
  0x21   :  { %v2426_v41 = vsel %vm85_vm2, %v2175_v27, %v84_v38  ;;  %v2122_v38 = vld [vmem:[#allocation5] sm:$0xff] }
  0x22   :  { %v87_v43 = vmul.f32 %v2426_v41, %v72_v40  ;;  %v88_v44 = vmul.f32 %v2426_v41, %v79_v42  ;;  %v113_v5 = vsel %vm112_vm3, %v2177_v54, %v111_v1  ;;  %255 = vmatpush.bf16.msra.mxu0 %v2122_v38  ;;  %v2123_v38 = vld [vmem:[#allocation5 + $0x8] sm:$0xff] }
  0x24   :  { %v2430_v45 = vsub.f32 %v63_v0, %v87_v43  ;;  %v2432_v46 = vsub.f32 %v64_v2, %v88_v44 }
  0x26   :  { %v91_v47 = vmul.f32 %v2430_v45, %v2430_v45  ;;  %v92_v48 = vmul.f32 %v2432_v46, %v2432_v46 }
  0x28   :  { %v93_v50 = vsel %vm65_vm0, %v91_v47, 0.0  ;;  %v100_v51 = vsel %vm65_vm0, %v92_v48, 0.0 }
  0x29   :  { %v94_v52 = vrot.slane %v93_v50, 4  ;;  %v101_v53 = vrot.slane %v100_v51, 4 }
  0x2b   :  { %v95_v55 = vadd.f32 %v94_v52, %v93_v50  ;;  %v102_v57 = vadd.f32 %v101_v53, %v100_v51 }
  0x2d   :  { %v96_v58 = vrot.slane %v95_v55, 2  ;;  %v103_v60 = vrot.slane %v102_v57, 2 }
  0x2f   :  { %v97_v61 = vadd.f32 %v96_v58, %v95_v55  ;;  %v104_v63 = vadd.f32 %v103_v60, %v102_v57 }
  0x84   :  { %v157_v14 = vpop.xlane.xlu0 %156 }
  0x85   :  { %v167_v15 = vmul.f32 %v166_v13, %v157_v14 }
  0x87   :  { %v2416_v16 = vsub.f32 %v63_v0, %v167_v15  ;;  %v98_v0 = vrot.slane %v97_v61, 1  ;;  %v182_v15 = vmul.f32 %v2179_v9, %v181_v11 }
  0x89   :  { %v171_v17 = vmul.f32 %v2416_v16, %v2416_v16  ;;  %v99_v3 = vadd.f32 %v98_v0, %v97_v61 }
  0x8b   :  { %v173_v18 = vsel %vm65_vm0, %v171_v17, 0.0  ;;  %v114_v7 = vmul.f32 %v113_v5, %v99_v3 }
  0x8c   :  { %174 = vadd.xlane.f32.xlu1 %v173_v18  ;;  %v159_v19 = vpop.xlane.xlu0 %158 }
  0x8d   :  { %v168_v20 = vmul.f32 %v166_v13, %v159_v19  ;;  %2180 = vrsqrt.f32 %v114_v7  ;;  %v183_v19 = vadd.f32 %v2179_v9, %v182_v15  ;;  %vm123_vm5 = vcmp.eq.f32.partialorder %v114_v7, inf }
  0x8e   :  { %v126_v39 = vand.u32 2147483648, %v114_v7  ;;  %vm125_vm7 = vcmp.eq.f32.partialorder %v114_v7, 0.0 }
  0x8f   :  { %v2421_v21 = vsub.f32 %v64_v2, %v168_v20  ;;  %v105_v2 = vrot.slane %v104_v63, 1 }
  0x91   :  { %v172_v22 = vmul.f32 %v2421_v21, %v2421_v21  ;;  %v106_v6 = vadd.f32 %v105_v2, %v104_v63  ;;  %v220_v63 = vpop.permute.xlu2 %219 }
  0x93   :  { %v176_v23 = vsel %vm65_vm0, %v172_v22, 0.0  ;;  %v115_v8 = vmul.f32 %v113_v5, %v106_v6  ;;  %v2181_v12 = vpop.eup %2180 }
  0x94   :  { %177 = vadd.xlane.f32.xlu1 %v176_v23  ;;  %v117_v14 = vmul.f32 %v2181_v12, %v114_v7  ;;  %v185_v23 = vsel %vm184_vm4, %v2179_v9, %v183_v19 }
  0x95   :  { %2182 = vrsqrt.f32 %v115_v8  ;;  %vm135_vm6 = vcmp.eq.f32.partialorder %v115_v8, inf  ;;  %v138_v42 = vand.u32 2147483648, %v115_v8  ;;  %vm137_vm8 = vcmp.eq.f32.partialorder %v115_v8, 0.0 }
  0x96   :  { %v118_v18 = vmul.f32 %v2181_v12, %v117_v14  ;;  %v2161_v14 = vld [vmem:[#allocation7 + $0x18] ss:$0 sm:$0xff] }
  0x98   :  { %v119_v22 = vmul.f32 0.5, %v118_v18 }
  0x9a   :  { %v120_v27 = vsub.f32 1.5, %v119_v22 }
  0x9b   :  { %v2183_v13 = vpop.eup %2182 }
  0x9c   :  { %v129_v17 = vmul.f32 %v2183_v13, %v115_v8  ;;  %v121_v29 = vmul.f32 %v2181_v12, %v120_v27 }
  0x9e   :  { %v130_v20 = vmul.f32 %v2183_v13, %v129_v17  ;;  %v122_v34 = vmul.f32 %v121_v29, %v114_v7  ;;  %v228_v17 = vpop.permute.xlu2 %227 }
  0xa0   :  { %v131_v24 = vmul.f32 0.5, %v130_v20  ;;  %v124_v40 = vsel %vm123_vm5, %v114_v7, %v122_v34 }
  0xa1   :  { %v127_v49 = vsel %vm125_vm7, %v126_v39, %v124_v40 }
  0xa2   :  { %v132_v28 = vsub.f32 1.5, %v131_v24  ;;  %vm140_vm11 = vcmp.lt.f32.partialorder %v127_v49, 0.0001 }
  0xa4   :  { %v133_v30 = vmul.f32 %v2183_v13, %v132_v28 }
  0xa6   :  { %v134_v36 = vmul.f32 %v133_v30, %v115_v8  ;;  %v2124_v30 = vld [vmem:[#allocation5 + $0x10] sm:$0xff] }
  0xa7   :  { %359 = vmatpush.bf16.msra.mxu1 %v2124_v30 }
  0xa8   :  { %v136_v44 = vsel %vm135_vm6, %v115_v8, %v134_v36 }
  0xa9   :  { %v139_v50 = vsel %vm137_vm8, %v138_v42, %v136_v44  ;;  %vm692_vm8 = vcmask 1043456  }
  0xaa   :  { %vm141_vm12 = vcmp.lt.f32.partialorder %v139_v50, 0.0001 }
  0xab   :  { %360 = vmatpush.bf16.msra.mxu1 %v2123_v38  ;;  %v2129_v38 = vld [vmem:[#allocation5 + $0x38] sm:$0xff] }
  0xff   :  { %v175_v25 = vpop.xlane.xlu1 %174 }
 0x100   :  { %v186_v26 = vmul.f32 %v185_v23, %v175_v25 }
 0x102   :  { %2184 = vrsqrt.f32 %v186_v26  ;;  %vm195_vm9 = vcmp.eq.f32.partialorder %v186_v26, inf  ;;  %v198_v55 = vand.u32 2147483648, %v186_v26  ;;  %vm197_vm10 = vcmp.eq.f32.partialorder %v186_v26, 0.0 }
 0x107   :  { %v178_v31 = vpop.xlane.xlu1 %177 }
 0x108   :  { %v2185_v32 = vpop.eup %2184  ;;  %v187_v33 = vmul.f32 %v185_v23, %v178_v31 }
 0x109   :  { %v189_v35 = vmul.f32 %v2185_v32, %v186_v26 }
 0x10a   :  { %2186 = vrsqrt.f32 %v187_v33  ;;  %vm207_vm13 = vcmp.eq.f32.partialorder %v187_v33, inf  ;;  %v210_v1 = vand.u32 2147483648, %v187_v33  ;;  %vm209_vm14 = vcmp.eq.f32.partialorder %v187_v33, 0.0 }
 0x10b   :  { %v190_v37 = vmul.f32 %v2185_v32, %v189_v35  ;;  %2188 = vrcp.f32 %v127_v49 }
 0x10c   :  { %2190 = vrcp.f32 %v139_v50 }
 0x10d   :  { %v191_v43 = vmul.f32 0.5, %v190_v37 }
 0x10f   :  { %v192_v47 = vsub.f32 1.5, %v191_v43 }
 0x110   :  { %v2187_v48 = vpop.eup %2186 }
 0x111   :  { %v193_v51 = vmul.f32 %v2185_v32, %v192_v47  ;;  %v201_v52 = vmul.f32 %v2187_v48, %v187_v33  ;;  %v2189_v60 = vpop.eup %2188 }
 0x112   :  { %v2191_v62 = vpop.eup %2190  ;;  %v144_v3 = vsel %vm140_vm11, 1.0, %v2189_v60 }
 0x113   :  { %v194_v53 = vmul.f32 %v193_v51, %v186_v26  ;;  %v202_v54 = vmul.f32 %v2187_v48, %v201_v52  ;;  %v145_v4 = vsel %vm141_vm12, 1.0, %v2191_v62  ;;  %v147_v7 = vmul.f32 %v144_v3, %v2430_v45 }
 0x114   :  { %v148_v8 = vmul.f32 %v145_v4, %v2432_v46 }
 0x115   :  { %v196_v56 = vsel %vm195_vm9, %v186_v26, %v194_v53  ;;  %v203_v57 = vmul.f32 0.5, %v202_v54  ;;  %v150_v12 = vmul.f32 %v2160_v10, %v147_v7  ;;  %vm685_vm9 = vcmask 64512  }
 0x116   :  { %v199_v58 = vsel %vm197_vm10, %v198_v55, %v196_v56  ;;  %v151_v13 = vmul.f32 %v2160_v10, %v148_v8 }
 0x117   :  { %v204_v59 = vsub.f32 1.5, %v203_v57  ;;  %2192 = vrcp.f32 %v199_v58  ;;  %v154_v20 = vadd.f32 %v2161_v14, %v150_v12 }
 0x118   :  { %v155_v22 = vadd.f32 %v2161_v14, %v151_v13 }
 0x119   :  { %v205_v61 = vmul.f32 %v2187_v48, %v204_v59 }
 0x11b   :  { %v206_v0 = vmul.f32 %v205_v61, %v187_v33 }
 0x11d   :  { %v2193_v2 = vpop.eup %2192  ;;  %v208_v5 = vsel %vm207_vm13, %v187_v33, %v206_v0 }
 0x11e   :  { %v211_v6 = vsel %vm209_vm14, %v210_v1, %v208_v5  ;;  %v215_v9 = vmul.f32 %v2193_v2, %v2416_v16  ;;  %v2162_v16 = vld [vmem:[#allocation7 + $0x20] ss:$0 sm:$0xff] }
 0x11f   :  { %2194 = vrcp.f32 %v211_v6 }
 0x120   :  { %v222_v11 = vmul.f32 %v220_v63, %v215_v9 }
 0x122   :  { %v230_v23 = vadd.f32 %v228_v17, %v222_v11 }
 0x124   :  { %v232_v25 = vadd.f32 %v230_v23, %v154_v20 }
 0x125   :  { %v2195_v15 = vpop.eup %2194 }
 0x126   :  { %v216_v18 = vmul.f32 %v2195_v15, %v2421_v21 }
 0x128   :  { %v223_v19 = vmul.f32 %v220_v63, %v216_v18 }
 0x12a   :  { %v231_v24 = vadd.f32 %v228_v17, %v223_v19 }
 0x12c   :  { %v233_v45 = vadd.f32 %v231_v24, %v155_v22 }
 0x12e   :  { %v234_v26 = vpack.c.bf16 %v233_v45, %v232_v25 }
 0x130   :  { %1978 = vmatmul.msk.bf16.vlgmr.msra.gmra.mxu0 %vm65_vm0, %v234_v26 }
 0x1ad   :  { %v257_v46 = vpop.f32.mrf.mxu0 }
 0x1ae   :  { %v2445_v27 = vadd.f32 %v2162_v16, %v257_v46 }
 0x1b0   :  { %v264_v28 = vmul.f32 0.70710677, %v2445_v27  ;;  %v262_v30 = vmul.f32 0.5, %v2445_v27  ;;  %v2163_v27 = vld [vmem:[#allocation7 + $0x28] ss:$0 sm:$0xff] }
 0x1b2   :  { %v1979_v29 = vclamps-f32 %v264_v28, 4.0 }
 0x1b4   :  { %v270_v31 = vmul.f32 %v1979_v29, %v1979_v29 }
 0x1b5   :  { %v259_v21 = vpop.f32.mrf.mxu0 }
 0x1b6   :  { %v272_v32 = vmul.f32 %v270_v31, %v270_v31  ;;  %v280_v33 = vmul.f32 -5.6925062e-05, %v270_v31  ;;  %v288_v34 = vmul.f32 2.7706815e-08, %v270_v31  ;;  %v300_v35 = vmul.f32 -0.0073733293, %v270_v31 }
 0x1b7   :  { %v304_v36 = vmul.f32 -0.00021337405, %v270_v31  ;;  %v260_v37 = vadd.f32 %v2162_v16, %v259_v21  ;;  %v276_v48 = vmul.f32 -0.0029546, %v270_v31 }
 0x1b8   :  { %v274_v39 = vmul.f32 %v272_v32, %v272_v32  ;;  %v282_v40 = vadd.f32 -0.00073499064, %v280_v33  ;;  %v290_v43 = vadd.f32 -2.101024e-06, %v288_v34  ;;  %v292_v44 = vmul.f32 -2.7261424e-10, %v272_v32 }
 0x1b9   :  { %v306_v42 = vadd.f32 -0.001682827, %v304_v36  ;;  %v265_v47 = vmul.f32 0.70710677, %v260_v37  ;;  %v302_v49 = vadd.f32 -0.014264739, %v300_v35 }
 0x1ba   :  { %v284_v52 = vmul.f32 %v282_v40, %v272_v32  ;;  %v312_v54 = vmul.f32 -1.45660715e-05, %v274_v39  ;;  %v294_v55 = vadd.f32 %v292_v44, %v290_v43  ;;  %v278_v57 = vadd.f32 -0.016096033, %v276_v48  ;;  %v2132_v34 = vld [vmem:[#allocation5 + $0x50] sm:$0xff]  ;;  %v2131_v35 = vld [vmem:[#allocation5 + $0x48] sm:$0xff] }
 0x1bb   :  { %v308_v50 = vmul.f32 %v306_v42, %v272_v32  ;;  %v1980_v51 = vclamps-f32 %v265_v47, 4.0  ;;  %v263_v31 = vmul.f32 0.5, %v260_v37  ;;  %502 = vmatpush.bf16.msra.mxu2 %v2132_v34  ;;  %v2130_v36 = vld [vmem:[#allocation5 + $0x40] sm:$0xff]  ;;  %v2128_v37 = vld [vmem:[#allocation5 + $0x30] sm:$0xff] }
 0x1bc   :  { %v286_v62 = vadd.f32 %v284_v52, %v278_v57  ;;  %v296_v1 = vmul.f32 %v294_v55, %v274_v39  ;;  %v2127_v39 = vld [vmem:[#allocation5 + $0x28] sm:$0xff]  ;;  %v2126_v44 = vld [vmem:[#allocation5 + $0x20] sm:$0xff] }
 0x1bd   :  { %v310_v53 = vadd.f32 %v308_v50, %v302_v49  ;;  %v271_v56 = vmul.f32 %v1980_v51, %v1980_v51  ;;  %v2125_v49 = vld [vmem:[#allocation5 + $0x18] sm:$0xff] }
 0x1be   :  { %v298_v12 = vadd.f32 %v296_v1, %v286_v62 }
 0x1bf   :  { %v314_v58 = vadd.f32 %v312_v54, %v310_v53  ;;  %v273_v59 = vmul.f32 %v271_v56, %v271_v56  ;;  %v281_v60 = vmul.f32 -5.6925062e-05, %v271_v56  ;;  %v289_v61 = vmul.f32 2.7706815e-08, %v271_v56  ;;  %503 = vmatpush.bf16.msra.mxu2 %v2131_v35 }
 0x1c0   :  { %v301_v63 = vmul.f32 -0.0073733293, %v271_v56  ;;  %v305_v0 = vmul.f32 -0.00021337405, %v271_v56  ;;  %v277_v2 = vmul.f32 -0.0029546, %v271_v56  ;;  %v316_v22 = vmul.f32 %v1979_v29, %v298_v12 }
 0x1c1   :  { %v283_v3 = vadd.f32 -0.00073499064, %v281_v60  ;;  %v291_v4 = vadd.f32 -2.101024e-06, %v289_v61  ;;  %2196 = vrcp.f32 %v314_v58  ;;  %v275_v5 = vmul.f32 %v273_v59, %v273_v59 }
 0x1c2   :  { %v293_v6 = vmul.f32 -2.7261424e-10, %v273_v59  ;;  %v307_v7 = vadd.f32 -0.001682827, %v305_v0  ;;  %v303_v10 = vadd.f32 -0.014264739, %v301_v63 }
 0x1c3   :  { %v285_v8 = vmul.f32 %v283_v3, %v273_v59  ;;  %v279_v13 = vadd.f32 -0.016096033, %v277_v2  ;;  %v313_v15 = vmul.f32 -1.45660715e-05, %v275_v5  ;;  %504 = vmatpush.bf16.msra.mxu2 %v2130_v36 }
 0x1c4   :  { %v295_v9 = vadd.f32 %v293_v6, %v291_v4  ;;  %v309_v11 = vmul.f32 %v307_v7, %v273_v59 }
 0x1c5   :  { %v287_v17 = vadd.f32 %v285_v8, %v279_v13 }
 0x1c6   :  { %v311_v14 = vadd.f32 %v309_v11, %v303_v10  ;;  %v297_v18 = vmul.f32 %v295_v9, %v275_v5 }
 0x1c7   :  { %v2197_v19 = vpop.eup %2196  ;;  %505 = vmatpush.bf16.msra.mxu2 %v2129_v38 }
 0x1c8   :  { %v315_v20 = vadd.f32 %v313_v15, %v311_v14  ;;  %v320_v23 = vmul.f32 %v2197_v19, %v316_v22  ;;  %v299_v24 = vadd.f32 %v297_v18, %v287_v17 }
 0x1ca   :  { %2198 = vrcp.f32 %v315_v20  ;;  %v1981_v25 = vclamps-f32 %v320_v23, 1.0  ;;  %v317_v45 = vmul.f32 %v1980_v51, %v299_v24 }
 0x1cb   :  { %506 = vmatpush.bf16.msra.mxu2 %v2128_v37 }
 0x1cc   :  { %v326_v46 = vadd.f32 1.0, %v1981_v25 }
 0x1ce   :  { %v2449_v32 = vmul.f32 %v326_v46, %v262_v30 }
 0x1cf   :  { %507 = vmatpush.bf16.msra.mxu2 %v2127_v39 }
 0x1d0   :  { %v2199_v26 = vpop.eup %2198 }
 0x1d1   :  { %v321_v16 = vmul.f32 %v2199_v26, %v317_v45 }
 0x1d3   :  { %v1982_v28 = vclamps-f32 %v321_v16, 1.0  ;;  %508 = vmatpush.bf16.msra.mxu2 %v2126_v44 }
 0x1d5   :  { %v327_v21 = vadd.f32 1.0, %v1982_v28 }
 0x1d7   :  { %v2451_v33 = vmul.f32 %v327_v21, %v263_v31  ;;  %509 = vmatpush.bf16.msra.mxu2 %v2125_v49 }
 0x1d9   :  { %v330_v29 = vpack.c.bf16 %v2451_v33, %v2449_v32 }
 0x1db   :  { %1991 = vmatmul.msk.bf16.vlgmr.msra.gmra.mxu1 %vm349_vm15, %v330_v29 }
 0x258   :  { %v362_v40 = vpop.f32.mrf.mxu1 }
 0x259   :  { %v2456_v42 = vadd.f32 %v2163_v27, %v362_v40 }
 0x25b   :  { %v369_v43 = vmul.f32 0.70710677, %v2456_v42  ;;  %v367_v49 = vmul.f32 0.5, %v2456_v42 }
 0x25d   :  { %v1992_v47 = vclamps-f32 %v369_v43, 4.0 }
 0x25f   :  { %v375_v48 = vmul.f32 %v1992_v47, %v1992_v47 }
 0x260   :  { %v364_v50 = vpop.f32.mrf.mxu1 }
 0x261   :  { %v377_v51 = vmul.f32 %v375_v48, %v375_v48  ;;  %v385_v52 = vmul.f32 -5.6925062e-05, %v375_v48  ;;  %v393_v53 = vmul.f32 2.7706815e-08, %v375_v48  ;;  %v365_v54 = vadd.f32 %v2163_v27, %v364_v50 }
 0x262   :  { %v409_v55 = vmul.f32 -0.00021337405, %v375_v48  ;;  %v405_v56 = vmul.f32 -0.0073733293, %v375_v48  ;;  %v381_v63 = vmul.f32 -0.0029546, %v375_v48 }
 0x263   :  { %v387_v57 = vadd.f32 -0.00073499064, %v385_v52  ;;  %v370_v58 = vmul.f32 0.70710677, %v365_v54  ;;  %v379_v59 = vmul.f32 %v377_v51, %v377_v51  ;;  %v395_v60 = vadd.f32 -2.101024e-06, %v393_v53 }
 0x264   :  { %v397_v61 = vmul.f32 -2.7261424e-10, %v377_v51  ;;  %v411_v62 = vadd.f32 -0.001682827, %v409_v55  ;;  %v407_v1 = vadd.f32 -0.014264739, %v405_v56 }
 0x265   :  { %v1993_v0 = vclamps-f32 %v370_v58, 4.0  ;;  %v389_v3 = vmul.f32 %v387_v57, %v377_v51  ;;  %v417_v6 = vmul.f32 -1.45660715e-05, %v379_v59  ;;  %v383_v8 = vadd.f32 -0.016096033, %v381_v63 }
 0x266   :  { %v413_v2 = vmul.f32 %v411_v62, %v377_v51  ;;  %v399_v5 = vadd.f32 %v397_v61, %v395_v60  ;;  %v368_v50 = vmul.f32 0.5, %v365_v54  ;;  %v2164_v56 = vld [vmem:[#allocation7 + $0x30] ss:$0 sm:$0xff]  ;;  %v2382_v54 = vmov 32.0  }
 0x267   :  { %v376_v4 = vmul.f32 %v1993_v0, %v1993_v0  ;;  %v391_v14 = vadd.f32 %v389_v3, %v383_v8 }
 0x268   :  { %v415_v7 = vadd.f32 %v413_v2, %v407_v1  ;;  %v401_v18 = vmul.f32 %v399_v5, %v379_v59 }
 0x269   :  { %v378_v9 = vmul.f32 %v376_v4, %v376_v4  ;;  %v386_v10 = vmul.f32 -5.6925062e-05, %v376_v4  ;;  %v394_v11 = vmul.f32 2.7706815e-08, %v376_v4  ;;  %v410_v12 = vmul.f32 -0.00021337405, %v376_v4 }
 0x26a   :  { %v419_v13 = vadd.f32 %v417_v6, %v415_v7  ;;  %v406_v17 = vmul.f32 -0.0073733293, %v376_v4  ;;  %v382_v19 = vmul.f32 -0.0029546, %v376_v4  ;;  %v403_v46 = vadd.f32 %v401_v18, %v391_v14 }
 0x26b   :  { %v388_v15 = vadd.f32 -0.00073499064, %v386_v10  ;;  %v396_v20 = vadd.f32 -2.101024e-06, %v394_v11  ;;  %v398_v22 = vmul.f32 -2.7261424e-10, %v378_v9  ;;  %v380_v23 = vmul.f32 %v378_v9, %v378_v9 }
 0x26c   :  { %v412_v24 = vadd.f32 -0.001682827, %v410_v12  ;;  %2200 = vrcp.f32 %v419_v13  ;;  %v408_v26 = vadd.f32 -0.014264739, %v406_v17  ;;  %v384_v28 = vadd.f32 -0.016096033, %v382_v19 }
 0x26d   :  { %v390_v25 = vmul.f32 %v388_v15, %v378_v9  ;;  %v400_v45 = vadd.f32 %v398_v22, %v396_v20  ;;  %v418_v30 = vmul.f32 -1.45660715e-05, %v380_v23  ;;  %v421_v36 = vmul.f32 %v1992_v47, %v403_v46  ;;  %v1018_v13 = vld [vmem:[#allocation7 + $0x68] sm:$0xff] }
 0x26e   :  { %v414_v16 = vmul.f32 %v412_v24, %v378_v9 }
 0x26f   :  { %v392_v21 = vadd.f32 %v390_v25, %v384_v28  ;;  %v402_v29 = vmul.f32 %v400_v45, %v380_v23  ;;  %v2165_v28 = vld [vmem:[#allocation7 + $0x38] ss:$0 sm:$0xff] }
 0x270   :  { %v416_v31 = vadd.f32 %v414_v16, %v408_v26 }
 0x271   :  { %v404_v38 = vadd.f32 %v402_v29, %v392_v21  ;;  %v2166_v29 = vld [vmem:[#allocation7 + $0x40] ss:$0 sm:$0xff] }
 0x272   :  { %v2201_v34 = vpop.eup %2200  ;;  %v420_v35 = vadd.f32 %v418_v30, %v416_v31 }
 0x273   :  { %v425_v27 = vmul.f32 %v2201_v34, %v421_v36  ;;  %v422_v37 = vmul.f32 %v1993_v0, %v404_v38 }
 0x274   :  { %2202 = vrcp.f32 %v420_v35 }
 0x275   :  { %v1994_v39 = vclamps-f32 %v425_v27, 1.0  ;;  %2204 = vrcp.f32 %v2382_v54 }
 0x277   :  { %v431_v48 = vadd.f32 1.0, %v1994_v39 }
 0x279   :  { %v433_v52 = vmul.f32 %v431_v48, %v367_v49 }
 0x27a   :  { %v2203_v40 = vpop.eup %2202 }
 0x27b   :  { %v426_v43 = vmul.f32 %v2203_v40, %v422_v37  ;;  %v2205_v63 = vpop.eup %2204 }
 0x27c   :  { %v527_v0 = vmul.f32 32.0, %v2205_v63  ;;  %vm531_vm1 = vweird.f32 %v2205_v63 }
 0x27d   :  { %v1995_v44 = vclamps-f32 %v426_v43, 1.0 }
 0x27e   :  { %v528_v1 = vsub.f32 1.0, %v527_v0 }
 0x27f   :  { %v432_v51 = vadd.f32 1.0, %v1995_v44 }
 0x280   :  { %v529_v2 = vmul.f32 %v2205_v63, %v528_v1 }
 0x281   :  { %v434_v53 = vmul.f32 %v432_v51, %v368_v50 }
 0x282   :  { %v530_v3 = vadd.f32 %v2205_v63, %v529_v2 }
 0x283   :  { %v435_v55 = vpack.c.bf16 %v434_v53, %v433_v52 }
 0x284   :  { %v532_v4 = vsel %vm531_vm1, %v2205_v63, %v530_v3 }
 0x285   :  { %510 = vmatmul.bf16.vlgmr.msra.gmra.mxu2 %v435_v55 }
 0x308   :  { %v511_v57 = vpop.f32.mrf.mxu2 }
 0x309   :  { %v512_v47 = vadd.f32 %v2164_v56, %v511_v57 }
 0x30b   :  { %v516_v58 = vadd.f32 %v512_v47, %v2449_v32 }
 0x30d   :  { %v520_v59 = vsel %vm349_vm15, %v516_v58, 0.0 }
 0x30e   :  { %521 = vadd.xlane.f32.xlu0 %v520_v59 }
 0x310   :  { %v513_v60 = vpop.f32.mrf.mxu2 }
 0x311   :  { %v514_v61 = vadd.f32 %v2164_v56, %v513_v60 }
 0x313   :  { %v517_v62 = vadd.f32 %v514_v61, %v2451_v33 }
 0x315   :  { %v523_v42 = vsel %vm349_vm15, %v517_v62, 0.0 }
 0x316   :  { %524 = vadd.xlane.f32.xlu1 %v523_v42 }
 0x381   :  { %v522_v32 = vpop.xlane.xlu0 %521 }
 0x382   :  { %v533_v5 = vmul.f32 %v532_v4, %v522_v32 }
 0x384   :  { %v535_v6 = vsub.f32 %v516_v58, %v533_v5 }
 0x386   :  { %v537_v7 = vmul.f32 %v535_v6, %v535_v6 }
 0x388   :  { %v539_v8 = vsel %vm349_vm15, %v537_v7, 0.0 }
 0x389   :  { %v525_v9 = vpop.xlane.xlu1 %524  ;;  %540 = vadd.xlane.f32.xlu2 %v539_v8 }
 0x38a   :  { %v534_v33 = vmul.f32 %v532_v4, %v525_v9 }
 0x38c   :  { %v536_v10 = vsub.f32 %v517_v62, %v534_v33 }
 0x38e   :  { %v538_v11 = vmul.f32 %v536_v10, %v536_v10 }
 0x390   :  { %v542_v12 = vsel %vm349_vm15, %v538_v11, 0.0 }
 0x391   :  { %543 = vadd.xlane.f32.xlu0 %v542_v12 }
 0x3a1   :  { %1021 = vperm.xlu2 %2157, %v1018_v13  }
 0x3fc   :  { %v541_v14 = vpop.xlane.xlu2 %540 }
 0x3fd   :  { %v545_v15 = vmul.f32 %v541_v14, %v532_v4 }
 0x3ff   :  { %v547_v17 = vadd.f32 1e-05, %v545_v15 }
 0x401   :  { %2206 = vrsqrt.f32 %v547_v17  ;;  %vm555_vm3 = vweird.f32 %v547_v17 }
 0x404   :  { %v544_v18 = vpop.xlane.xlu0 %543 }
 0x405   :  { %v546_v19 = vmul.f32 %v544_v18, %v532_v4 }
 0x407   :  { %v2207_v20 = vpop.eup %2206  ;;  %v548_v22 = vadd.f32 1e-05, %v546_v19 }
 0x408   :  { %v550_v23 = vmul.f32 %v2207_v20, %v547_v17  ;;  %vm556_vm2 = vweird.f32 %v2207_v20 }
 0x409   :  { %2208 = vrsqrt.f32 %v548_v22  ;;  %vm557_vm4 = vmor %vm555_vm3, %vm556_vm2  ;;  %vm565_vm6 = vweird.f32 %v548_v22 }
 0x40a   :  { %v551_v24 = vmul.f32 %v2207_v20, %v550_v23 }
 0x40c   :  { %v552_v25 = vmul.f32 0.5, %v551_v24 }
 0x40e   :  { %v553_v45 = vsub.f32 1.5, %v552_v25 }
 0x40f   :  { %v2209_v26 = vpop.eup %2208 }
 0x410   :  { %v554_v16 = vmul.f32 %v2207_v20, %v553_v45  ;;  %v560_v46 = vmul.f32 %v2209_v26, %v548_v22  ;;  %vm566_vm5 = vweird.f32 %v2209_v26 }
 0x411   :  { %vm567_vm7 = vmor %vm565_vm6, %vm566_vm5 }
 0x412   :  { %v558_v30 = vsel %vm557_vm4, %v2207_v20, %v554_v16  ;;  %v561_v31 = vmul.f32 %v2209_v26, %v560_v46 }
 0x413   :  { %v569_v21 = vmul.f32 %v558_v30, %v535_v6  ;;  %v653_v6 = vld [vmem:[#allocation7 + $0x58] sm:$0xff] }
 0x414   :  { %v562_v34 = vmul.f32 0.5, %v561_v31  ;;  %667 = vperm.xlu1 %2158, %v653_v6  }
 0x415   :  { %v572_v35 = vmul.f32 %v2165_v28, %v569_v21 }
 0x416   :  { %v563_v36 = vsub.f32 1.5, %v562_v34 }
 0x417   :  { %v2466_v38 = vadd.f32 %v2166_v29, %v572_v35 }
 0x418   :  { %v564_v27 = vmul.f32 %v2209_v26, %v563_v36 }
 0x419   :  { %v579_v37 = vmul.f32 0.70710677, %v2466_v38  ;;  %v577_v35 = vmul.f32 0.5, %v2466_v38 }
 0x41a   :  { %v568_v39 = vsel %vm567_vm7, %v2209_v26, %v564_v27  ;;  %v651_v26 = vld [vmem:[#allocation7 + $0x48] sm:$0xff] }
 0x41b   :  { %v570_v40 = vmul.f32 %v568_v39, %v536_v10  ;;  %v2028_v43 = vclamps-f32 %v579_v37, 4.0  ;;  %v652_v39 = vld [vmem:[#allocation7 + $0x50] sm:$0xff] }
 0x41c   :  { %657 = vperm.xlu1 %2158, %v651_v26  }
 0x41d   :  { %v585_v44 = vmul.f32 %v2028_v43, %v2028_v43  ;;  %v573_v48 = vmul.f32 %v2165_v28, %v570_v40 }
 0x41f   :  { %v587_v49 = vmul.f32 %v585_v44, %v585_v44  ;;  %v595_v50 = vmul.f32 -5.6925062e-05, %v585_v44  ;;  %v603_v51 = vmul.f32 2.7706815e-08, %v585_v44  ;;  %v615_v52 = vmul.f32 -0.0073733293, %v585_v44 }
 0x420   :  { %v619_v53 = vmul.f32 -0.00021337405, %v585_v44  ;;  %v2469_v55 = vadd.f32 %v2166_v29, %v573_v48  ;;  %v591_v56 = vmul.f32 -0.0029546, %v585_v44  ;;  %v654_v44 = vld [vmem:[#allocation7 + $0x60] sm:$0xff] }
 0x421   :  { %v597_v57 = vadd.f32 -0.00073499064, %v595_v50  ;;  %v605_v47 = vadd.f32 -2.101024e-06, %v603_v51  ;;  %v589_v58 = vmul.f32 %v587_v49, %v587_v49  ;;  %v607_v59 = vmul.f32 -2.7261424e-10, %v587_v49  ;;  %672 = vperm.xlu0 %2159, %v654_v44  }
 0x422   :  { %v621_v60 = vadd.f32 -0.001682827, %v619_v53  ;;  %v580_v62 = vmul.f32 0.70710677, %v2469_v55  ;;  %v617_v54 = vadd.f32 -0.014264739, %v615_v52 }
 0x423   :  { %v599_v61 = vmul.f32 %v597_v57, %v587_v49  ;;  %v609_v42 = vadd.f32 %v607_v59, %v605_v47  ;;  %v593_v0 = vadd.f32 -0.016096033, %v591_v56  ;;  %v627_v3 = vmul.f32 -1.45660715e-05, %v589_v58  ;;  %v2133_v50 = vld [vmem:[#allocation5 + $0x58] sm:$0xff]  ;;  %v1079_v52 = vld [vmem:[#allocation7 + $0x70] sm:$0xff] }
 0x424   :  { %v623_v63 = vmul.f32 %v621_v60, %v587_v49  ;;  %v2029_v1 = vclamps-f32 %v580_v62, 4.0  ;;  %662 = vperm.xlu1 %2158, %v652_v39   ;;  %v578_v53 = vmul.f32 0.5, %v2469_v55  ;;  %v1080_v57 = vld [vmem:[#allocation7 + $0x78] sm:$0xff]  ;;  %v2134_v60 = vld [vmem:[#allocation5 + $0x60] sm:$0xff] }
 0x425   :  { %v601_v4 = vadd.f32 %v599_v61, %v593_v0  ;;  %v611_v32 = vmul.f32 %v609_v42, %v589_v58 }
 0x426   :  { %v625_v2 = vadd.f32 %v623_v63, %v617_v54  ;;  %v586_v5 = vmul.f32 %v2029_v1, %v2029_v1 }
 0x427   :  { %v613_v12 = vadd.f32 %v611_v32, %v601_v4 }
 0x428   :  { %v629_v7 = vadd.f32 %v627_v3, %v625_v2  ;;  %v588_v8 = vmul.f32 %v586_v5, %v586_v5  ;;  %v596_v9 = vmul.f32 -5.6925062e-05, %v586_v5  ;;  %v604_v33 = vmul.f32 2.7706815e-08, %v586_v5 }
 0x429   :  { %v616_v10 = vmul.f32 -0.0073733293, %v586_v5  ;;  %v620_v11 = vmul.f32 -0.00021337405, %v586_v5  ;;  %v592_v13 = vmul.f32 -0.0029546, %v586_v5  ;;  %v631_v25 = vmul.f32 %v2028_v43, %v613_v12  ;;  %1150 = vperm.xlu0 %2159, %v1080_v57  }
 0x42a   :  { %2210 = vrcp.f32 %v629_v7  ;;  %v598_v14 = vadd.f32 -0.00073499064, %v596_v9  ;;  %v606_v15 = vadd.f32 -2.101024e-06, %v604_v33  ;;  %v590_v17 = vmul.f32 %v588_v8, %v588_v8 }
 0x42b   :  { %v608_v18 = vmul.f32 -2.7261424e-10, %v588_v8  ;;  %v622_v19 = vadd.f32 -0.001682827, %v620_v11  ;;  %v618_v23 = vadd.f32 -0.014264739, %v616_v10 }
 0x42c   :  { %v600_v20 = vmul.f32 %v598_v14, %v588_v8  ;;  %v594_v45 = vadd.f32 -0.016096033, %v592_v13  ;;  %v628_v28 = vmul.f32 -1.45660715e-05, %v590_v17  ;;  %1143 = vperm.xlu1 %2158, %v1079_v52  }
 0x42d   :  { %v610_v22 = vadd.f32 %v608_v18, %v606_v15  ;;  %v624_v24 = vmul.f32 %v622_v19, %v588_v8 }
 0x42e   :  { %v602_v31 = vadd.f32 %v600_v20, %v594_v45 }
 0x42f   :  { %v626_v46 = vadd.f32 %v624_v24, %v618_v23  ;;  %v612_v21 = vmul.f32 %v610_v22, %v590_v17 }
 0x430   :  { %v2211_v16 = vpop.eup %2210 }
 0x431   :  { %v635_v30 = vmul.f32 %v2211_v16, %v631_v25  ;;  %v630_v29 = vadd.f32 %v628_v28, %v626_v46  ;;  %v614_v27 = vadd.f32 %v612_v21, %v602_v31 }
 0x433   :  { %v2030_v34 = vclamps-f32 %v635_v30, 1.0  ;;  %2212 = vrcp.f32 %v630_v29  ;;  %v632_v43 = vmul.f32 %v2029_v1, %v614_v27 }
 0x435   :  { %v641_v36 = vadd.f32 1.0, %v2030_v34 }
 0x437   :  { %v2473_v37 = vmul.f32 %v641_v36, %v577_v35 }
 0x439   :  { %v649_v40 = vpack.c.bf16 %v2473_v37, %v2473_v37  ;;  %v2213_v48 = vpop.eup %2212 }
 0x43a   :  { %v636_v51 = vmul.f32 %v2213_v48, %v632_v43 }
 0x43b   :  { %v694_v49 = vsel %vm692_vm8, %v649_v40, 0 }
 0x43c   :  { %703 = vmatpush.bf16.msra.mxu3 %v694_v49  ;;  %v2031_v38 = vclamps-f32 %v636_v51, 1.0 }
 0x43e   :  { %v642_v56 = vadd.f32 1.0, %v2031_v38 }
 0x43f   :  { %2040 = vmatmul.msk.bf16.vlgmr.msra.gmra.mxu3 %vm685_vm9, %v2133_v50 }
 0x440   :  { %v2480_v47 = vmul.f32 %v642_v56, %v578_v53 }
 0x442   :  { %v650_v58 = vpack.c.bf16 %v2480_v47, %v2480_v47 }
 0x444   :  { %v716_v59 = vsel %vm692_vm8, %v650_v58, 0 }
 0x445   :  { %725 = vmatpush.bf16.msrb.mxu0 %v716_v59 }
 0x448   :  { %2042 = vmatmul.msk.bf16.vlgmr.msrb.gmra.mxu0 %vm685_vm9, %v2133_v50 }
 0x44f   :  { %2041 = vmatmul.msk.bf16.gmra.mxu3 %vm685_vm9, %v2134_v60 }
 0x458   :  { %2043 = vmatmul.msk.bf16.gmra.mxu0 %vm685_vm9, %v2134_v60 }
 0x486   :  { %v2488_v55 = vpop.permute.xlu1 %667 }
 0x48e   :  { %v658_v61 = vpop.permute.xlu1 %657 }
 0x496   :  { %v663_v8 = vpop.permute.xlu1 %662 }
 0x4c2   :  { %v705_v62 = vpop.f32.mrf.mxu3 }
 0x4c3   :  { %v2490_v42 = vadd.f32 %v705_v62, %v658_v61 }
 0x4c5   :  { %v745_v54 = vmul.f32 0.70710677, %v2490_v42  ;;  %v727_v63 = vpop.f32.mrf.mxu0 }
 0x4c6   :  { %v2495_v1 = vadd.f32 %v727_v63, %v658_v61 }
 0x4c7   :  { %v2493_v0 = vclamps-f32 %v745_v54, 4.0 }
 0x4c8   :  { %v749_v3 = vmul.f32 0.70710677, %v2495_v1 }
 0x4c9   :  { %v769_v2 = vmul.f32 %v2493_v0, %v2493_v0 }
 0x4ca   :  { %v707_v4 = vpop.f32.mrf.mxu3  ;;  %v2500_v7 = vclamps-f32 %v749_v3, 4.0 }
 0x4cb   :  { %v809_v32 = vmul.f32 -5.6925062e-05, %v769_v2  ;;  %v889_v5 = vmul.f32 -0.0073733293, %v769_v2  ;;  %v905_v6 = vmul.f32 -0.00021337405, %v769_v2  ;;  %v777_v9 = vmul.f32 %v769_v2, %v769_v2 }
 0x4cc   :  { %v2502_v33 = vadd.f32 %v707_v4, %v663_v8  ;;  %v841_v10 = vmul.f32 2.7706815e-08, %v769_v2  ;;  %v793_v13 = vmul.f32 -0.0029546, %v769_v2  ;;  %v773_v18 = vmul.f32 %v2500_v7, %v2500_v7 }
 0x4cd   :  { %v913_v11 = vadd.f32 -0.001682827, %v905_v6  ;;  %v785_v12 = vmul.f32 %v777_v9, %v777_v9  ;;  %v817_v14 = vadd.f32 -0.00073499064, %v809_v32  ;;  %v897_v15 = vadd.f32 -0.014264739, %v889_v5  ;;  %v729_v19 = vpop.f32.mrf.mxu0 }
 0x4ce   :  { %v746_v20 = vmul.f32 0.70710677, %v2502_v33  ;;  %v849_v22 = vadd.f32 -2.101024e-06, %v841_v10  ;;  %v857_v23 = vmul.f32 -2.7261424e-10, %v777_v9  ;;  %v2509_v30 = vadd.f32 %v729_v19, %v663_v8 }
 0x4cf   :  { %v921_v17 = vmul.f32 %v913_v11, %v777_v9  ;;  %v801_v24 = vadd.f32 -0.016096033, %v793_v13  ;;  %v825_v25 = vmul.f32 %v817_v14, %v777_v9  ;;  %v937_v26 = vmul.f32 -1.45660715e-05, %v785_v12 }
 0x4d0   :  { %v813_v16 = vmul.f32 -5.6925062e-05, %v773_v18  ;;  %v909_v46 = vmul.f32 -0.00021337405, %v773_v18  ;;  %v2507_v28 = vclamps-f32 %v746_v20, 4.0  ;;  %v865_v31 = vadd.f32 %v857_v23, %v849_v22 }
 0x4d1   :  { %v929_v45 = vadd.f32 %v921_v17, %v897_v15  ;;  %v781_v21 = vmul.f32 %v773_v18, %v773_v18  ;;  %v797_v29 = vmul.f32 -0.0029546, %v773_v18  ;;  %v845_v34 = vmul.f32 2.7706815e-08, %v773_v18 }
 0x4d2   :  { %v770_v35 = vmul.f32 %v2507_v28, %v2507_v28  ;;  %v833_v36 = vadd.f32 %v825_v25, %v801_v24  ;;  %v821_v39 = vadd.f32 -0.00073499064, %v813_v16  ;;  %v893_v40 = vmul.f32 -0.0073733293, %v773_v18  ;;  %v710_v43 = vpop.f32.mrf.mxu3 }
 0x4d3   :  { %v945_v27 = vadd.f32 %v937_v26, %v929_v45  ;;  %v917_v44 = vadd.f32 -0.001682827, %v909_v46  ;;  %v750_v50 = vmul.f32 0.70710677, %v2509_v30  ;;  %v873_v51 = vmul.f32 %v865_v31, %v785_v12 }
 0x4d4   :  { %v778_v48 = vmul.f32 %v770_v35, %v770_v35  ;;  %v810_v49 = vmul.f32 -5.6925062e-05, %v770_v35  ;;  %v794_v38 = vmul.f32 -0.0029546, %v770_v35  ;;  %v842_v52 = vmul.f32 2.7706815e-08, %v770_v35 }
 0x4d5   :  { %v906_v53 = vmul.f32 -0.00021337405, %v770_v35  ;;  %v732_v56 = vpop.f32.mrf.mxu0  ;;  %v853_v57 = vadd.f32 -2.101024e-06, %v845_v34  ;;  %v861_v58 = vmul.f32 -2.7261424e-10, %v781_v21  ;;  %v2515_v60 = vadd.f32 %v710_v43, %v2488_v55 }
 0x4d6   :  { %v818_v59 = vadd.f32 -0.00073499064, %v810_v49  ;;  %v789_v61 = vmul.f32 %v781_v21, %v781_v21  ;;  %v850_v62 = vadd.f32 -2.101024e-06, %v842_v52  ;;  %v858_v54 = vmul.f32 -2.7261424e-10, %v778_v48  ;;  %v673_v49 = vpop.permute.xlu0 %672 }
 0x4d7   :  { %v890_v63 = vmul.f32 -0.0073733293, %v770_v35  ;;  %2214 = vrcp.f32 %v945_v27  ;;  %v925_v2 = vmul.f32 %v917_v44, %v781_v21  ;;  %v914_v4 = vadd.f32 -0.001682827, %v906_v53 }
 0x4d8   :  { %v826_v3 = vmul.f32 %v818_v59, %v778_v48  ;;  %v786_v32 = vmul.f32 %v778_v48, %v778_v48  ;;  %v802_v5 = vadd.f32 -0.016096033, %v794_v38  ;;  %v866_v6 = vadd.f32 %v858_v54, %v850_v62 }
 0x4d9   :  { %v2517_v8 = vclamps-f32 %v750_v50, 4.0  ;;  %v881_v9 = vadd.f32 %v873_v51, %v833_v36  ;;  %v901_v10 = vadd.f32 -0.014264739, %v893_v40  ;;  %v922_v11 = vmul.f32 %v914_v4, %v778_v48 }
 0x4da   :  { %v747_v12 = vmul.f32 0.70710677, %v2515_v60  ;;  %v834_v13 = vadd.f32 %v826_v3, %v802_v5  ;;  %v874_v14 = vmul.f32 %v866_v6, %v786_v32  ;;  %v898_v15 = vadd.f32 -0.014264739, %v890_v63  ;;  %v712_v27 = vpop.f32.mrf.mxu3 }
 0x4db   :  { %v774_v17 = vmul.f32 %v2517_v8, %v2517_v8  ;;  %v829_v18 = vmul.f32 %v821_v39, %v781_v21  ;;  %v869_v19 = vadd.f32 %v861_v58, %v853_v57  ;;  %v805_v20 = vadd.f32 -0.016096033, %v797_v29 }
 0x4dc   :  { %v933_v22 = vadd.f32 %v925_v2, %v901_v10  ;;  %v930_v23 = vadd.f32 %v922_v11, %v898_v15  ;;  %v2523_v24 = vadd.f32 %v732_v56, %v2488_v55  ;;  %v953_v45 = vmul.f32 %v2493_v0, %v881_v9 }
 0x4dd   :  { %v2215_v25 = vpop.eup %2214  ;;  %v941_v26 = vmul.f32 -1.45660715e-05, %v789_v61  ;;  %v910_v16 = vmul.f32 -0.00021337405, %v774_v17  ;;  %v2526_v46 = vclamps-f32 %v747_v12, 4.0  ;;  %v882_v31 = vadd.f32 %v874_v14, %v834_v13  ;;  %v734_v21 = vpop.f32.mrf.mxu0 }
 0x4de   :  { %v938_v34 = vmul.f32 -1.45660715e-05, %v786_v32  ;;  %v782_v35 = vmul.f32 %v774_v17, %v774_v17  ;;  %v798_v36 = vmul.f32 -0.0029546, %v774_v17  ;;  %v2528_v39 = vadd.f32 %v829_v18, %v805_v20 }
 0x4df   :  { %v2530_v29 = vmul.f32 %v869_v19, %v789_v61  ;;  %v814_v40 = vmul.f32 -5.6925062e-05, %v774_v17  ;;  %v846_v55 = vmul.f32 2.7706815e-08, %v774_v17  ;;  %v2532_v43 = vmul.f32 %v2215_v25, %v953_v45 }
 0x4e0   :  { %v2534_v44 = vadd.f32 %v941_v26, %v933_v22  ;;  %v946_v0 = vadd.f32 %v938_v34, %v930_v23  ;;  %v751_v48 = vmul.f32 0.70710677, %v2523_v24  ;;  %v918_v50 = vadd.f32 -0.001682827, %v910_v16 }
 0x4e1   :  { %v771_v51 = vmul.f32 %v2526_v46, %v2526_v46  ;;  %v2539_v38 = vadd.f32 %v712_v27, %v673_v49  ;;  %v2541_v52 = vadd.f32 %v734_v21, %v673_v49  ;;  %v2544_v53 = vmul.f32 %v2507_v28, %v882_v31 }
 0x4e2   :  { %v2546_v56 = vmul.f32 %v782_v35, %v782_v35  ;;  %v2548_v57 = vadd.f32 -0.016096033, %v798_v36  ;;  %v894_v58 = vmul.f32 -0.0073733293, %v774_v17  ;;  %v822_v59 = vadd.f32 -0.00073499064, %v814_v40 }
 0x4e3   :  { %v854_v61 = vadd.f32 -2.101024e-06, %v846_v55  ;;  %v779_v62 = vmul.f32 %v771_v51, %v771_v51  ;;  %v811_v54 = vmul.f32 -5.6925062e-05, %v771_v51  ;;  %2216 = vrcp.f32 %v946_v0 }
 0x4e4   :  { %v843_v63 = vmul.f32 2.7706815e-08, %v771_v51  ;;  %v907_v2 = vmul.f32 -0.00021337405, %v771_v51  ;;  %v2550_v3 = vclamps-f32 %v751_v48, 4.0  ;;  %v926_v4 = vmul.f32 %v918_v50, %v782_v35 }
 0x4e5   :  { %v795_v32 = vmul.f32 -0.0029546, %v771_v51  ;;  %v819_v5 = vadd.f32 -0.00073499064, %v811_v54  ;;  %v891_v6 = vmul.f32 -0.0073733293, %v771_v51  ;;  %v787_v28 = vmul.f32 %v779_v62, %v779_v62 }
 0x4e6   :  { %v851_v9 = vadd.f32 -2.101024e-06, %v843_v63  ;;  %v859_v10 = vmul.f32 -2.7261424e-10, %v779_v62  ;;  %v748_v11 = vmul.f32 0.70710677, %v2539_v38  ;;  %v830_v12 = vmul.f32 %v822_v59, %v782_v35 }
 0x4e7   :  { %v862_v13 = vmul.f32 -2.7261424e-10, %v782_v35  ;;  %v902_v14 = vadd.f32 -0.014264739, %v894_v58  ;;  %v915_v15 = vadd.f32 -0.001682827, %v907_v2  ;;  %v827_v18 = vmul.f32 %v819_v5, %v779_v62 }
 0x4e8   :  { %v942_v17 = vmul.f32 -1.45660715e-05, %v2546_v56  ;;  %v867_v19 = vadd.f32 %v859_v10, %v851_v9  ;;  %v775_v20 = vmul.f32 %v2550_v3, %v2550_v3  ;;  %v803_v23 = vadd.f32 -0.016096033, %v795_v32 }
 0x4e9   :  { %v934_v22 = vadd.f32 %v926_v4, %v902_v14  ;;  %v899_v25 = vadd.f32 -0.014264739, %v891_v6  ;;  %v923_v45 = vmul.f32 %v915_v15, %v779_v62  ;;  %v2556_v26 = vpop.eup %2216  ;;  %v939_v16 = vmul.f32 -1.45660715e-05, %v787_v28 }
 0x4ea   :  { %v783_v31 = vmul.f32 %v775_v20, %v775_v20  ;;  %v815_v34 = vmul.f32 -5.6925062e-05, %v775_v20  ;;  %v2558_v36 = vclamps-f32 %v748_v11, 4.0  ;;  %v799_v27 = vmul.f32 -0.0029546, %v775_v20 }
 0x4eb   :  { %v931_v35 = vadd.f32 %v923_v45, %v899_v25  ;;  %v847_v21 = vmul.f32 2.7706815e-08, %v775_v20  ;;  %v911_v40 = vmul.f32 -0.00021337405, %v775_v20  ;;  %v835_v55 = vadd.f32 %v827_v18, %v803_v23 }
 0x4ec   :  { %v875_v0 = vmul.f32 %v867_v19, %v787_v28  ;;  %v823_v48 = vadd.f32 -0.00073499064, %v815_v34  ;;  %v895_v49 = vmul.f32 -0.0073733293, %v775_v20  ;;  %v791_v51 = vmul.f32 %v783_v31, %v783_v31 }
 0x4ed   :  { %v947_v50 = vadd.f32 %v939_v16, %v931_v35  ;;  %v855_v58 = vadd.f32 -2.101024e-06, %v847_v21  ;;  %v863_v59 = vmul.f32 -2.7261424e-10, %v783_v31  ;;  %v870_v62 = vadd.f32 %v862_v13, %v854_v61 }
 0x4ee   :  { %v831_v54 = vmul.f32 %v823_v48, %v783_v31  ;;  %v919_v63 = vadd.f32 -0.001682827, %v911_v40  ;;  %v752_v2 = vmul.f32 0.70710677, %v2541_v52  ;;  %v950_v4 = vadd.f32 %v942_v17, %v934_v22 }
 0x4ef   :  { %v807_v32 = vadd.f32 -0.016096033, %v799_v27  ;;  %v871_v5 = vadd.f32 %v863_v59, %v855_v58  ;;  %v772_v6 = vmul.f32 %v2558_v36, %v2558_v36  ;;  %v883_v9 = vadd.f32 %v875_v0, %v835_v55 }
 0x4f0   :  { %2218 = vrcp.f32 %v947_v50  ;;  %v903_v28 = vadd.f32 -0.014264739, %v895_v49  ;;  %v927_v10 = vmul.f32 %v919_v63, %v783_v31  ;;  %v943_v14 = vmul.f32 -1.45660715e-05, %v791_v51 }
 0x4f1   :  { %v839_v11 = vadd.f32 %v831_v54, %v807_v32  ;;  %v780_v15 = vmul.f32 %v772_v6, %v772_v6  ;;  %v812_v18 = vmul.f32 -5.6925062e-05, %v772_v6  ;;  %v844_v61 = vmul.f32 2.7706815e-08, %v772_v6 }
 0x4f2   :  { %v935_v19 = vadd.f32 %v927_v10, %v903_v28  ;;  %v908_v13 = vmul.f32 -0.00021337405, %v772_v6  ;;  %v2563_v20 = vclamps-f32 %v752_v2, 4.0  ;;  %v879_v23 = vmul.f32 %v871_v5, %v791_v51 }
 0x4f3   :  { %v796_v17 = vmul.f32 -0.0029546, %v772_v6  ;;  %v820_v22 = vadd.f32 -0.00073499064, %v812_v18  ;;  %v892_v25 = vmul.f32 -0.0073733293, %v772_v6  ;;  %v788_v16 = vmul.f32 %v780_v15, %v780_v15 }
 0x4f4   :  { %v951_v45 = vadd.f32 %v943_v14, %v935_v19  ;;  %v852_v34 = vadd.f32 -2.101024e-06, %v844_v61  ;;  %v860_v35 = vmul.f32 -2.7261424e-10, %v780_v15  ;;  %v838_v27 = vadd.f32 %v830_v12, %v2548_v57 }
 0x4f5   :  { %v878_v31 = vmul.f32 %v870_v62, %v2546_v56  ;;  %2220 = vrcp.f32 %v950_v4  ;;  %v916_v21 = vadd.f32 -0.001682827, %v908_v13  ;;  %v955_v55 = vmul.f32 %v2526_v46, %v883_v9 }
 0x4f6   :  { %v2219_v40 = vpop.eup %2218  ;;  %v828_v0 = vmul.f32 %v820_v22, %v780_v15  ;;  %v868_v48 = vadd.f32 %v860_v35, %v852_v34  ;;  %v776_v49 = vmul.f32 %v2563_v20, %v2563_v20  ;;  %v887_v50 = vadd.f32 %v879_v23, %v839_v11 }
 0x4f7   :  { %v804_v51 = vadd.f32 -0.016096033, %v796_v17  ;;  %v900_v58 = vadd.f32 -0.014264739, %v892_v25  ;;  %v924_v59 = vmul.f32 %v916_v21, %v780_v15  ;;  %2222 = vrcp.f32 %v951_v45 }
 0x4f8   :  { %v940_v54 = vmul.f32 -1.45660715e-05, %v788_v16  ;;  %v784_v63 = vmul.f32 %v776_v49, %v776_v49  ;;  %v816_v57 = vmul.f32 -5.6925062e-05, %v776_v49  ;;  %v971_v12 = vmul.f32 %v2219_v40, %v955_v55 }
 0x4f9   :  { %v932_v56 = vadd.f32 %v924_v59, %v900_v58  ;;  %v848_v62 = vmul.f32 2.7706815e-08, %v776_v49  ;;  %v912_v2 = vmul.f32 -0.00021337405, %v776_v49  ;;  %v836_v4 = vadd.f32 %v828_v0, %v804_v51 }
 0x4fa   :  { %v876_v32 = vmul.f32 %v868_v48, %v788_v16  ;;  %v824_v46 = vadd.f32 -0.00073499064, %v816_v57  ;;  %v896_v5 = vmul.f32 -0.0073733293, %v776_v49  ;;  %v800_v28 = vmul.f32 -0.0029546, %v776_v49 }
 0x4fb   :  { %v2221_v6 = vpop.eup %2220  ;;  %v948_v9 = vadd.f32 %v940_v54, %v932_v56  ;;  %v856_v10 = vadd.f32 -2.101024e-06, %v848_v62  ;;  %v864_v11 = vmul.f32 -2.7261424e-10, %v784_v63  ;;  %2224 = vrcp.f32 %v2534_v44 }
 0x4fc   :  { %v970_v14 = vmul.f32 %v2556_v26, %v2544_v53  ;;  %v792_v15 = vmul.f32 %v784_v63, %v784_v63  ;;  %v920_v18 = vadd.f32 -0.001682827, %v912_v2  ;;  %v886_v19 = vadd.f32 %v878_v31, %v838_v27 }
 0x4fd   :  { %2226 = vrcp.f32 %v948_v9  ;;  %v832_v61 = vmul.f32 %v824_v46, %v784_v63  ;;  %v872_v13 = vadd.f32 %v864_v11, %v856_v10  ;;  %v2223_v23 = vpop.eup %2222  ;;  %v884_v17 = vadd.f32 %v876_v32, %v836_v4 }
 0x4fe   :  { %v904_v22 = vadd.f32 -0.014264739, %v896_v5  ;;  %v928_v25 = vmul.f32 %v920_v18, %v784_v63  ;;  %v2054_v45 = vclamps-f32 %v971_v12, 1.0  ;;  %v885_v16 = vadd.f32 %v2530_v29, %v2528_v39 }
 0x4ff   :  { %v959_v34 = vmul.f32 %v2550_v3, %v887_v50  ;;  %v808_v44 = vadd.f32 -0.016096033, %v800_v28  ;;  %v944_v21 = vmul.f32 -1.45660715e-05, %v792_v15  ;;  %v2053_v53 = vclamps-f32 %v970_v14, 1.0 }
 0x500   :  { %v936_v35 = vadd.f32 %v928_v25, %v904_v22  ;;  %v958_v26 = vmul.f32 %v2517_v8, %v886_v19  ;;  %v880_v40 = vmul.f32 %v872_v13, %v792_v15  ;;  %v956_v0 = vmul.f32 %v2558_v36, %v884_v17 }
 0x501   :  { %v975_v27 = vmul.f32 %v2223_v23, %v959_v34  ;;  %v840_v31 = vadd.f32 %v832_v61, %v808_v44  ;;  %v2225_v55 = vpop.eup %2224  ;;  %v995_v49 = vadd.f32 1.0, %v2054_v45  ;;  %v2052_v51 = vclamps-f32 %v2532_v43, 1.0 }
 0x502   :  { %v952_v48 = vadd.f32 %v944_v21, %v936_v35  ;;  %v957_v39 = vmul.f32 %v2500_v7, %v885_v16  ;;  %v974_v29 = vmul.f32 %v2221_v6, %v958_v26  ;;  %v739_v3 = vmul.f32 0.5, %v2515_v60 }
 0x503   :  { %v2227_v58 = vpop.eup %2226  ;;  %v994_v59 = vadd.f32 1.0, %v2053_v53  ;;  %v888_v54 = vadd.f32 %v880_v40, %v840_v31  ;;  %v2058_v63 = vclamps-f32 %v975_v27, 1.0  ;;  %v738_v57 = vmul.f32 0.5, %v2502_v33  ;;  %v1009_v40 = vld [vmem:[#allocation5 + $0x68] sm:$0xf] }
 0x504   :  { %v972_v50 = vmul.f32 %v2227_v58, %v956_v0  ;;  %2228 = vrcp.f32 %v952_v48  ;;  %v973_v8 = vmul.f32 %v2225_v55, %v957_v39  ;;  %v1003_v36 = vmul.f32 %v995_v49, %v739_v3  ;;  %v1022_v48 = vpop.permute.xlu2 %1021 }
 0x505   :  { %v993_v56 = vadd.f32 1.0, %v2052_v51  ;;  %v2057_v62 = vclamps-f32 %v974_v29, 1.0  ;;  %v737_v43 = vmul.f32 0.5, %v2490_v42  ;;  %v740_v2 = vmul.f32 0.5, %v2539_v38 }
 0x506   :  { %v2055_v12 = vclamps-f32 %v972_v50, 1.0  ;;  %v1002_v4 = vmul.f32 %v994_v59, %v738_v57  ;;  %v960_v60 = vmul.f32 %v2563_v20, %v888_v54  ;;  %v999_v32 = vadd.f32 1.0, %v2058_v63 }
 0x507   :  { %v2056_v46 = vclamps-f32 %v973_v8, 1.0  ;;  %v1012_v9 = vpack.c.bf16 %v1003_v36, %v1003_v36  ;;  %v1001_v28 = vmul.f32 %v993_v56, %v737_v43  ;;  %v743_v33 = vmul.f32 0.5, %v2523_v24 }
 0x508   :  { %v996_v7 = vadd.f32 1.0, %v2055_v12  ;;  %v998_v11 = vadd.f32 1.0, %v2057_v62  ;;  %v1011_v15 = vpack.c.bf16 %v1002_v4, %v1002_v4  ;;  %v742_v42 = vmul.f32 0.5, %v2509_v30 }
 0x509   :  { %v1007_v38 = vmul.f32 %v999_v32, %v743_v33  ;;  %v997_v19 = vadd.f32 1.0, %v2056_v46  ;;  %v1030_v61 = vunpack.c.l.b16 %v1012_v9  ;;  %v1010_v20 = vpack.c.bf16 %v1001_v28, %v1001_v28 }
 0x50a   :  { %v2229_v5 = vpop.eup %2228  ;;  %v1004_v6 = vmul.f32 %v996_v7, %v740_v2  ;;  %v741_v23 = vmul.f32 0.5, %v2495_v1  ;;  %v744_v17 = vmul.f32 0.5, %v2541_v52  ;;  %v1006_v25 = vmul.f32 %v998_v11, %v742_v42 }
 0x50b   :  { %v976_v10 = vmul.f32 %v2229_v5, %v960_v60  ;;  %v1029_v24 = vunpack.c.l.b16 %v1011_v15  ;;  %v1016_v34 = vpack.c.bf16 %v1007_v38, %v1007_v38  ;;  %v1028_v35 = vunpack.c.l.b16 %v1010_v20 }
 0x50c   :  { %v1013_v14 = vpack.c.bf16 %v1004_v6, %v1004_v6  ;;  %v1005_v44 = vmul.f32 %v997_v19, %v741_v23  ;;  %v1015_v21 = vpack.c.bf16 %v1006_v25, %v1006_v25 }
 0x50d   :  { %v2059_v18 = vclamps-f32 %v976_v10, 1.0  ;;  %v1032_v53 = vpack.c.b16 %v1029_v24, %v1028_v35  ;;  %v1058_v26 = vunpack.c.l.b16 %v1016_v34 }
 0x50e   :  { %v1031_v13 = vunpack.c.l.b16 %v1013_v14  ;;  %v1014_v31 = vpack.c.bf16 %v1005_v44, %v1005_v44  ;;  %v1057_v55 = vunpack.c.l.b16 %v1015_v21 }
 0x50f   :  { %v1000_v22 = vadd.f32 1.0, %v2059_v18 }
 0x510   :  { %v1033_v45 = vpack.c.b16 %v1031_v13, %v1030_v61  ;;  %v1056_v52 = vunpack.c.l.b16 %v1014_v31 }
 0x511   :  { %v1008_v16 = vmul.f32 %v1000_v22, %v744_v17 }
 0x512   :  { %1045 = vmatpush.bf16.msrb.mxu1 %v1033_v45  ;;  %v1060_v0 = vpack.c.b16 %v1057_v55, %v1056_v52 }
 0x513   :  { %v1017_v30 = vpack.c.bf16 %v1008_v16, %v1008_v16 }
 0x515   :  { %v1059_v27 = vunpack.c.l.b16 %v1017_v30 }
 0x516   :  { %1046 = vmatpush.bf16.msrb.mxu1 %v1032_v53 }
 0x517   :  { %v1061_v1 = vpack.c.b16 %v1059_v27, %v1058_v26  ;;  %v1144_v27 = vpop.permute.xlu1 %1143 }
 0x519   :  { %1070 = vmatpush.bf16.msrb.mxu3 %v1061_v1  ;;  %2060 = vmatmul.msk.bf16.vlgmr.msrb.gmra.mxu1 %vm349_vm15, %v1009_v40  ;;  %v1151_v1 = vpop.permute.xlu0 %1150 }
 0x51d   :  { %1071 = vmatpush.bf16.msrb.mxu3 %v1060_v0 }
 0x520   :  { %2061 = vmatmul.msk.bf16.vlgmr.msrb.gmra.mxu3 %vm349_vm15, %v1009_v40 }
 0x596   :  { %v1048_v49 = vpop.f32.mrf.mxu1 }
 0x597   :  { %v1049_v51 = vadd.f32 %v1048_v49, %v1022_v48  ;;  %v2136_v49 = vld [vmem:[#allocation5 + $0x78] sm:$0xff] }
 0x598   :  { %1251 = vmatpush.bf16.msra.mxu1 %v2136_v49 }
 0x599   :  { %v1077_v58 = vadd.f32 %v1049_v51, %v2473_v37 }
 0x59b   :  { %v1081_v39 = vsel %vm349_vm15, %v1077_v58, 0.0 }
 0x59c   :  { %v1082_v29 = vrot.slane %v1081_v39, 4 }
 0x59e   :  { %v1083_v3 = vadd.f32 %v1082_v29, %v1081_v39  ;;  %v1050_v50 = vpop.f32.mrf.mxu1  ;;  %v2135_v39 = vld [vmem:[#allocation5 + $0x70] sm:$0xff] }
 0x59f   :  { %1252 = vmatpush.bf16.msra.mxu1 %v2135_v39 }
 0x5a0   :  { %v1084_v59 = vrot.slane %v1083_v3, 2 }
 0x5a2   :  { %v1085_v8 = vadd.f32 %v1084_v59, %v1083_v3 }
 0x5a3   :  { %v1073_v54 = vpop.f32.mrf.mxu3 }
 0x5a4   :  { %v1086_v63 = vrot.slane %v1085_v8, 1  ;;  %v1074_v57 = vadd.f32 %v1073_v54, %v1022_v48 }
 0x5a6   :  { %v1087_v12 = vadd.f32 %v1086_v63, %v1085_v8  ;;  %v1078_v36 = vadd.f32 %v1074_v57, %v2480_v47 }
 0x5a8   :  { %v1095_v56 = vmul.f32 %v1087_v12, %v2426_v41  ;;  %v1088_v62 = vsel %vm349_vm15, %v1078_v36, 0.0 }
 0x5a9   :  { %v1089_v43 = vrot.slane %v1088_v62, 4 }
 0x5aa   :  { %v1097_v2 = vsub.f32 %v1077_v58, %v1095_v56 }
 0x5ab   :  { %v1090_v37 = vadd.f32 %v1089_v43, %v1088_v62  ;;  %v1075_v7 = vpop.f32.mrf.mxu3 }
 0x5ac   :  { %v1099_v4 = vmul.f32 %v1097_v2, %v1097_v2 }
 0x5ad   :  { %v1091_v60 = vrot.slane %v1090_v37, 2 }
 0x5ae   :  { %v1101_v32 = vsel %vm349_vm15, %v1099_v4, 0.0 }
 0x5af   :  { %v1102_v46 = vrot.slane %v1101_v32, 4  ;;  %v1092_v5 = vadd.f32 %v1091_v60, %v1090_v37 }
 0x5b1   :  { %v1103_v6 = vadd.f32 %v1102_v46, %v1101_v32  ;;  %v1093_v9 = vrot.slane %v1092_v5, 1 }
 0x5b3   :  { %v1104_v28 = vrot.slane %v1103_v6, 2  ;;  %v1094_v33 = vadd.f32 %v1093_v9, %v1092_v5 }
 0x5b5   :  { %v1105_v10 = vadd.f32 %v1104_v28, %v1103_v6  ;;  %v1096_v47 = vmul.f32 %v1094_v33, %v2426_v41 }
 0x5b7   :  { %v1106_v11 = vrot.slane %v1105_v10, 1  ;;  %v1098_v14 = vsub.f32 %v1078_v36, %v1096_v47 }
 0x5b9   :  { %v1107_v15 = vadd.f32 %v1106_v11, %v1105_v10  ;;  %v1100_v42 = vmul.f32 %v1098_v14, %v1098_v14 }
 0x5bb   :  { %v1115_v18 = vmul.f32 %v1107_v15, %v2426_v41  ;;  %v1108_v38 = vsel %vm349_vm15, %v1100_v42, 0.0 }
 0x5bc   :  { %v1109_v19 = vrot.slane %v1108_v38, 4 }
 0x5bd   :  { %v1117_v61 = vadd.f32 1e-05, %v1115_v18 }
 0x5be   :  { %v1110_v13 = vadd.f32 %v1109_v19, %v1108_v38 }
 0x5bf   :  { %2230 = vrsqrt.f32 %v1117_v61  ;;  %vm1125_vm11 = vweird.f32 %v1117_v61 }
 0x5c0   :  { %v1111_v20 = vrot.slane %v1110_v13, 2 }
 0x5c2   :  { %v1112_v23 = vadd.f32 %v1111_v20, %v1110_v13 }
 0x5c4   :  { %v1113_v17 = vrot.slane %v1112_v23, 1 }
 0x5c5   :  { %v2231_v22 = vpop.eup %2230 }
 0x5c6   :  { %v1120_v25 = vmul.f32 %v2231_v22, %v1117_v61  ;;  %v1114_v45 = vadd.f32 %v1113_v17, %v1112_v23  ;;  %vm1126_vm10 = vweird.f32 %v2231_v22 }
 0x5c7   :  { %vm1127_vm12 = vmor %vm1125_vm11, %vm1126_vm10  ;;  %vm1748_vm10 = vcmask 58368  }
 0x5c8   :  { %v1121_v24 = vmul.f32 %v2231_v22, %v1120_v25  ;;  %v1116_v16 = vmul.f32 %v1114_v45, %v2426_v41 }
 0x5ca   :  { %v1122_v34 = vmul.f32 0.5, %v1121_v24  ;;  %v1118_v44 = vadd.f32 1e-05, %v1116_v16 }
 0x5cc   :  { %v1123_v35 = vsub.f32 1.5, %v1122_v34  ;;  %2232 = vrsqrt.f32 %v1118_v44  ;;  %vm1135_vm14 = vweird.f32 %v1118_v44 }
 0x5ce   :  { %v1124_v30 = vmul.f32 %v2231_v22, %v1123_v35 }
 0x5d0   :  { %v1128_v21 = vsel %vm1127_vm12, %v2231_v22, %v1124_v30 }
 0x5d1   :  { %v1139_v53 = vmul.f32 %v1128_v21, %v1097_v2 }
 0x5d2   :  { %v2233_v26 = vpop.eup %2232 }
 0x5d3   :  { %v1146_v31 = vmul.f32 %v1144_v27, %v1139_v53  ;;  %v1130_v40 = vmul.f32 %v2233_v26, %v1118_v44  ;;  %vm1136_vm13 = vweird.f32 %v2233_v26 }
 0x5d4   :  { %vm1137_vm1 = vmor %vm1135_vm14, %vm1136_vm13 }
 0x5d5   :  { %v2601_v55 = vadd.f32 %v1151_v1, %v1146_v31  ;;  %v1131_v52 = vmul.f32 %v2233_v26, %v1130_v40 }
 0x5d7   :  { %v1157_v0 = vmul.f32 0.70710677, %v2601_v55  ;;  %v1132_v48 = vmul.f32 0.5, %v1131_v52 }
 0x5d9   :  { %v2062_v51 = vclamps-f32 %v1157_v0, 4.0  ;;  %v1133_v58 = vsub.f32 1.5, %v1132_v48 }
 0x5db   :  { %v1163_v29 = vmul.f32 %v2062_v51, %v2062_v51  ;;  %v1134_v3 = vmul.f32 %v2233_v26, %v1133_v58 }
 0x5dd   :  { %v1138_v50 = vsel %vm1137_vm1, %v2233_v26, %v1134_v3  ;;  %v1197_v59 = vmul.f32 -0.00021337405, %v1163_v29  ;;  %v1165_v63 = vmul.f32 %v1163_v29, %v1163_v29  ;;  %v1173_v57 = vmul.f32 -5.6925062e-05, %v1163_v29 }
 0x5de   :  { %v1140_v8 = vmul.f32 %v1138_v50, %v1098_v14  ;;  %v1193_v12 = vmul.f32 -0.0073733293, %v1163_v29  ;;  %v1181_v36 = vmul.f32 2.7706815e-08, %v1163_v29  ;;  %v1169_v46 = vmul.f32 -0.0029546, %v1163_v29 }
 0x5df   :  { %v1199_v54 = vadd.f32 -0.001682827, %v1197_v59  ;;  %v1167_v2 = vmul.f32 %v1165_v63, %v1165_v63  ;;  %v1175_v37 = vadd.f32 -0.00073499064, %v1173_v57  ;;  %v1185_v60 = vmul.f32 -2.7261424e-10, %v1165_v63 }
 0x5e0   :  { %v1147_v56 = vmul.f32 %v1144_v27, %v1140_v8  ;;  %v1195_v7 = vadd.f32 -0.014264739, %v1193_v12  ;;  %v1183_v4 = vadd.f32 -2.101024e-06, %v1181_v36  ;;  %v1171_v47 = vadd.f32 -0.016096033, %v1169_v46 }
 0x5e1   :  { %v1201_v62 = vmul.f32 %v1199_v54, %v1165_v63  ;;  %v1177_v9 = vmul.f32 %v1175_v37, %v1165_v63  ;;  %v1205_v28 = vmul.f32 -1.45660715e-05, %v1167_v2  ;;  %v1155_v3 = vmul.f32 0.5, %v2601_v55  ;;  %v2167_v57 = vld [vmem:[#allocation7 + $0x80] ss:$0 sm:$0xff]  ;;  %v2140_v36 = vld [vmem:[#allocation5 + $0x98] sm:$0xff] }
 0x5e2   :  { %v1154_v43 = vadd.f32 %v1151_v1, %v1147_v56  ;;  %v1187_v33 = vadd.f32 %v1185_v60, %v1183_v4  ;;  %1370 = vmatpush.bf16.msrb.mxu2 %v2140_v36 }
 0x5e3   :  { %v1203_v5 = vadd.f32 %v1201_v62, %v1195_v7  ;;  %v1179_v18 = vadd.f32 %v1177_v9, %v1171_v47 }
 0x5e4   :  { %v1158_v32 = vmul.f32 0.70710677, %v1154_v43  ;;  %v1189_v61 = vmul.f32 %v1187_v33, %v1167_v2  ;;  %v1156_v50 = vmul.f32 0.5, %v1154_v43  ;;  %v2139_v2 = vld [vmem:[#allocation5 + $0x90] sm:$0xff] }
 0x5e5   :  { %v1207_v11 = vadd.f32 %v1205_v28, %v1203_v5  ;;  %v2138_v5 = vld [vmem:[#allocation5 + $0x88] sm:$0xff] }
 0x5e6   :  { %v2063_v6 = vclamps-f32 %v1158_v32, 4.0  ;;  %v1191_v44 = vadd.f32 %v1189_v61, %v1179_v18  ;;  %1371 = vmatpush.bf16.msrb.mxu2 %v2139_v2 }
 0x5e7   :  { %2234 = vrcp.f32 %v1207_v11  ;;  %v2137_v11 = vld [vmem:[#allocation5 + $0x80] sm:$0xff] }
 0x5e8   :  { %v1164_v10 = vmul.f32 %v2063_v6, %v2063_v6  ;;  %v1209_v40 = vmul.f32 %v2062_v51, %v1191_v44 }
 0x5ea   :  { %v1166_v14 = vmul.f32 %v1164_v10, %v1164_v10  ;;  %v1174_v15 = vmul.f32 -5.6925062e-05, %v1164_v10  ;;  %v1182_v42 = vmul.f32 2.7706815e-08, %v1164_v10  ;;  %v1194_v38 = vmul.f32 -0.0073733293, %v1164_v10  ;;  %1372 = vmatpush.bf16.msrb.mxu2 %v2138_v5 }
 0x5eb   :  { %v1198_v19 = vmul.f32 -0.00021337405, %v1164_v10  ;;  %v1170_v13 = vmul.f32 -0.0029546, %v1164_v10 }
 0x5ec   :  { %v1176_v20 = vadd.f32 -0.00073499064, %v1174_v15  ;;  %v1184_v23 = vadd.f32 -2.101024e-06, %v1182_v42  ;;  %v1168_v17 = vmul.f32 %v1166_v14, %v1166_v14  ;;  %v1186_v22 = vmul.f32 -2.7261424e-10, %v1166_v14 }
 0x5ed   :  { %v1200_v25 = vadd.f32 -0.001682827, %v1198_v19  ;;  %v1196_v16 = vadd.f32 -0.014264739, %v1194_v38  ;;  %v1172_v35 = vadd.f32 -0.016096033, %v1170_v13  ;;  %v2235_v27 = vpop.eup %2234 }
 0x5ee   :  { %v1178_v45 = vmul.f32 %v1176_v20, %v1166_v14  ;;  %v1188_v24 = vadd.f32 %v1186_v22, %v1184_v23  ;;  %v1206_v30 = vmul.f32 -1.45660715e-05, %v1168_v17  ;;  %v1213_v52 = vmul.f32 %v2235_v27, %v1209_v40  ;;  %1373 = vmatpush.bf16.msrb.mxu2 %v2137_v11 }
 0x5ef   :  { %v1202_v34 = vmul.f32 %v1200_v25, %v1166_v14 }
 0x5f0   :  { %v1180_v53 = vadd.f32 %v1178_v45, %v1172_v35  ;;  %v1190_v26 = vmul.f32 %v1188_v24, %v1168_v17  ;;  %v2064_v48 = vclamps-f32 %v1213_v52, 1.0 }
 0x5f1   :  { %v1204_v21 = vadd.f32 %v1202_v34, %v1196_v16 }
 0x5f2   :  { %v1192_v1 = vadd.f32 %v1190_v26, %v1180_v53  ;;  %v1219_v29 = vadd.f32 1.0, %v2064_v48 }
 0x5f3   :  { %v1208_v31 = vadd.f32 %v1206_v30, %v1204_v21 }
 0x5f4   :  { %v1210_v0 = vmul.f32 %v2063_v6, %v1192_v1  ;;  %v1221_v8 = vmul.f32 %v1219_v29, %v1155_v3 }
 0x5f5   :  { %2236 = vrcp.f32 %v1208_v31 }
 0x5fb   :  { %v2237_v49 = vpop.eup %2236 }
 0x5fc   :  { %v1214_v58 = vmul.f32 %v2237_v49, %v1210_v0 }
 0x5fe   :  { %v2065_v39 = vclamps-f32 %v1214_v58, 1.0 }
 0x600   :  { %v1220_v59 = vadd.f32 1.0, %v2065_v39 }
 0x602   :  { %v1222_v54 = vmul.f32 %v1220_v59, %v1156_v50 }
 0x604   :  { %v1223_v63 = vpack.c.bf16 %v1222_v54, %v1221_v8 }
 0x606   :  { %2074 = vmatmul.msk.bf16.vlgmr.msra.gmra.mxu1 %vm349_vm15, %v1223_v63  ;;  %vm1362_vm15 = vcmask 523264  }
 0x683   :  { %v1254_v51 = vpop.f32.mrf.mxu1 }
 0x684   :  { %v2606_v12 = vadd.f32 %v2167_v57, %v1254_v51 }
 0x686   :  { %v1261_v56 = vmul.f32 0.70710677, %v2606_v12 }
 0x688   :  { %v2075_v62 = vclamps-f32 %v1261_v56, 4.0 }
 0x68a   :  { %v1267_v37 = vmul.f32 %v2075_v62, %v2075_v62 }
 0x68b   :  { %v1256_v7 = vpop.f32.mrf.mxu1 }
 0x68c   :  { %v1269_v55 = vmul.f32 %v1267_v37, %v1267_v37  ;;  %v1277_v43 = vmul.f32 -5.6925062e-05, %v1267_v37  ;;  %v1285_v4 = vmul.f32 2.7706815e-08, %v1267_v37  ;;  %v1297_v60 = vmul.f32 -0.0073733293, %v1267_v37 }
 0x68d   :  { %v1301_v32 = vmul.f32 -0.00021337405, %v1267_v37  ;;  %v1257_v46 = vadd.f32 %v2167_v57, %v1256_v7  ;;  %v1273_v14 = vmul.f32 -0.0029546, %v1267_v37  ;;  %v1259_v37 = vmul.f32 0.5, %v2606_v12 }
 0x68e   :  { %v1271_v6 = vmul.f32 %v1269_v55, %v1269_v55  ;;  %v1279_v9 = vadd.f32 -0.00073499064, %v1277_v43  ;;  %v1287_v28 = vadd.f32 -2.101024e-06, %v1285_v4  ;;  %v1289_v10 = vmul.f32 -2.7261424e-10, %v1269_v55 }
 0x68f   :  { %v1303_v33 = vadd.f32 -0.001682827, %v1301_v32  ;;  %v1262_v47 = vmul.f32 0.70710677, %v1257_v46  ;;  %v1299_v15 = vadd.f32 -0.014264739, %v1297_v60 }
 0x690   :  { %v1281_v38 = vmul.f32 %v1279_v9, %v1269_v55  ;;  %v1309_v61 = vmul.f32 -1.45660715e-05, %v1271_v6  ;;  %v1291_v13 = vadd.f32 %v1289_v10, %v1287_v28  ;;  %v1275_v23 = vadd.f32 -0.016096033, %v1273_v14  ;;  %v2168_v32 = vld [vmem:[#allocation7 + $0x88] ss:$0 sm:$0xff] }
 0x691   :  { %v1305_v42 = vmul.f32 %v1303_v33, %v1269_v55  ;;  %v2076_v18 = vclamps-f32 %v1262_v47, 4.0  ;;  %v1260_v7 = vmul.f32 0.5, %v1257_v46  ;;  %v1504_v10 = vld [vmem:[#allocation7 + $0xa0] sm:$0xff]  ;;  %v1746_v12 = vld [vmem:[#allocation7 + $0xb8] sm:$0x3] }
 0x692   :  { %v1283_v24 = vadd.f32 %v1281_v38, %v1275_v23  ;;  %v1293_v44 = vmul.f32 %v1291_v13, %v1271_v6  ;;  %v1699_v13 = vld [vmem:[#allocation7 + $0xb0] sm:$0x3]  ;;  %v1747_v23 = vld [vmem:[#allocation7 + $0xc0] sm:$0x3] }
 0x693   :  { %v1307_v19 = vadd.f32 %v1305_v42, %v1299_v15  ;;  %v1268_v20 = vmul.f32 %v2076_v18, %v2076_v18 }
 0x694   :  { %v1295_v0 = vadd.f32 %v1293_v44, %v1283_v24 }
 0x695   :  { %v1311_v17 = vadd.f32 %v1309_v61, %v1307_v19  ;;  %v1270_v22 = vmul.f32 %v1268_v20, %v1268_v20  ;;  %v1278_v25 = vmul.f32 -5.6925062e-05, %v1268_v20  ;;  %v1286_v45 = vmul.f32 2.7706815e-08, %v1268_v20 }
 0x696   :  { %v1298_v16 = vmul.f32 -0.0073733293, %v1268_v20  ;;  %v1302_v34 = vmul.f32 -0.00021337405, %v1268_v20  ;;  %v1274_v35 = vmul.f32 -0.0029546, %v1268_v20  ;;  %v1313_v59 = vmul.f32 %v2075_v62, %v1295_v0 }
 0x697   :  { %v1280_v30 = vadd.f32 -0.00073499064, %v1278_v25  ;;  %v1288_v21 = vadd.f32 -2.101024e-06, %v1286_v45  ;;  %2238 = vrcp.f32 %v1311_v17  ;;  %v1272_v53 = vmul.f32 %v1270_v22, %v1270_v22  ;;  %v1505_v20 = vld [vmem:[#allocation7 + $0xa8] sm:$0xff] }
 0x698   :  { %v1290_v26 = vmul.f32 -2.7261424e-10, %v1270_v22  ;;  %v1304_v27 = vadd.f32 -0.001682827, %v1302_v34  ;;  %v1300_v1 = vadd.f32 -0.014264739, %v1298_v16 }
 0x699   :  { %v1282_v31 = vmul.f32 %v1280_v30, %v1270_v22  ;;  %v1276_v48 = vadd.f32 -0.016096033, %v1274_v35  ;;  %v1310_v58 = vmul.f32 -1.45660715e-05, %v1272_v53  ;;  %v2170_v0 = vld [vmem:[#allocation7 + $0x98] ss:$0 sm:$0xff] }
 0x69a   :  { %v1292_v40 = vadd.f32 %v1290_v26, %v1288_v21  ;;  %v1306_v52 = vmul.f32 %v1304_v27, %v1270_v22 }
 0x69b   :  { %v1284_v39 = vadd.f32 %v1282_v31, %v1276_v48  ;;  %v2169_v31 = vld [vmem:[#allocation7 + $0x90] ss:$0 sm:$0xff] }
 0x69c   :  { %v1308_v49 = vadd.f32 %v1306_v52, %v1300_v1  ;;  %v1294_v29 = vmul.f32 %v1292_v40, %v1272_v53 }
 0x69d   :  { %v2239_v3 = vpop.eup %2238 }
 0x69e   :  { %v1312_v50 = vadd.f32 %v1310_v58, %v1308_v49  ;;  %v1317_v8 = vmul.f32 %v2239_v3, %v1313_v59  ;;  %v1296_v54 = vadd.f32 %v1294_v29, %v1284_v39 }
 0x6a0   :  { %2240 = vrcp.f32 %v1312_v50  ;;  %v2077_v63 = vclamps-f32 %v1317_v8, 1.0  ;;  %v1314_v57 = vmul.f32 %v2076_v18, %v1296_v54 }
 0x6a2   :  { %v1323_v56 = vadd.f32 1.0, %v2077_v63 }
 0x6a4   :  { %v1325_v43 = vmul.f32 %v1323_v56, %v1259_v37 }
 0x6a6   :  { %v2241_v51 = vpop.eup %2240 }
 0x6a7   :  { %v1318_v36 = vmul.f32 %v2241_v51, %v1314_v57 }
 0x6a9   :  { %v2078_v2 = vclamps-f32 %v1318_v36, 1.0 }
 0x6ab   :  { %v1324_v55 = vadd.f32 1.0, %v2078_v2 }
 0x6ad   :  { %v1326_v4 = vmul.f32 %v1324_v55, %v1260_v7 }
 0x6af   :  { %v1327_v60 = vpack.c.bf16 %v1326_v4, %v1325_v43 }
 0x6b1   :  { %2095 = vmatmul.msk.bf16.vlgmr.msrb.gmra.mxu2 %vm1362_vm15, %v1327_v60 }
 0x734   :  { %v1375_v62 = vpop.f32.mrf.mxu2 }
 0x735   :  { %v1376_v5 = vadd.f32 %v2168_v32, %v1375_v62 }
 0x737   :  { %v1382_v6 = vsel %vm685_vm9, %v1376_v5, 0.0 }
 0x738   :  { %1383 = vadd.xlane.f32.xlu0 %v1382_v6 }
 0x73c   :  { %v1377_v9 = vpop.f32.mrf.mxu2 }
 0x73d   :  { %v1378_v28 = vadd.f32 %v2168_v32, %v1377_v9 }
 0x73f   :  { %v1385_v33 = vsel %vm685_vm9, %v1378_v28, 0.0 }
 0x740   :  { %1386 = vadd.xlane.f32.xlu1 %v1385_v33 }
 0x74c   :  { %1508 = vperm.xlu0 %2159, %v1504_v10  }
 0x754   :  { %1818 = vperm.xlu0 %2159, %v1746_v12  }
 0x7ab   :  { %v1384_v46 = vpop.xlane.xlu0 %1383 }
 0x7ac   :  { %v1388_v47 = vmul.f32 %v1384_v46, %v2426_v41 }
 0x7ae   :  { %v1390_v11 = vsub.f32 %v1376_v5, %v1388_v47 }
 0x7b0   :  { %v1392_v14 = vmul.f32 %v1390_v11, %v1390_v11 }
 0x7b2   :  { %v1394_v15 = vsel %vm685_vm9, %v1392_v14, 0.0 }
 0x7b3   :  { %v1387_v42 = vpop.xlane.xlu1 %1386  ;;  %1395 = vadd.xlane.f32.xlu1 %v1394_v15 }
 0x7b4   :  { %v1389_v18 = vmul.f32 %v1387_v42, %v2426_v41 }
 0x7b6   :  { %v1391_v38 = vsub.f32 %v1378_v28, %v1389_v18 }
 0x7b8   :  { %v1393_v19 = vmul.f32 %v1391_v38, %v1391_v38 }
 0x7ba   :  { %v1397_v61 = vsel %vm685_vm9, %v1393_v19, 0.0 }
 0x7bb   :  { %1398 = vadd.xlane.f32.xlu2 %v1397_v61 }
 0x7cc   :  { %1702 = vperm.xlu1 %2158, %v1699_v13  }
 0x7d3   :  { %1513 = vperm.xlu2 %2157, %v1505_v20  }
 0x7db   :  { %1825 = vperm.xlu2 %2157, %v1747_v23  }
 0x826   :  { %v1396_v17 = vpop.xlane.xlu1 %1395 }
 0x827   :  { %v1400_v22 = vmul.f32 %v1396_v17, %v2426_v41 }
 0x829   :  { %v1402_v25 = vadd.f32 1e-05, %v1400_v22 }
 0x82b   :  { %2242 = vrsqrt.f32 %v1402_v25  ;;  %vm1410_vm3 = vweird.f32 %v1402_v25 }
 0x82e   :  { %v1399_v45 = vpop.xlane.xlu2 %1398 }
 0x82f   :  { %v1401_v24 = vmul.f32 %v1399_v45, %v2426_v41 }
 0x831   :  { %v2243_v16 = vpop.eup %2242  ;;  %v1403_v34 = vadd.f32 1e-05, %v1401_v24 }
 0x832   :  { %v1405_v44 = vmul.f32 %v2243_v16, %v1402_v25  ;;  %vm1411_vm2 = vweird.f32 %v2243_v16 }
 0x833   :  { %2244 = vrsqrt.f32 %v1403_v34  ;;  %vm1412_vm4 = vmor %vm1410_vm3, %vm1411_vm2  ;;  %vm1420_vm6 = vweird.f32 %v1403_v34  ;;  %vm1954_vm2 = vcmask 17408  }
 0x834   :  { %v1406_v35 = vmul.f32 %v2243_v16, %v1405_v44 }
 0x836   :  { %v1407_v30 = vmul.f32 0.5, %v1406_v35 }
 0x838   :  { %v1408_v21 = vsub.f32 1.5, %v1407_v30 }
 0x839   :  { %v2245_v53 = vpop.eup %2244 }
 0x83a   :  { %v1409_v26 = vmul.f32 %v2243_v16, %v1408_v21  ;;  %v1415_v27 = vmul.f32 %v2245_v53, %v1403_v34  ;;  %vm1421_vm5 = vweird.f32 %v2245_v53 }
 0x83b   :  { %vm1422_vm7 = vmor %vm1420_vm6, %vm1421_vm5 }
 0x83c   :  { %v1413_v40 = vsel %vm1412_vm4, %v2243_v16, %v1409_v26  ;;  %v1416_v1 = vmul.f32 %v2245_v53, %v1415_v27 }
 0x83d   :  { %v1424_v52 = vmul.f32 %v1413_v40, %v1390_v11 }
 0x83e   :  { %v1417_v48 = vmul.f32 0.5, %v1416_v1 }
 0x83f   :  { %v1427_v41 = vmul.f32 %v2169_v31, %v1424_v52 }
 0x840   :  { %v1418_v49 = vsub.f32 1.5, %v1417_v48 }
 0x841   :  { %v1430_v58 = vadd.f32 %v2170_v0, %v1427_v41 }
 0x842   :  { %v1419_v39 = vmul.f32 %v2245_v53, %v1418_v49 }
 0x843   :  { %v1434_v29 = vmul.f32 0.70710677, %v1430_v58  ;;  %v1432_v52 = vmul.f32 0.5, %v1430_v58 }
 0x844   :  { %v1423_v3 = vsel %vm1422_vm7, %v2245_v53, %v1419_v39 }
 0x845   :  { %v1425_v50 = vmul.f32 %v1423_v3, %v1391_v38  ;;  %v2096_v59 = vclamps-f32 %v1434_v29, 4.0 }
 0x847   :  { %v1428_v8 = vmul.f32 %v2169_v31, %v1425_v50  ;;  %v1440_v54 = vmul.f32 %v2096_v59, %v2096_v59  ;;  %v2141_v50 = vld [vmem:[#allocation5 + $0xa0] sm:$0xff] }
 0x849   :  { %v1442_v63 = vmul.f32 %v1440_v54, %v1440_v54  ;;  %v1450_v57 = vmul.f32 -5.6925062e-05, %v1440_v54  ;;  %v1458_v51 = vmul.f32 2.7706815e-08, %v1440_v54  ;;  %v1470_v36 = vmul.f32 -0.0073733293, %v1440_v54 }
 0x84a   :  { %v1474_v56 = vmul.f32 -0.00021337405, %v1440_v54  ;;  %v1431_v2 = vadd.f32 %v2170_v0, %v1428_v8  ;;  %v1446_v37 = vmul.f32 -0.0029546, %v1440_v54 }
 0x84b   :  { %v1452_v7 = vadd.f32 -0.00073499064, %v1450_v57  ;;  %v1460_v55 = vadd.f32 -2.101024e-06, %v1458_v51  ;;  %v1444_v43 = vmul.f32 %v1442_v63, %v1442_v63  ;;  %v1462_v4 = vmul.f32 -2.7261424e-10, %v1442_v63 }
 0x84c   :  { %v1476_v60 = vadd.f32 -0.001682827, %v1474_v56  ;;  %v1435_v62 = vmul.f32 0.70710677, %v1431_v2  ;;  %v1472_v6 = vadd.f32 -0.014264739, %v1470_v36  ;;  %v1509_v36 = vpop.permute.xlu0 %1508 }
 0x84d   :  { %v1454_v32 = vmul.f32 %v1452_v7, %v1442_v63  ;;  %v1464_v5 = vadd.f32 %v1462_v4, %v1460_v55  ;;  %v1448_v28 = vadd.f32 -0.016096033, %v1446_v37  ;;  %v1482_v12 = vmul.f32 -1.45660715e-05, %v1444_v43 }
 0x84e   :  { %v1478_v9 = vmul.f32 %v1476_v60, %v1442_v63  ;;  %v2097_v33 = vclamps-f32 %v1435_v62, 4.0  ;;  %v1433_v54 = vmul.f32 0.5, %v1431_v2  ;;  %v1514_v60 = vpop.permute.xlu2 %1513 }
 0x84f   :  { %v1456_v46 = vadd.f32 %v1454_v32, %v1448_v28  ;;  %v1466_v47 = vmul.f32 %v1464_v5, %v1444_v43 }
 0x850   :  { %v1480_v10 = vadd.f32 %v1478_v9, %v1472_v6  ;;  %v1441_v11 = vmul.f32 %v2097_v33, %v2097_v33 }
 0x851   :  { %v1468_v61 = vadd.f32 %v1466_v47, %v1456_v46 }
 0x852   :  { %v1484_v14 = vadd.f32 %v1482_v12, %v1480_v10  ;;  %v1443_v15 = vmul.f32 %v1441_v11, %v1441_v11  ;;  %v1451_v42 = vmul.f32 -5.6925062e-05, %v1441_v11  ;;  %v1459_v18 = vmul.f32 2.7706815e-08, %v1441_v11 }
 0x853   :  { %v1471_v38 = vmul.f32 -0.0073733293, %v1441_v11  ;;  %v1475_v19 = vmul.f32 -0.00021337405, %v1441_v11  ;;  %v1447_v13 = vmul.f32 -0.0029546, %v1441_v11  ;;  %v1486_v44 = vmul.f32 %v2096_v59, %v1468_v61 }
 0x854   :  { %2246 = vrcp.f32 %v1484_v14  ;;  %v1453_v20 = vadd.f32 -0.00073499064, %v1451_v42  ;;  %v1461_v23 = vadd.f32 -2.101024e-06, %v1459_v18  ;;  %v1445_v17 = vmul.f32 %v1443_v15, %v1443_v15 }
 0x855   :  { %v1463_v22 = vmul.f32 -2.7261424e-10, %v1443_v15  ;;  %v1477_v25 = vadd.f32 -0.001682827, %v1475_v19  ;;  %v1473_v16 = vadd.f32 -0.014264739, %v1471_v38 }
 0x856   :  { %v1455_v45 = vmul.f32 %v1453_v20, %v1443_v15  ;;  %v1449_v35 = vadd.f32 -0.016096033, %v1447_v13  ;;  %v1483_v53 = vmul.f32 -1.45660715e-05, %v1445_v17 }
 0x857   :  { %v1465_v24 = vadd.f32 %v1463_v22, %v1461_v23  ;;  %v1479_v34 = vmul.f32 %v1477_v25, %v1443_v15 }
 0x858   :  { %v1457_v27 = vadd.f32 %v1455_v45, %v1449_v35 }
 0x859   :  { %v1481_v21 = vadd.f32 %v1479_v34, %v1473_v16  ;;  %v1467_v31 = vmul.f32 %v1465_v24, %v1445_v17 }
 0x85a   :  { %v2247_v30 = vpop.eup %2246 }
 0x85b   :  { %v1490_v26 = vmul.f32 %v2247_v30, %v1486_v44  ;;  %v1485_v40 = vadd.f32 %v1483_v53, %v1481_v21  ;;  %v1469_v48 = vadd.f32 %v1467_v31, %v1457_v27 }
 0x85d   :  { %v2098_v1 = vclamps-f32 %v1490_v26, 1.0  ;;  %2248 = vrcp.f32 %v1485_v40  ;;  %v1487_v39 = vmul.f32 %v2097_v33, %v1469_v48 }
 0x85f   :  { %v1496_v0 = vadd.f32 1.0, %v2098_v1 }
 0x861   :  { %v1498_v41 = vmul.f32 %v1496_v0, %v1432_v52 }
 0x863   :  { %v1502_v49 = vpack.c.bf16 %v1498_v41, %v1498_v41  ;;  %v2249_v29 = vpop.eup %2248 }
 0x864   :  { %v1491_v59 = vmul.f32 %v2249_v29, %v1487_v39 }
 0x865   :  { %v1525_v3 = vsel %vm692_vm8, %v1502_v49, 0 }
 0x866   :  { %1534 = vmatpush.bf16.msra.mxu0 %v1525_v3  ;;  %v2099_v8 = vclamps-f32 %v1491_v59, 1.0 }
 0x868   :  { %v1497_v63 = vadd.f32 1.0, %v2099_v8 }
 0x869   :  { %2104 = vmatmul.msk.bf16.vlgmr.msra.gmra.mxu0 %vm685_vm9, %v2141_v50 }
 0x86a   :  { %v1499_v57 = vmul.f32 %v1497_v63, %v1433_v54 }
 0x86c   :  { %v1503_v51 = vpack.c.bf16 %v1499_v57, %v1499_v57 }
 0x86e   :  { %v1542_v58 = vsel %vm692_vm8, %v1503_v51, 0 }
 0x86f   :  { %1551 = vmatpush.bf16.msra.mxu3 %v1542_v58 }
 0x872   :  { %2105 = vmatmul.msk.bf16.vlgmr.msra.gmra.mxu3 %vm685_vm9, %v2141_v50 }
 0x8e6   :  { %v1536_v56 = vpop.f32.mrf.mxu0 }
 0x8e7   :  { %v2622_v37 = vadd.f32 %v1536_v56, %v1509_v36 }
 0x8e9   :  { %v1562_v7 = vmul.f32 0.70710677, %v2622_v37 }
 0x8eb   :  { %v2106_v55 = vclamps-f32 %v1562_v7, 4.0 }
 0x8ed   :  { %v1574_v43 = vmul.f32 %v2106_v55, %v2106_v55 }
 0x8ee   :  { %v1538_v4 = vpop.f32.mrf.mxu0 }
 0x8ef   :  { %v1578_v32 = vmul.f32 %v1574_v43, %v1574_v43  ;;  %v1594_v2 = vmul.f32 -5.6925062e-05, %v1574_v43  ;;  %v1610_v62 = vmul.f32 2.7706815e-08, %v1574_v43  ;;  %v1634_v5 = vmul.f32 -0.0073733293, %v1574_v43 }
 0x8f0   :  { %v1642_v6 = vmul.f32 -0.00021337405, %v1574_v43  ;;  %v2625_v9 = vadd.f32 %v1538_v4, %v1514_v60  ;;  %v1586_v28 = vmul.f32 -0.0029546, %v1574_v43 }
 0x8f1   :  { %v1598_v33 = vadd.f32 -0.00073499064, %v1594_v2  ;;  %v1614_v10 = vadd.f32 -2.101024e-06, %v1610_v62  ;;  %v1582_v12 = vmul.f32 %v1578_v32, %v1578_v32  ;;  %v1618_v46 = vmul.f32 -2.7261424e-10, %v1578_v32 }
 0x8f2   :  { %v1646_v47 = vadd.f32 -0.001682827, %v1642_v6  ;;  %v1563_v14 = vmul.f32 0.70710677, %v2625_v9  ;;  %v1638_v42 = vadd.f32 -0.014264739, %v1634_v5 }
 0x8f3   :  { %v1602_v11 = vmul.f32 %v1598_v33, %v1578_v32  ;;  %v1622_v15 = vadd.f32 %v1618_v46, %v1614_v10  ;;  %v1590_v38 = vadd.f32 -0.016096033, %v1586_v28  ;;  %v1658_v13 = vmul.f32 -1.45660715e-05, %v1582_v12 }
 0x8f4   :  { %v1650_v18 = vmul.f32 %v1646_v47, %v1578_v32  ;;  %v2107_v19 = vclamps-f32 %v1563_v14, 4.0  ;;  %v1558_v14 = vmul.f32 0.5, %v2622_v37 }
 0x8f5   :  { %v1553_v20 = vpop.f32.mrf.mxu3  ;;  %v1606_v23 = vadd.f32 %v1602_v11, %v1590_v38  ;;  %v1626_v17 = vmul.f32 %v1622_v15, %v1582_v12 }
 0x8f6   :  { %v1654_v61 = vadd.f32 %v1650_v18, %v1638_v42  ;;  %v1575_v22 = vmul.f32 %v2107_v19, %v2107_v19  ;;  %v2628_v34 = vadd.f32 %v1553_v20, %v1509_v36 }
 0x8f7   :  { %v1630_v30 = vadd.f32 %v1626_v17, %v1606_v23 }
 0x8f8   :  { %v1662_v25 = vadd.f32 %v1658_v13, %v1654_v61  ;;  %v1579_v45 = vmul.f32 %v1575_v22, %v1575_v22  ;;  %v1595_v24 = vmul.f32 -5.6925062e-05, %v1575_v22  ;;  %v1611_v16 = vmul.f32 2.7706815e-08, %v1575_v22 }
 0x8f9   :  { %v1635_v44 = vmul.f32 -0.0073733293, %v1575_v22  ;;  %v1643_v35 = vmul.f32 -0.00021337405, %v1575_v22  ;;  %v1587_v21 = vmul.f32 -0.0029546, %v1575_v22  ;;  %v1666_v39 = vmul.f32 %v2106_v55, %v1630_v30 }
 0x8fa   :  { %2250 = vrcp.f32 %v1662_v25  ;;  %v1599_v53 = vadd.f32 -0.00073499064, %v1595_v24  ;;  %v1615_v26 = vadd.f32 -2.101024e-06, %v1611_v16  ;;  %v1583_v27 = vmul.f32 %v1579_v45, %v1579_v45 }
 0x8fb   :  { %v1619_v31 = vmul.f32 -2.7261424e-10, %v1579_v45  ;;  %v1647_v40 = vadd.f32 -0.001682827, %v1643_v35  ;;  %v1564_v52 = vmul.f32 0.70710677, %v2628_v34 }
 0x8fc   :  { %v1603_v1 = vmul.f32 %v1599_v53, %v1579_v45  ;;  %v1639_v48 = vadd.f32 -0.014264739, %v1635_v44  ;;  %v1591_v29 = vadd.f32 -0.016096033, %v1587_v21  ;;  %v1659_v8 = vmul.f32 -1.45660715e-05, %v1583_v27 }
 0x8fd   :  { %v1623_v0 = vadd.f32 %v1619_v31, %v1615_v26  ;;  %v1651_v41 = vmul.f32 %v1647_v40, %v1579_v45  ;;  %v1555_v49 = vpop.f32.mrf.mxu3  ;;  %v2631_v3 = vclamps-f32 %v1564_v52, 4.0 }
 0x8fe   :  { %v2633_v54 = vadd.f32 %v1555_v49, %v1514_v60  ;;  %v1607_v57 = vadd.f32 %v1603_v1, %v1591_v29 }
 0x8ff   :  { %v1655_v59 = vadd.f32 %v1651_v41, %v1639_v48  ;;  %v1627_v51 = vmul.f32 %v1623_v0, %v1583_v27  ;;  %v1576_v58 = vmul.f32 %v2631_v3, %v2631_v3 }
 0x900   :  { %v2251_v50 = vpop.eup %2250  ;;  %v1565_v4 = vmul.f32 0.70710677, %v2633_v54 }
 0x901   :  { %v1674_v63 = vmul.f32 %v2251_v50, %v1666_v39  ;;  %v1663_v36 = vadd.f32 %v1659_v8, %v1655_v59  ;;  %v1580_v56 = vmul.f32 %v1576_v58, %v1576_v58  ;;  %v1596_v7 = vmul.f32 -5.6925062e-05, %v1576_v58 }
 0x902   :  { %v1612_v55 = vmul.f32 2.7706815e-08, %v1576_v58  ;;  %v1631_v32 = vadd.f32 %v1627_v51, %v1607_v57  ;;  %v1636_v60 = vmul.f32 -0.0073733293, %v1576_v58  ;;  %v1644_v6 = vmul.f32 -0.00021337405, %v1576_v58 }
 0x903   :  { %v2110_v43 = vclamps-f32 %v1674_v63, 1.0  ;;  %2252 = vrcp.f32 %v1663_v36  ;;  %v1600_v2 = vadd.f32 -0.00073499064, %v1596_v7  ;;  %v1620_v5 = vmul.f32 -2.7261424e-10, %v1580_v56 }
 0x904   :  { %v1616_v62 = vadd.f32 -2.101024e-06, %v1612_v55  ;;  %v1588_v33 = vmul.f32 -0.0029546, %v1576_v58  ;;  %v2109_v10 = vclamps-f32 %v1565_v4, 4.0  ;;  %v1667_v12 = vmul.f32 %v2107_v19, %v1631_v32 }
 0x905   :  { %v1686_v28 = vadd.f32 1.0, %v2110_v43  ;;  %v1584_v46 = vmul.f32 %v1580_v56, %v1580_v56  ;;  %v1648_v47 = vadd.f32 -0.001682827, %v1644_v6  ;;  %v1604_v15 = vmul.f32 %v1600_v2, %v1580_v56  ;;  %v1694_v32 = vld [vmem:[#allocation5 + $0xa8] sm:$0x1] }
 0x906   :  { %v1624_v42 = vadd.f32 %v1620_v5, %v1616_v62  ;;  %v1577_v18 = vmul.f32 %v2109_v10, %v2109_v10  ;;  %v1640_v61 = vadd.f32 -0.014264739, %v1636_v60  ;;  %v1592_v23 = vadd.f32 -0.016096033, %v1588_v33 }
 0x907   :  { %v1652_v13 = vmul.f32 %v1648_v47, %v1580_v56  ;;  %v1690_v20 = vmul.f32 %v1686_v28, %v1558_v14  ;;  %v1660_v24 = vmul.f32 -1.45660715e-05, %v1584_v46  ;;  %v1559_v19 = vmul.f32 0.5, %v2625_v9 }
 0x908   :  { %v1581_v17 = vmul.f32 %v1577_v18, %v1577_v18  ;;  %v1597_v22 = vmul.f32 -5.6925062e-05, %v1577_v18  ;;  %v1613_v16 = vmul.f32 2.7706815e-08, %v1577_v18  ;;  %v1608_v44 = vadd.f32 %v1604_v15, %v1592_v23 }
 0x909   :  { %v2253_v11 = vpop.eup %2252  ;;  %v1656_v45 = vadd.f32 %v1652_v13, %v1640_v61  ;;  %v1628_v35 = vmul.f32 %v1624_v42, %v1584_v46  ;;  %v1637_v27 = vmul.f32 -0.0073733293, %v1577_v18  ;;  %v1645_v31 = vmul.f32 -0.00021337405, %v1577_v18 }
 0x90a   :  { %v1675_v38 = vmul.f32 %v2253_v11, %v1667_v12  ;;  %v1601_v30 = vadd.f32 -0.00073499064, %v1597_v22  ;;  %v1617_v53 = vadd.f32 -2.101024e-06, %v1613_v16  ;;  %v1621_v26 = vmul.f32 -2.7261424e-10, %v1581_v17 }
 0x90b   :  { %v1664_v21 = vadd.f32 %v1660_v24, %v1656_v45  ;;  %v1695_v40 = vpack.c.bf16 %v1690_v20, %v1690_v20  ;;  %v1589_v52 = vmul.f32 -0.0029546, %v1577_v18  ;;  %v1632_v0 = vadd.f32 %v1628_v35, %v1608_v44 }
 0x90c   :  { %v2111_v25 = vclamps-f32 %v1675_v38, 1.0  ;;  %v1585_v48 = vmul.f32 %v1581_v17, %v1581_v17  ;;  %v1649_v41 = vadd.f32 -0.001682827, %v1645_v31  ;;  %v1605_v39 = vmul.f32 %v1601_v30, %v1581_v17 }
 0x90d   :  { %2254 = vrcp.f32 %v1664_v21  ;;  %v1625_v29 = vadd.f32 %v1621_v26, %v1617_v53  ;;  %v1641_v9 = vadd.f32 -0.014264739, %v1637_v27  ;;  %v1707_v59 = vunpack.c.l.b16 %v1695_v40 }
 0x90e   :  { %v1687_v37 = vadd.f32 1.0, %v2111_v25  ;;  %v1653_v50 = vmul.f32 %v1649_v41, %v1581_v17  ;;  %v1593_v63 = vadd.f32 -0.016096033, %v1589_v52  ;;  %v1668_v57 = vmul.f32 %v2631_v3, %v1632_v0 }
 0x90f   :  { %v1661_v58 = vmul.f32 -1.45660715e-05, %v1585_v48  ;;  %v1629_v7 = vmul.f32 %v1625_v29, %v1585_v48  ;;  %v1560_v3 = vmul.f32 0.5, %v2628_v34  ;;  %v1561_v46 = vmul.f32 0.5, %v2633_v54  ;;  %v1703_v34 = vpop.permute.xlu1 %1702 }
 0x910   :  { %v1691_v1 = vmul.f32 %v1687_v37, %v1559_v19  ;;  %v1657_v51 = vadd.f32 %v1653_v50, %v1641_v9  ;;  %v1609_v56 = vadd.f32 %v1605_v39, %v1593_v63  ;;  %v2383_v61 = vmov 2.0  }
 0x912   :  { %v1696_v49 = vpack.c.bf16 %v1691_v1, %v1691_v1  ;;  %v1665_v4 = vadd.f32 %v1661_v58, %v1657_v51  ;;  %v1633_v62 = vadd.f32 %v1629_v7, %v1609_v56 }
 0x913   :  { %v2255_v36 = vpop.eup %2254 }
 0x914   :  { %v1708_v8 = vunpack.c.l.b16 %v1696_v49  ;;  %v1676_v55 = vmul.f32 %v2255_v36, %v1668_v57  ;;  %2256 = vrcp.f32 %v1665_v4  ;;  %v1669_v60 = vmul.f32 %v2109_v10, %v1633_v62 }
 0x915   :  { %2258 = vrcp.f32 %v2383_v61 }
 0x916   :  { %v1709_v43 = vpack.c.b16 %v1708_v8, %v1707_v59  ;;  %v2112_v2 = vclamps-f32 %v1676_v55, 1.0 }
 0x918   :  { %1721 = vmatpush.bf16.msrb.mxu1 %v1709_v43  ;;  %v1688_v5 = vadd.f32 1.0, %v2112_v2 }
 0x91a   :  { %v2257_v6 = vpop.eup %2256  ;;  %v1692_v33 = vmul.f32 %v1688_v5, %v1560_v3 }
 0x91b   :  { %2114 = vmatmul.msk.bf16.vlgmr.msrb.gmra.mxu1 %vm65_vm0, %v1694_v32  ;;  %v1677_v28 = vmul.f32 %v2257_v6, %v1669_v60  ;;  %v2259_v10 = vpop.eup %2258 }
 0x91c   :  { %v1697_v11 = vpack.c.bf16 %v1692_v33, %v1692_v33  ;;  %v1764_v13 = vmul.f32 2.0, %v2259_v10  ;;  %vm1768_vm11 = vweird.f32 %v2259_v10 }
 0x91d   :  { %v2113_v12 = vclamps-f32 %v1677_v28, 1.0 }
 0x91e   :  { %v1729_v42 = vunpack.c.l.b16 %v1697_v11  ;;  %v1765_v17 = vsub.f32 1.0, %v1764_v13 }
 0x91f   :  { %v1689_v47 = vadd.f32 1.0, %v2113_v12 }
 0x920   :  { %v1766_v25 = vmul.f32 %v2259_v10, %v1765_v17 }
 0x921   :  { %v1693_v14 = vmul.f32 %v1689_v47, %v1561_v46  ;;  %v1819_v46 = vpop.permute.xlu0 %1818 }
 0x922   :  { %v1767_v19 = vadd.f32 %v2259_v10, %v1766_v25 }
 0x923   :  { %v1698_v15 = vpack.c.bf16 %v1693_v14, %v1693_v14  ;;  %v1826_v14 = vpop.permute.xlu2 %1825 }
 0x924   :  { %v1769_v30 = vsel %vm1768_vm11, %v2259_v10, %v1767_v19 }
 0x925   :  { %v1730_v18 = vunpack.c.l.b16 %v1698_v15 }
 0x927   :  { %v1731_v38 = vpack.c.b16 %v1730_v18, %v1729_v42 }
 0x929   :  { %1740 = vmatpush.bf16.msra.mxu2 %v1731_v38 }
 0x92c   :  { %2115 = vmatmul.msk.bf16.vlgmr.msra.gmra.mxu2 %vm65_vm0, %v1694_v32 }
 0x998   :  { %v1723_v20 = vpop.f32.mrf.mxu1 }
 0x999   :  { %v1724_v23 = vadd.f32 %v1723_v20, %v1703_v34 }
 0x99b   :  { %v1749_v54 = vsel %vm1748_vm10, %v1724_v23, 0.0 }
 0x99c   :  { %v1750_v22 = vrot.slane %v1749_v54, 4 }
 0x99e   :  { %v1751_v45 = vadd.f32 %v1750_v22, %v1749_v54 }
 0x9a0   :  { %v1752_v24 = vrot.slane %v1751_v45, 2  ;;  %v1725_v16 = vpop.f32.mrf.mxu1 }
 0x9a2   :  { %v1753_v44 = vadd.f32 %v1752_v24, %v1751_v45 }
 0x9a4   :  { %v1754_v35 = vrot.slane %v1753_v44, 1 }
 0x9a6   :  { %v1755_v37 = vadd.f32 %v1754_v35, %v1753_v44 }
 0x9a8   :  { %v1770_v21 = vmul.f32 %v1769_v30, %v1755_v37 }
 0x9aa   :  { %v1772_v53 = vsub.f32 %v1724_v23, %v1770_v21 }
 0x9ac   :  { %v1774_v26 = vmul.f32 %v1772_v53, %v1772_v53 }
 0x9ae   :  { %v1776_v27 = vsel %vm1748_vm10, %v1774_v26, 0.0 }
 0x9af   :  { %v1777_v31 = vrot.slane %v1776_v27, 4  ;;  %v1742_v52 = vpop.f32.mrf.mxu2 }
 0x9b0   :  { %v1743_v48 = vadd.f32 %v1742_v52, %v1703_v34 }
 0x9b1   :  { %v1778_v40 = vadd.f32 %v1777_v31, %v1776_v27 }
 0x9b2   :  { %v1756_v49 = vsel %vm1748_vm10, %v1743_v48, 0.0 }
 0x9b3   :  { %v1779_v1 = vrot.slane %v1778_v40, 2  ;;  %v1757_v39 = vrot.slane %v1756_v49, 4 }
 0x9b5   :  { %v1780_v0 = vadd.f32 %v1779_v1, %v1778_v40  ;;  %v1758_v9 = vadd.f32 %v1757_v39, %v1756_v49 }
 0x9b7   :  { %v1781_v41 = vrot.slane %v1780_v0, 1  ;;  %v1759_v59 = vrot.slane %v1758_v9, 2  ;;  %v1744_v8 = vpop.f32.mrf.mxu2 }
 0x9b9   :  { %v1782_v29 = vadd.f32 %v1781_v41, %v1780_v0  ;;  %v1760_v57 = vadd.f32 %v1759_v59, %v1758_v9 }
 0x9bb   :  { %v1790_v50 = vmul.f32 %v1782_v29, %v1769_v30  ;;  %v1761_v51 = vrot.slane %v1760_v57, 1 }
 0x9bd   :  { %v1792_v63 = vadd.f32 1e-05, %v1790_v50  ;;  %v1762_v58 = vadd.f32 %v1761_v51, %v1760_v57 }
 0x9bf   :  { %2260 = vrsqrt.f32 %v1792_v63  ;;  %v1771_v36 = vmul.f32 %v1769_v30, %v1762_v58  ;;  %vm1800_vm12 = vweird.f32 %v1792_v63 }
 0x9c1   :  { %v1773_v43 = vsub.f32 %v1743_v48, %v1771_v36 }
 0x9c3   :  { %v1775_v4 = vmul.f32 %v1773_v43, %v1773_v43 }
 0x9c5   :  { %v2261_v56 = vpop.eup %2260  ;;  %v1783_v2 = vsel %vm1748_vm10, %v1775_v4, 0.0 }
 0x9c6   :  { %v1795_v7 = vmul.f32 %v2261_v56, %v1792_v63  ;;  %v1784_v62 = vrot.slane %v1783_v2, 4  ;;  %vm1801_vm0 = vweird.f32 %v2261_v56  ;;  %v1901_v63 = vld [vmem:[#allocation5 + $0xb8] sm:$0xf] }
 0x9c7   :  { %vm1802_vm13 = vmor %vm1800_vm12, %vm1801_vm0  ;;  %v1914_v51 = vsel %vm692_vm8, %v1901_v63, 0 }
 0x9c8   :  { %v1796_v55 = vmul.f32 %v2261_v56, %v1795_v7  ;;  %v1785_v60 = vadd.f32 %v1784_v62, %v1783_v2  ;;  %1923 = vmatpush.bf16.msrb.mxu0 %v1914_v51 }
 0x9ca   :  { %v1797_v32 = vmul.f32 0.5, %v1796_v55  ;;  %v1786_v3 = vrot.slane %v1785_v60, 2  ;;  %v1900_v55 = vld [vmem:[#allocation5 + $0xb0] sm:$0xf] }
 0x9cc   :  { %v1798_v5 = vsub.f32 1.5, %v1797_v32  ;;  %v1787_v12 = vadd.f32 %v1786_v3, %v1785_v60 }
 0x9ce   :  { %v1799_v6 = vmul.f32 %v2261_v56, %v1798_v5  ;;  %v1788_v11 = vrot.slane %v1787_v12, 1 }
 0x9d0   :  { %v1803_v28 = vsel %vm1802_vm13, %v2261_v56, %v1799_v6  ;;  %v1789_v42 = vadd.f32 %v1788_v11, %v1787_v12 }
 0x9d1   :  { %v1814_v33 = vmul.f32 %v1803_v28, %v1772_v53 }
 0x9d2   :  { %v1791_v38 = vmul.f32 %v1789_v42, %v1769_v30 }
 0x9d3   :  { %v1821_v47 = vmul.f32 %v1819_v46, %v1814_v33  ;;  %v1937_v33 = vsel %vm692_vm8, %v1900_v55, 0  ;;  %vm1907_vm8 = vcmask 1041409  }
 0x9d4   :  { %v1793_v10 = vadd.f32 1e-05, %v1791_v38  ;;  %1946 = vmatpush.bf16.msrb.mxu3 %v1937_v33 }
 0x9d5   :  { %v2649_v15 = vadd.f32 %v1826_v14, %v1821_v47 }
 0x9d6   :  { %2262 = vrsqrt.f32 %v1793_v10  ;;  %vm1810_vm1 = vweird.f32 %v1793_v10 }
 0x9d7   :  { %v1832_v18 = vmul.f32 0.70710677, %v2649_v15 }
 0x9d9   :  { %v2116_v61 = vclamps-f32 %v1832_v18, 4.0 }
 0x9db   :  { %v1838_v13 = vmul.f32 %v2116_v61, %v2116_v61 }
 0x9dc   :  { %v2263_v34 = vpop.eup %2262 }
 0x9dd   :  { %v1872_v20 = vmul.f32 -0.00021337405, %v1838_v13  ;;  %v1805_v23 = vmul.f32 %v2263_v34, %v1793_v10  ;;  %v1840_v25 = vmul.f32 %v1838_v13, %v1838_v13  ;;  %v1868_v45 = vmul.f32 -0.0073733293, %v1838_v13 }
 0x9de   :  { %v1848_v24 = vmul.f32 -5.6925062e-05, %v1838_v13  ;;  %v1856_v16 = vmul.f32 2.7706815e-08, %v1838_v13  ;;  %vm1811_vm14 = vweird.f32 %v2263_v34  ;;  %v1844_v1 = vmul.f32 -0.0029546, %v1838_v13 }
 0x9df   :  { %v1806_v17 = vmul.f32 %v2263_v34, %v1805_v23  ;;  %v1874_v54 = vadd.f32 -0.001682827, %v1872_v20  ;;  %v1842_v30 = vmul.f32 %v1840_v25, %v1840_v25  ;;  %v1870_v37 = vadd.f32 -0.014264739, %v1868_v45  ;;  %vm1812_vm15 = vmor %vm1810_vm1, %vm1811_vm14 }
 0x9e0   :  { %v1850_v21 = vadd.f32 -0.00073499064, %v1848_v24  ;;  %v1858_v53 = vadd.f32 -2.101024e-06, %v1856_v16  ;;  %v1860_v26 = vmul.f32 -2.7261424e-10, %v1840_v25 }
 0x9e1   :  { %v1807_v22 = vmul.f32 0.5, %v1806_v17  ;;  %v1876_v44 = vmul.f32 %v1874_v54, %v1840_v25  ;;  %v1880_v52 = vmul.f32 -1.45660715e-05, %v1842_v30  ;;  %v1846_v29 = vadd.f32 -0.016096033, %v1844_v1 }
 0x9e2   :  { %v1852_v48 = vmul.f32 %v1850_v21, %v1840_v25  ;;  %v1862_v41 = vadd.f32 %v1860_v26, %v1858_v53  ;;  %v1830_v17 = vmul.f32 0.5, %v2649_v15 }
 0x9e3   :  { %v1808_v19 = vsub.f32 1.5, %v1807_v22  ;;  %v1878_v31 = vadd.f32 %v1876_v44, %v1870_v37 }
 0x9e4   :  { %v1854_v50 = vadd.f32 %v1852_v48, %v1846_v29  ;;  %v1864_v59 = vmul.f32 %v1862_v41, %v1842_v30 }
 0x9e5   :  { %v1809_v35 = vmul.f32 %v2263_v34, %v1808_v19  ;;  %v1882_v49 = vadd.f32 %v1880_v52, %v1878_v31  ;;  %v2171_v52 = vld [vmem:[#allocation7 + $0xc8] ss:$0 sm:$0xff] }
 0x9e6   :  { %v1866_v58 = vadd.f32 %v1864_v59, %v1854_v50 }
 0x9e7   :  { %v1813_v27 = vsel %vm1812_vm15, %v2263_v34, %v1809_v35  ;;  %2264 = vrcp.f32 %v1882_v49 }
 0x9e8   :  { %v1815_v40 = vmul.f32 %v1813_v27, %v1773_v43  ;;  %v1884_v62 = vmul.f32 %v2116_v61, %v1866_v58 }
 0x9ea   :  { %v1822_v0 = vmul.f32 %v1819_v46, %v1815_v40 }
 0x9ec   :  { %v1829_v39 = vadd.f32 %v1826_v14, %v1822_v0 }
 0x9ed   :  { %v2265_v4 = vpop.eup %2264 }
 0x9ee   :  { %v1833_v9 = vmul.f32 0.70710677, %v1829_v39  ;;  %v1888_v12 = vmul.f32 %v2265_v4, %v1884_v62  ;;  %v1831_v19 = vmul.f32 0.5, %v1829_v39 }
 0x9f0   :  { %v2117_v8 = vclamps-f32 %v1833_v9, 4.0  ;;  %v2118_v10 = vclamps-f32 %v1888_v12, 1.0 }
 0x9f2   :  { %v1839_v57 = vmul.f32 %v2117_v8, %v2117_v8  ;;  %v1894_v20 = vadd.f32 1.0, %v2118_v10 }
 0x9f4   :  { %v1841_v36 = vmul.f32 %v1839_v57, %v1839_v57  ;;  %v1849_v56 = vmul.f32 -5.6925062e-05, %v1839_v57  ;;  %v1857_v7 = vmul.f32 2.7706815e-08, %v1839_v57  ;;  %v1873_v43 = vmul.f32 -0.00021337405, %v1839_v57 }
 0x9f5   :  { %v1869_v2 = vmul.f32 -0.0073733293, %v1839_v57  ;;  %v1845_v5 = vmul.f32 -0.0029546, %v1839_v57  ;;  %v1896_v54 = vmul.f32 %v1894_v20, %v1830_v17 }
 0x9f6   :  { %v1851_v32 = vadd.f32 -0.00073499064, %v1849_v56  ;;  %v1859_v60 = vadd.f32 -2.101024e-06, %v1857_v7  ;;  %v1861_v6 = vmul.f32 -2.7261424e-10, %v1841_v36  ;;  %v1843_v3 = vmul.f32 %v1841_v36, %v1841_v36 }
 0x9f7   :  { %v1875_v28 = vadd.f32 -0.001682827, %v1873_v43  ;;  %v1871_v11 = vadd.f32 -0.014264739, %v1869_v2  ;;  %v1847_v42 = vadd.f32 -0.016096033, %v1845_v5  ;;  %v1898_v24 = vpack.c.bf16 %v1896_v54, %v1896_v54 }
 0x9f8   :  { %v1853_v46 = vmul.f32 %v1851_v32, %v1841_v36  ;;  %v1863_v47 = vadd.f32 %v1861_v6, %v1859_v60  ;;  %v1881_v38 = vmul.f32 -1.45660715e-05, %v1843_v3 }
 0x9f9   :  { %v1877_v14 = vmul.f32 %v1875_v28, %v1841_v36  ;;  %v1904_v35 = vunpack.c.l.b16 %v1898_v24 }
 0x9fa   :  { %v1855_v13 = vadd.f32 %v1853_v46, %v1847_v42  ;;  %v1865_v34 = vmul.f32 %v1863_v47, %v1843_v3 }
 0x9fb   :  { %v1879_v18 = vadd.f32 %v1877_v14, %v1871_v11  ;;  %v1906_v21 = vrot.slane %v1904_v35, 1 }
 0x9fc   :  { %v1867_v23 = vadd.f32 %v1865_v34, %v1855_v13 }
 0x9fd   :  { %v1883_v61 = vadd.f32 %v1881_v38, %v1879_v18 }
 0x9fe   :  { %v1885_v22 = vmul.f32 %v2117_v8, %v1867_v23 }
 0x9ff   :  { %2266 = vrcp.f32 %v1883_v61 }
 0xa05   :  { %v2267_v25 = vpop.eup %2266 }
 0xa06   :  { %v1889_v45 = vmul.f32 %v2267_v25, %v1885_v22 }
 0xa08   :  { %v2119_v16 = vclamps-f32 %v1889_v45, 1.0 }
 0xa0a   :  { %v1895_v44 = vadd.f32 1.0, %v2119_v16 }
 0xa0c   :  { %v1897_v30 = vmul.f32 %v1895_v44, %v1831_v19 }
 0xa0e   :  { %v1899_v37 = vpack.c.bf16 %v1897_v30, %v1897_v30 }
 0xa10   :  { %v1905_v53 = vunpack.c.l.b16 %v1899_v37 }
 0xa12   :  { %v1930_v26 = vrot.slane %v1905_v53, 7  ;;  %v1908_v27 = vsel %vm1907_vm8, %v1905_v53, %v1906_v21 }
 0xa13   :  { %v1909_v31 = vpack.c.b16 %v1908_v27, %v1908_v27 }
 0xa14   :  { %v1931_v40 = vsel %vm1907_vm8, %v1930_v26, %v1904_v35 }
 0xa15   :  { %2120 = vmatmul.msk.bf16.vlgmr.msrb.gmra.mxu0 %vm685_vm9, %v1909_v31  ;;  %v1932_v15 = vpack.c.b16 %v1931_v40, %v1931_v40 }
 0xa17   :  { %2121 = vmatmul.msk.bf16.vlgmr.msrb.gmra.mxu3 %vm685_vm9, %v1932_v15 }
 0xa92   :  { %v1925_v1 = vpop.f32.mrf.mxu0 }
 0xa9a   :  { %v1927_v0 = vpop.f32.mrf.mxu0  ;;  %v1948_v48 = vpop.f32.mrf.mxu3 }
 0xa9b   :  { %v1949_v41 = vadd.f32 %v1948_v48, %v1925_v1 }
 0xa9d   :  { %v1953_v49 = vadd.f32 %v2171_v52, %v1949_v41 }
 0xa9f   :  { %1955 = vst.msk [vmem:[#allocation8] sm:$0x3] %vm1954_vm2, %v1953_v49 }
 0xaa0   :  { %1966 = dma.vmem_to_hbm [thread:$0]  %s1962_s2, 32, %s1964_s5, [#allocation4]  }
 0xaa2   :  { %v1950_v39 = vpop.f32.mrf.mxu3 }
 0xaa3   :  { %2368 = dma.done.wait [#allocation4], 32  }
 0xaa4   :  { %2369 = vsyncadd [#allocation4], 4294967264 }
 0xaa5   :  { %1971 = vsyncpa [#allocation3], 1 }
 0xaa6   :  { %1972 = vsyncpa [#allocation6], 1 }
 0xaa7   :  { %1973 = vsyncpa [#allocation4], 1 }

</bundles_post_ra>
